<compile_context>
chip_gen: v7x
topology: tpu7x:2x2x1
jax: 0.10.0
libtpu: 0.0.40
codegen_flags: <defaults>
</compile_context>

<pallas_src>
import functools

import jax
import jax.numpy as jnp
from jax import lax
from jax.experimental import pallas as pl
from jax.experimental.pallas import tpu as pltpu


def _round_up(x, m):
    return -(-x // m) * m


def _dncnn_kernel(x_ref, w_first_ref, w_mid_ref, scale_ref, bias_ref,
                  w_last_ref, mask_ref, o_ref, act_ref,
                  *, K, p, Wp, G, Sp, Lmid, compute_dtype, unroll_mid):
    """Fused DnCNN forward for one image (channels-first, flat padded spatial).

    x_ref       : (1, Cin_p, Sbuf)    flat padded input (+ G-wide zero guards)
    w_first_ref : (KK, Cp, Cin_p)     first conv, per-tap (cout, cin) matrices
    w_mid_ref   : (Lmid, KK, Cp, Cp)  middle convs
    scale_ref   : (Lmid, Cp, 1)       folded BatchNorm scale (f32)
    bias_ref    : (Lmid, Cp, 1)       folded BatchNorm bias  (f32)
    w_last_ref  : (KK, Cout_r, Cp)    final conv
    mask_ref    : (1, Sp)             1.0 on interior pixels, 0 on halo / tail
    o_ref       : (1, Cout_r, Sp)     output on the flat padded grid (f32)
    act_ref     : (2, Cp, Sbuf)       ping-pong activations (VMEM scratch)
    """
    cdt = compute_dtype
    Cp = act_ref.shape[1]
    Sbuf = act_ref.shape[2]
    mask = mask_ref[...]                              # (1, Sp) f32

    # The G-wide guard strips of both ping-pong buffers must read as zero.
    # Layers never write them, so clear them every grid step (cheap, aligned,
    # and megacore-safe: no reliance on scratch persistence across steps).
    for b in range(2):
        act_ref[b, :, :G] = jnp.zeros((Cp, G), cdt)
        act_ref[b, :, G + Sp:] = jnp.zeros((Cp, Sbuf - G - Sp), cdt)

    def conv_taps(load_slice, w_of_tap):
        """Slab-free 3x3 conv: 9 shifted matmuls, f32 accumulation.

        Output pixel j (flat padded grid) needs src[j + s], s=(ky-p)*Wp+(kx-p).
        The zero guards keep every static slice in-bounds and make interior
        outputs exact; halo / tail outputs are garbage and masked afterwards.
        """
        acc = None
        for ky in range(K):
            for kx in range(K):
                t = ky * K + kx
                s = (ky - p) * Wp + (kx - p)
                xt = load_slice(G + s)                 # (cin_rows, Sp)
                part = jnp.dot(w_of_tap(t), xt,
                               preferred_element_type=jnp.float32)
                acc = part if acc is None else acc + part
        return acc                                     # (cout_rows, Sp) f32

    # ---- layer 0: Conv + ReLU (reads the HBM input block) ----
    acc = conv_taps(lambda st: x_ref[0, :, st:st + Sp],
                    lambda t: w_first_ref[t])
    act_ref[0, :, G:G + Sp] = (jnp.maximum(acc, 0.0) * mask).astype(cdt)

    # ---- middle layers: Conv + folded-BN + ReLU on ping-pong buffers ----
    def mid_layer(m, src, dst):
        w_l = w_mid_ref[m]                             # (KK, Cp, Cp)
        acc = conv_taps(lambda st: act_ref[src, :, st:st + Sp],
                        lambda t: w_l[t])
        y = acc * scale_ref[m] + bias_ref[m]           # eval-mode BatchNorm
        y = jnp.maximum(y, 0.0) * mask                 # ReLU + re-zero halo
        act_ref[dst, :, G:G + Sp] = y.astype(cdt)

    if unroll_mid:
        for m in range(Lmid):
            mid_layer(m, m % 2, (m + 1) % 2)
    else:
        # Production depth (DnCNN: 17-20 layers): keep the hot loop compact;
        # pl.when on the parity keeps the ping-pong buffer indices static.
        def body(m, carry):
            even = lax.rem(m, 2) == 0

            @pl.when(even)
            def _():
                mid_layer(m, 0, 1)

            @pl.when(jnp.logical_not(even))
            def _():
                mid_layer(m, 1, 0)

            return carry

        lax.fori_loop(0, Lmid, body, 0)

    # ---- final layer: plain Conv, store only the real output channels ----
    acc = conv_taps(lambda st: act_ref[Lmid % 2, :, st:st + Sp],
                    lambda t: w_last_ref[t])
    o_ref[0] = (acc * mask).astype(o_ref.dtype)


def dncnn_forward(x_nchw, params, compute_dtype=jnp.bfloat16):
    """Run the fused DnCNN Pallas kernel.  x_nchw: (N, C, H, W) float32."""
    N, Cin, H, W = x_nchw.shape
    L = len(params)
    assert L >= 3, "DnCNN: first conv, >=1 middle Conv+BN+ReLU, final conv"
    K = int(params[0]["w"].shape[0])
    p = (K - 1) // 2
    KK = K * K
    Hp, Wp = H + 2 * p, W + 2 * p
    S = Hp * Wp                        # flat padded spatial size
    Sp = _round_up(S, 128)             # lane-dense working width
    E = p * Wp + p                     # max |shift| of a conv tap
    G = _round_up(E, 128)              # zero guard -> shifted slices in-bounds
    Sbuf = G + Sp + G

    Cmid = int(params[0]["w"].shape[-1])      # working channels
    Cout = int(params[-1]["w"].shape[-1])     # network output channels
    Cp = _round_up(Cmid, 8)                   # channels sit on sublanes now
    Cin_p = _round_up(Cin, 8)
    Cout_r = _round_up(Cout, 8)
    Lmid = L - 2

    def pack_w(w, co_pad, ci_pad):
        # HWIO (K,K,ci,co) -> (KK, co_pad, ci_pad) with [t,co,ci] = w[ky,kx,ci,co]
        ci, co = int(w.shape[2]), int(w.shape[3])
        wt = jnp.transpose(w, (0, 1, 3, 2)).reshape(KK, co, ci)
        wt = jnp.pad(wt, ((0, 0), (0, co_pad - co), (0, ci_pad - ci)))
        return wt.astype(compute_dtype)

    w_first = pack_w(params[0]["w"], Cp, Cin_p)
    w_mid = jnp.stack([pack_w(params[1 + m]["w"], Cp, Cp) for m in range(Lmid)])
    w_last = pack_w(params[-1]["w"], Cout_r, Cp)
    # Padded channels keep scale = bias = 0 so they stay exactly zero between
    # layers (invariant required by the shared channel padding).
    scale_mid = jnp.stack([jnp.pad(params[1 + m]["scale"].astype(jnp.float32),
                                   (0, Cp - Cmid)) for m in range(Lmid)])
    bias_mid = jnp.stack([jnp.pad(params[1 + m]["bias"].astype(jnp.float32),
                                  (0, Cp - Cmid)) for m in range(Lmid)])
    scale_mid = scale_mid.reshape(Lmid, Cp, 1)
    bias_mid = bias_mid.reshape(Lmid, Cp, 1)

    # Interior mask on the flat padded grid (0 on halo rows/cols and lane tail).
    mask2d = jnp.zeros((Hp, Wp), jnp.float32).at[p:Hp - p, p:Wp - p].set(1.0)
    mask = jnp.pad(mask2d.reshape(1, S), ((0, 0), (0, Sp - S)))

    # NCHW -> channels-first flat padded layout with G-wide zero guards.
    x = x_nchw.astype(jnp.float32)
    x = jnp.pad(x, ((0, 0), (0, Cin_p - Cin), (p, p), (p, p)))  # (N,Cin_p,Hp,Wp)
    x_buf = jnp.pad(x.reshape(N, Cin_p, S),
                    ((0, 0), (0, 0), (G, Sbuf - G - S))).astype(compute_dtype)

    # Generation-aware VMEM budget (v7x: 64 MiB/TC; v5e/v6e: 128 MiB).
    try:
        vmem_cap = int(pltpu.get_tpu_info().vmem_capacity_bytes)
    except Exception:
        vmem_cap = 64 * 1024 * 1024
    vmem_budget = vmem_cap // 2
    itemsize = jnp.dtype(compute_dtype).itemsize
    vmem_bytes = (
        2 * Cp * Sbuf * itemsize                        # ping-pong activations
        + 2 * Cin_p * Sbuf * itemsize                   # double-buffered input
        + 2 * Cout_r * Sp * 4                           # double-buffered output
        + 2 * (KK * Cp * Cin_p + Lmid * KK * Cp * Cp
               + KK * Cout_r * Cp) * itemsize           # resident weights
        + 2 * (2 * Lmid * Cp + Sp) * 4)                 # affines + mask
    assert vmem_bytes < vmem_budget, (
        f"fused full-image blocks need ~{vmem_bytes} B of VMEM "
        f"(budget {vmem_budget} B); add row-band spatial tiling")

    kernel = functools.partial(
        _dncnn_kernel, K=K, p=p, Wp=Wp, G=G, Sp=Sp, Lmid=Lmid,
        compute_dtype=compute_dtype, unroll_mid=Lmid <= 4)

    out = pl.pallas_call(
        kernel,
        out_shape=jax.ShapeDtypeStruct((N, Cout_r, Sp), jnp.float32),
        grid=(N,),
        in_specs=[
            pl.BlockSpec((1, Cin_p, Sbuf), lambda n: (n, 0, 0)),
            # Constant index_map => weights / affines / mask are VMEM-resident.
            pl.BlockSpec((KK, Cp, Cin_p), lambda n: (0, 0, 0)),
            pl.BlockSpec((Lmid, KK, Cp, Cp), lambda n: (0, 0, 0, 0)),
            pl.BlockSpec((Lmid, Cp, 1), lambda n: (0, 0, 0)),
            pl.BlockSpec((Lmid, Cp, 1), lambda n: (0, 0, 0)),
            pl.BlockSpec((KK, Cout_r, Cp), lambda n: (0, 0, 0)),
            pl.BlockSpec((1, Sp), lambda n: (0, 0)),
        ],
        out_specs=pl.BlockSpec((1, Cout_r, Sp), lambda n: (n, 0, 0)),
        scratch_shapes=[pltpu.VMEM((2, Cp, Sbuf), compute_dtype)],
        compiler_params=pltpu.CompilerParams(
            dimension_semantics=("parallel",),      # images shard across cores
            vmem_limit_bytes=vmem_budget),
    )(x_buf, w_first, w_mid, scale_mid, bias_mid, w_last, mask)

    # Drop lane-pad tail, halo and channel padding; result is already NCHW.
    out = out[:, :Cout, :S].reshape(N, Cout, Hp, Wp)
    return out[:, :, p:p + H, p:p + W]


def init_dncnn_params(key, num_layers, input_channels, output_channels,
                      filter_size, eps=1e-5):
    """Deterministic parameters. Weights follow PyTorch Conv2d (OIHW) init,
    converted to HWIO. BatchNorm is eval-mode: folded into (scale, bias)."""
    params = []

    def make_conv(key, cin, cout):
        bound = 1.0 / (cin * filter_size * filter_size) ** 0.5
        w_oihw = jax.random.uniform(
            key, (cout, cin, filter_size, filter_size),
            minval=-bound, maxval=bound, dtype=jnp.float32)
        return jnp.transpose(w_oihw, (2, 3, 1, 0))  # -> HWIO

    keys = jax.random.split(key, 1 + 4 * num_layers + 1)
    ki = 0

    # CNN_ReLU: conv (no BN) + relu
    w = make_conv(keys[ki], input_channels, output_channels); ki += 1
    params.append(dict(w=w, scale=jnp.ones((output_channels,), jnp.float32),
                       bias=jnp.zeros((output_channels,), jnp.float32),
                       relu=True))

    # num_layers x CNN_BN_ReLU (BN folded to per-channel scale/bias)
    for _ in range(num_layers):
        w = make_conv(keys[ki], output_channels, output_channels); ki += 1
        gamma = 1.0 + 0.1 * jax.random.normal(keys[ki], (output_channels,)); ki += 1
        beta = 0.1 * jax.random.normal(keys[ki], (output_channels,)); ki += 1
        rmean = 0.1 * jax.random.normal(keys[ki], (output_channels,)); ki += 1
        rvar = jnp.ones((output_channels,), jnp.float32)
        scale = gamma / jnp.sqrt(rvar + eps)
        bias = beta - rmean * scale
        params.append(dict(w=w, scale=scale.astype(jnp.float32),
                           bias=bias.astype(jnp.float32), relu=True))
        # TODO(synk): PyTorch training-mode BN uses batch statistics; eval-mode
        # running stats are folded here instead.

    # final CNN: conv only
    w = make_conv(keys[ki], output_channels, input_channels); ki += 1
    params.append(dict(w=w, scale=jnp.ones((input_channels,), jnp.float32),
                       bias=jnp.zeros((input_channels,), jnp.float32),
                       relu=False))
    return params


def _reference_forward(x_nchw, params):
    """Pure-JAX f32 reference (lax conv) for correctness checking."""
    x = x_nchw.astype(jnp.float32)
    for layer in params:
        w_oihw = jnp.transpose(layer["w"], (3, 2, 0, 1))
        K = w_oihw.shape[-1]
        p = (K - 1) // 2
        y = lax.conv_general_dilated(
            x, w_oihw, window_strides=(1, 1), padding=[(p, p), (p, p)],
            dimension_numbers=("NCHW", "OIHW", "NCHW"))
        y = y * layer["scale"][None, :, None, None] + \
            layer["bias"][None, :, None, None]
        if layer["relu"]:
            y = jnp.maximum(y, 0.0)
        x = y
    return x


if __name__ == "__main__":
    num_layers = 2
    input_channels = 4
    output_channels = 16
    filter_size = 3

    key = jax.random.PRNGKey(0)
    kx, kp = jax.random.split(key)
    x = jax.random.normal(kx, (2, input_channels, 16, 16), dtype=jnp.float32)
    params = init_dncnn_params(kp, num_layers, input_channels,
                               output_channels, filter_size)

    ref = _reference_forward(x, params)

    # f32 compute path: tight tolerance against the lax.conv reference.
    out_f32 = jax.block_until_ready(
        dncnn_forward(x, params, compute_dtype=jnp.float32))
    assert out_f32.shape == ref.shape
    assert jnp.allclose(out_f32, ref, atol=1e-4, rtol=1e-4), \
        f"f32 max err {jnp.max(jnp.abs(out_f32 - ref))}"

    # Default bf16-MXU / f32-accumulate path: looser tolerance vs f32 reference.
    out_bf16 = jax.block_until_ready(dncnn_forward(x, params))
    assert out_bf16.shape == ref.shape
    assert jnp.allclose(out_bf16, ref, atol=5e-2, rtol=5e-2), \
        f"bf16 max err {jnp.max(jnp.abs(out_bf16 - ref))}"

    print("KERNEL_OK")
</pallas_src>

<mosaic_0001>
module attributes {stable_mosaic.version = 11 : i64} {
  func.func @_dncnn_kernel(%arg0: i32, %arg1: memref<1x8x640xf32, #tpu.memory_space<vmem>>, %arg2: memref<9x16x8xf32, #tpu.memory_space<vmem>>, %arg3: memref<2x9x16x16xf32, #tpu.memory_space<vmem>>, %arg4: memref<2x16x1xf32, #tpu.memory_space<vmem>>, %arg5: memref<2x16x1xf32, #tpu.memory_space<vmem>>, %arg6: memref<9x8x16xf32, #tpu.memory_space<vmem>>, %arg7: memref<1x384xf32, #tpu.memory_space<vmem>>, %arg8: memref<1x8x384xf32, #tpu.memory_space<vmem>>, %arg9: memref<2x16x640xf32, #tpu.memory_space<vmem>>) attributes {dimension_semantics = [#tpu.dimension_semantics<parallel>], iteration_bounds = array<i64: 2>, scalar_prefetch = 0 : i64, scratch_operands = 1 : i64, tpu.core_type = #tpu.core_type<tc>, window_params = [{transform_indices = @transform_0, window_bounds = array<i64: 1, 8, 640>}, {pipeline_mode = #tpu.pipeline_mode<synchronous>, transform_indices = @transform_1, window_bounds = array<i64: 9, 16, 8>}, {pipeline_mode = #tpu.pipeline_mode<synchronous>, transform_indices = @transform_2, window_bounds = array<i64: 2, 9, 16, 16>}, {pipeline_mode = #tpu.pipeline_mode<synchronous>, transform_indices = @transform_3, window_bounds = array<i64: 2, 16, 1>}, {pipeline_mode = #tpu.pipeline_mode<synchronous>, transform_indices = @transform_4, window_bounds = array<i64: 2, 16, 1>}, {pipeline_mode = #tpu.pipeline_mode<synchronous>, transform_indices = @transform_5, window_bounds = array<i64: 9, 8, 16>}, {pipeline_mode = #tpu.pipeline_mode<synchronous>, transform_indices = @transform_6, window_bounds = array<i64: 1, 384>}, {transform_indices = @transform_7, window_bounds = array<i64: 1, 8, 384>}]} {
    %c0 = arith.constant 0 : index
    %c0_0 = arith.constant 0 : index
    %0 = vector.load %arg7[%c0, %c0_0] : memref<1x384xf32, #tpu.memory_space<vmem>>, vector<1x384xf32>
    %cst = arith.constant 0.000000e+00 : f32
    %1 = vector.broadcast %cst : f32 to vector<16x128xf32>
    %c0_1 = arith.constant 0 : index
    %c0_2 = arith.constant 0 : index
    %c0_3 = arith.constant 0 : index
    %2 = vector.load %arg9[%c0_1, %c0_2, %c0_3] : memref<2x16x640xf32, #tpu.memory_space<vmem>>, vector<1x16x128xf32>
    %3 = vector.shape_cast %2 : vector<1x16x128xf32> to vector<16x128xf32>
    %4 = vector.shape_cast %1 : vector<16x128xf32> to vector<1x16x128xf32>
    tpu.vector_store %arg9[%c0_1, %c0_2, %c0_3], %4 {strides = array<i32>} : memref<2x16x640xf32, #tpu.memory_space<vmem>>, vector<1x16x128xf32>,
    %cst_4 = arith.constant 0.000000e+00 : f32
    %5 = vector.broadcast %cst_4 : f32 to vector<16x128xf32>
    %c0_5 = arith.constant 0 : index
    %c0_6 = arith.constant 0 : index
    %c512 = arith.constant 512 : index
    %6 = vector.load %arg9[%c0_5, %c0_6, %c512] : memref<2x16x640xf32, #tpu.memory_space<vmem>>, vector<1x16x128xf32>
    %7 = vector.shape_cast %6 : vector<1x16x128xf32> to vector<16x128xf32>
    %8 = vector.shape_cast %5 : vector<16x128xf32> to vector<1x16x128xf32>
    tpu.vector_store %arg9[%c0_5, %c0_6, %c512], %8 {strides = array<i32>} : memref<2x16x640xf32, #tpu.memory_space<vmem>>, vector<1x16x128xf32>,
    %cst_7 = arith.constant 0.000000e+00 : f32
    %9 = vector.broadcast %cst_7 : f32 to vector<16x128xf32>
    %c1 = arith.constant 1 : index
    %c0_8 = arith.constant 0 : index
    %c0_9 = arith.constant 0 : index
    %10 = vector.load %arg9[%c1, %c0_8, %c0_9] : memref<2x16x640xf32, #tpu.memory_space<vmem>>, vector<1x16x128xf32>
    %11 = vector.shape_cast %10 : vector<1x16x128xf32> to vector<16x128xf32>
    %12 = vector.shape_cast %9 : vector<16x128xf32> to vector<1x16x128xf32>
    tpu.vector_store %arg9[%c1, %c0_8, %c0_9], %12 {strides = array<i32>} : memref<2x16x640xf32, #tpu.memory_space<vmem>>, vector<1x16x128xf32>,
    %cst_10 = arith.constant 0.000000e+00 : f32
    %13 = vector.broadcast %cst_10 : f32 to vector<16x128xf32>
    %c1_11 = arith.constant 1 : index
    %c0_12 = arith.constant 0 : index
    %c512_13 = arith.constant 512 : index
    %14 = vector.load %arg9[%c1_11, %c0_12, %c512_13] : memref<2x16x640xf32, #tpu.memory_space<vmem>>, vector<1x16x128xf32>
    %15 = vector.shape_cast %14 : vector<1x16x128xf32> to vector<16x128xf32>
    %16 = vector.shape_cast %13 : vector<16x128xf32> to vector<1x16x128xf32>
    tpu.vector_store %arg9[%c1_11, %c0_12, %c512_13], %16 {strides = array<i32>} : memref<2x16x640xf32, #tpu.memory_space<vmem>>, vector<1x16x128xf32>,
    %c0_14 = arith.constant 0 : index
    %c0_15 = arith.constant 0 : index
    %c109 = arith.constant 109 : index
    %17 = vector.load %arg1[%c0_14, %c0_15, %c109] : memref<1x8x640xf32, #tpu.memory_space<vmem>>, vector<1x8x384xf32>
    %18 = vector.shape_cast %17 : vector<1x8x384xf32> to vector<8x384xf32>
    %c0_16 = arith.constant 0 : index
    %c0_17 = arith.constant 0 : index
    %c0_18 = arith.constant 0 : index
    %19 = vector.load %arg2[%c0_16, %c0_17, %c0_18] : memref<9x16x8xf32, #tpu.memory_space<vmem>>, vector<1x16x8xf32>
    %20 = vector.shape_cast %19 : vector<1x16x8xf32> to vector<16x8xf32>
    %cst_19 = arith.constant dense<0.000000e+00> : vector<16x384xf32>
    %21 = tpu.matmul %20, %18, %cst_19 {dimension_numbers = #tpu.dot_dimension_numbers<[1], [0], [0], [1], [0, 0, 1, 1], [], []>} : vector<16x8xf32>, vector<8x384xf32>, vector<16x384xf32> -> vector<16x384xf32>
    %c0_20 = arith.constant 0 : index
    %c0_21 = arith.constant 0 : index
    %c110 = arith.constant 110 : index
    %22 = vector.load %arg1[%c0_20, %c0_21, %c110] : memref<1x8x640xf32, #tpu.memory_space<vmem>>, vector<1x8x384xf32>
    %23 = vector.shape_cast %22 : vector<1x8x384xf32> to vector<8x384xf32>
    %c1_22 = arith.constant 1 : index
    %c0_23 = arith.constant 0 : index
    %c0_24 = arith.constant 0 : index
    %24 = vector.load %arg2[%c1_22, %c0_23, %c0_24] : memref<9x16x8xf32, #tpu.memory_space<vmem>>, vector<1x16x8xf32>
    %25 = vector.shape_cast %24 : vector<1x16x8xf32> to vector<16x8xf32>
    %cst_25 = arith.constant dense<0.000000e+00> : vector<16x384xf32>
    %26 = tpu.matmul %25, %23, %cst_25 {dimension_numbers = #tpu.dot_dimension_numbers<[1], [0], [0], [1], [0, 0, 1, 1], [], []>} : vector<16x8xf32>, vector<8x384xf32>, vector<16x384xf32> -> vector<16x384xf32>
    %27 = arith.addf %21, %26 : vector<16x384xf32>
    %c0_26 = arith.constant 0 : index
    %c0_27 = arith.constant 0 : index
    %c111 = arith.constant 111 : index
    %28 = vector.load %arg1[%c0_26, %c0_27, %c111] : memref<1x8x640xf32, #tpu.memory_space<vmem>>, vector<1x8x384xf32>
    %29 = vector.shape_cast %28 : vector<1x8x384xf32> to vector<8x384xf32>
    %c2 = arith.constant 2 : index
    %c0_28 = arith.constant 0 : index
    %c0_29 = arith.constant 0 : index
    %30 = vector.load %arg2[%c2, %c0_28, %c0_29] : memref<9x16x8xf32, #tpu.memory_space<vmem>>, vector<1x16x8xf32>
    %31 = vector.shape_cast %30 : vector<1x16x8xf32> to vector<16x8xf32>
    %cst_30 = arith.constant dense<0.000000e+00> : vector<16x384xf32>
    %32 = tpu.matmul %31, %29, %cst_30 {dimension_numbers = #tpu.dot_dimension_numbers<[1], [0], [0], [1], [0, 0, 1, 1], [], []>} : vector<16x8xf32>, vector<8x384xf32>, vector<16x384xf32> -> vector<16x384xf32>
    %33 = arith.addf %27, %32 : vector<16x384xf32>
    %c0_31 = arith.constant 0 : index
    %c0_32 = arith.constant 0 : index
    %c127 = arith.constant 127 : index
    %34 = vector.load %arg1[%c0_31, %c0_32, %c127] : memref<1x8x640xf32, #tpu.memory_space<vmem>>, vector<1x8x384xf32>
    %35 = vector.shape_cast %34 : vector<1x8x384xf32> to vector<8x384xf32>
    %c3 = arith.constant 3 : index
    %c0_33 = arith.constant 0 : index
    %c0_34 = arith.constant 0 : index
    %36 = vector.load %arg2[%c3, %c0_33, %c0_34] : memref<9x16x8xf32, #tpu.memory_space<vmem>>, vector<1x16x8xf32>
    %37 = vector.shape_cast %36 : vector<1x16x8xf32> to vector<16x8xf32>
    %cst_35 = arith.constant dense<0.000000e+00> : vector<16x384xf32>
    %38 = tpu.matmul %37, %35, %cst_35 {dimension_numbers = #tpu.dot_dimension_numbers<[1], [0], [0], [1], [0, 0, 1, 1], [], []>} : vector<16x8xf32>, vector<8x384xf32>, vector<16x384xf32> -> vector<16x384xf32>
    %39 = arith.addf %33, %38 : vector<16x384xf32>
    %c0_36 = arith.constant 0 : index
    %c0_37 = arith.constant 0 : index
    %c128 = arith.constant 128 : index
    %40 = vector.load %arg1[%c0_36, %c0_37, %c128] : memref<1x8x640xf32, #tpu.memory_space<vmem>>, vector<1x8x384xf32>
    %41 = vector.shape_cast %40 : vector<1x8x384xf32> to vector<8x384xf32>
    %c4 = arith.constant 4 : index
    %c0_38 = arith.constant 0 : index
    %c0_39 = arith.constant 0 : index
    %42 = vector.load %arg2[%c4, %c0_38, %c0_39] : memref<9x16x8xf32, #tpu.memory_space<vmem>>, vector<1x16x8xf32>
    %43 = vector.shape_cast %42 : vector<1x16x8xf32> to vector<16x8xf32>
    %cst_40 = arith.constant dense<0.000000e+00> : vector<16x384xf32>
    %44 = tpu.matmul %43, %41, %cst_40 {dimension_numbers = #tpu.dot_dimension_numbers<[1], [0], [0], [1], [0, 0, 1, 1], [], []>} : vector<16x8xf32>, vector<8x384xf32>, vector<16x384xf32> -> vector<16x384xf32>
    %45 = arith.addf %39, %44 : vector<16x384xf32>
    %c0_41 = arith.constant 0 : index
    %c0_42 = arith.constant 0 : index
    %c129 = arith.constant 129 : index
    %46 = vector.load %arg1[%c0_41, %c0_42, %c129] : memref<1x8x640xf32, #tpu.memory_space<vmem>>, vector<1x8x384xf32>
    %47 = vector.shape_cast %46 : vector<1x8x384xf32> to vector<8x384xf32>
    %c5 = arith.constant 5 : index
    %c0_43 = arith.constant 0 : index
    %c0_44 = arith.constant 0 : index
    %48 = vector.load %arg2[%c5, %c0_43, %c0_44] : memref<9x16x8xf32, #tpu.memory_space<vmem>>, vector<1x16x8xf32>
    %49 = vector.shape_cast %48 : vector<1x16x8xf32> to vector<16x8xf32>
    %cst_45 = arith.constant dense<0.000000e+00> : vector<16x384xf32>
    %50 = tpu.matmul %49, %47, %cst_45 {dimension_numbers = #tpu.dot_dimension_numbers<[1], [0], [0], [1], [0, 0, 1, 1], [], []>} : vector<16x8xf32>, vector<8x384xf32>, vector<16x384xf32> -> vector<16x384xf32>
    %51 = arith.addf %45, %50 : vector<16x384xf32>
    %c0_46 = arith.constant 0 : index
    %c0_47 = arith.constant 0 : index
    %c145 = arith.constant 145 : index
    %52 = vector.load %arg1[%c0_46, %c0_47, %c145] : memref<1x8x640xf32, #tpu.memory_space<vmem>>, vector<1x8x384xf32>
    %53 = vector.shape_cast %52 : vector<1x8x384xf32> to vector<8x384xf32>
    %c6 = arith.constant 6 : index
    %c0_48 = arith.constant 0 : index
    %c0_49 = arith.constant 0 : index
    %54 = vector.load %arg2[%c6, %c0_48, %c0_49] : memref<9x16x8xf32, #tpu.memory_space<vmem>>, vector<1x16x8xf32>
    %55 = vector.shape_cast %54 : vector<1x16x8xf32> to vector<16x8xf32>
    %cst_50 = arith.constant dense<0.000000e+00> : vector<16x384xf32>
    %56 = tpu.matmul %55, %53, %cst_50 {dimension_numbers = #tpu.dot_dimension_numbers<[1], [0], [0], [1], [0, 0, 1, 1], [], []>} : vector<16x8xf32>, vector<8x384xf32>, vector<16x384xf32> -> vector<16x384xf32>
    %57 = arith.addf %51, %56 : vector<16x384xf32>
    %c0_51 = arith.constant 0 : index
    %c0_52 = arith.constant 0 : index
    %c146 = arith.constant 146 : index
    %58 = vector.load %arg1[%c0_51, %c0_52, %c146] : memref<1x8x640xf32, #tpu.memory_space<vmem>>, vector<1x8x384xf32>
    %59 = vector.shape_cast %58 : vector<1x8x384xf32> to vector<8x384xf32>
    %c7 = arith.constant 7 : index
    %c0_53 = arith.constant 0 : index
    %c0_54 = arith.constant 0 : index
    %60 = vector.load %arg2[%c7, %c0_53, %c0_54] : memref<9x16x8xf32, #tpu.memory_space<vmem>>, vector<1x16x8xf32>
    %61 = vector.shape_cast %60 : vector<1x16x8xf32> to vector<16x8xf32>
    %cst_55 = arith.constant dense<0.000000e+00> : vector<16x384xf32>
    %62 = tpu.matmul %61, %59, %cst_55 {dimension_numbers = #tpu.dot_dimension_numbers<[1], [0], [0], [1], [0, 0, 1, 1], [], []>} : vector<16x8xf32>, vector<8x384xf32>, vector<16x384xf32> -> vector<16x384xf32>
    %63 = arith.addf %57, %62 : vector<16x384xf32>
    %c0_56 = arith.constant 0 : index
    %c0_57 = arith.constant 0 : index
    %c147 = arith.constant 147 : index
    %64 = vector.load %arg1[%c0_56, %c0_57, %c147] : memref<1x8x640xf32, #tpu.memory_space<vmem>>, vector<1x8x384xf32>
    %65 = vector.shape_cast %64 : vector<1x8x384xf32> to vector<8x384xf32>
    %c8 = arith.constant 8 : index
    %c0_58 = arith.constant 0 : index
    %c0_59 = arith.constant 0 : index
    %66 = vector.load %arg2[%c8, %c0_58, %c0_59] : memref<9x16x8xf32, #tpu.memory_space<vmem>>, vector<1x16x8xf32>
    %67 = vector.shape_cast %66 : vector<1x16x8xf32> to vector<16x8xf32>
    %cst_60 = arith.constant dense<0.000000e+00> : vector<16x384xf32>
    %68 = tpu.matmul %67, %65, %cst_60 {dimension_numbers = #tpu.dot_dimension_numbers<[1], [0], [0], [1], [0, 0, 1, 1], [], []>} : vector<16x8xf32>, vector<8x384xf32>, vector<16x384xf32> -> vector<16x384xf32>
    %69 = arith.addf %63, %68 : vector<16x384xf32>
    %cst_61 = arith.constant 0.000000e+00 : f32
    %70 = vector.broadcast %cst_61 : f32 to vector<16x384xf32>
    %71 = arith.maximumf %69, %70 : vector<16x384xf32>
    %72 = vector.broadcast %0 : vector<1x384xf32> to vector<16x384xf32>
    %73 = arith.mulf %71, %72 : vector<16x384xf32>
    %c0_62 = arith.constant 0 : index
    %c0_63 = arith.constant 0 : index
    %c128_64 = arith.constant 128 : index
    %74 = vector.load %arg9[%c0_62, %c0_63, %c128_64] : memref<2x16x640xf32, #tpu.memory_space<vmem>>, vector<1x16x384xf32>
    %75 = vector.shape_cast %74 : vector<1x16x384xf32> to vector<16x384xf32>
    %76 = vector.shape_cast %73 : vector<16x384xf32> to vector<1x16x384xf32>
    tpu.vector_store %arg9[%c0_62, %c0_63, %c128_64], %76 {strides = array<i32>} : memref<2x16x640xf32, #tpu.memory_space<vmem>>, vector<1x16x384xf32>,
    %c0_65 = arith.constant 0 : index
    %c0_66 = arith.constant 0 : index
    %c0_67 = arith.constant 0 : index
    %c0_68 = arith.constant 0 : index
    %77 = vector.load %arg3[%c0_65, %c0_66, %c0_67, %c0_68] : memref<2x9x16x16xf32, #tpu.memory_space<vmem>>, vector<1x9x16x16xf32>
    %78 = vector.shape_cast %77 : vector<1x9x16x16xf32> to vector<9x16x16xf32>
    %c0_69 = arith.constant 0 : index
    %c0_70 = arith.constant 0 : index
    %c109_71 = arith.constant 109 : index
    %79 = vector.load %arg9[%c0_69, %c0_70, %c109_71] : memref<2x16x640xf32, #tpu.memory_space<vmem>>, vector<1x16x384xf32>
    %80 = vector.shape_cast %79 : vector<1x16x384xf32> to vector<16x384xf32>
    %81 = vector.extract_strided_slice %78 {offsets = [0, 0, 0], sizes = [1, 16, 16], strides = [1, 1, 1]} : vector<9x16x16xf32> to vector<1x16x16xf32>
    %82 = vector.shape_cast %81 : vector<1x16x16xf32> to vector<16x16xf32>
    %cst_72 = arith.constant dense<0.000000e+00> : vector<16x384xf32>
    %83 = tpu.matmul %82, %80, %cst_72 {dimension_numbers = #tpu.dot_dimension_numbers<[1], [0], [0], [1], [0, 0, 1, 1], [], []>} : vector<16x16xf32>, vector<16x384xf32>, vector<16x384xf32> -> vector<16x384xf32>
    %c0_73 = arith.constant 0 : index
    %c0_74 = arith.constant 0 : index
    %c110_75 = arith.constant 110 : index
    %84 = vector.load %arg9[%c0_73, %c0_74, %c110_75] : memref<2x16x640xf32, #tpu.memory_space<vmem>>, vector<1x16x384xf32>
    %85 = vector.shape_cast %84 : vector<1x16x384xf32> to vector<16x384xf32>
    %86 = vector.extract_strided_slice %78 {offsets = [1, 0, 0], sizes = [1, 16, 16], strides = [1, 1, 1]} : vector<9x16x16xf32> to vector<1x16x16xf32>
    %87 = vector.shape_cast %86 : vector<1x16x16xf32> to vector<16x16xf32>
    %cst_76 = arith.constant dense<0.000000e+00> : vector<16x384xf32>
    %88 = tpu.matmul %87, %85, %cst_76 {dimension_numbers = #tpu.dot_dimension_numbers<[1], [0], [0], [1], [0, 0, 1, 1], [], []>} : vector<16x16xf32>, vector<16x384xf32>, vector<16x384xf32> -> vector<16x384xf32>
    %89 = arith.addf %83, %88 : vector<16x384xf32>
    %c0_77 = arith.constant 0 : index
    %c0_78 = arith.constant 0 : index
    %c111_79 = arith.constant 111 : index
    %90 = vector.load %arg9[%c0_77, %c0_78, %c111_79] : memref<2x16x640xf32, #tpu.memory_space<vmem>>, vector<1x16x384xf32>
    %91 = vector.shape_cast %90 : vector<1x16x384xf32> to vector<16x384xf32>
    %92 = vector.extract_strided_slice %78 {offsets = [2, 0, 0], sizes = [1, 16, 16], strides = [1, 1, 1]} : vector<9x16x16xf32> to vector<1x16x16xf32>
    %93 = vector.shape_cast %92 : vector<1x16x16xf32> to vector<16x16xf32>
    %cst_80 = arith.constant dense<0.000000e+00> : vector<16x384xf32>
    %94 = tpu.matmul %93, %91, %cst_80 {dimension_numbers = #tpu.dot_dimension_numbers<[1], [0], [0], [1], [0, 0, 1, 1], [], []>} : vector<16x16xf32>, vector<16x384xf32>, vector<16x384xf32> -> vector<16x384xf32>
    %95 = arith.addf %89, %94 : vector<16x384xf32>
    %c0_81 = arith.constant 0 : index
    %c0_82 = arith.constant 0 : index
    %c127_83 = arith.constant 127 : index
    %96 = vector.load %arg9[%c0_81, %c0_82, %c127_83] : memref<2x16x640xf32, #tpu.memory_space<vmem>>, vector<1x16x384xf32>
    %97 = vector.shape_cast %96 : vector<1x16x384xf32> to vector<16x384xf32>
    %98 = vector.extract_strided_slice %78 {offsets = [3, 0, 0], sizes = [1, 16, 16], strides = [1, 1, 1]} : vector<9x16x16xf32> to vector<1x16x16xf32>
    %99 = vector.shape_cast %98 : vector<1x16x16xf32> to vector<16x16xf32>
    %cst_84 = arith.constant dense<0.000000e+00> : vector<16x384xf32>
    %100 = tpu.matmul %99, %97, %cst_84 {dimension_numbers = #tpu.dot_dimension_numbers<[1], [0], [0], [1], [0, 0, 1, 1], [], []>} : vector<16x16xf32>, vector<16x384xf32>, vector<16x384xf32> -> vector<16x384xf32>
    %101 = arith.addf %95, %100 : vector<16x384xf32>
    %c0_85 = arith.constant 0 : index
    %c0_86 = arith.constant 0 : index
    %c128_87 = arith.constant 128 : index
    %102 = vector.load %arg9[%c0_85, %c0_86, %c128_87] : memref<2x16x640xf32, #tpu.memory_space<vmem>>, vector<1x16x384xf32>
    %103 = vector.shape_cast %102 : vector<1x16x384xf32> to vector<16x384xf32>
    %104 = vector.extract_strided_slice %78 {offsets = [4, 0, 0], sizes = [1, 16, 16], strides = [1, 1, 1]} : vector<9x16x16xf32> to vector<1x16x16xf32>
    %105 = vector.shape_cast %104 : vector<1x16x16xf32> to vector<16x16xf32>
    %cst_88 = arith.constant dense<0.000000e+00> : vector<16x384xf32>
    %106 = tpu.matmul %105, %103, %cst_88 {dimension_numbers = #tpu.dot_dimension_numbers<[1], [0], [0], [1], [0, 0, 1, 1], [], []>} : vector<16x16xf32>, vector<16x384xf32>, vector<16x384xf32> -> vector<16x384xf32>
    %107 = arith.addf %101, %106 : vector<16x384xf32>
    %c0_89 = arith.constant 0 : index
    %c0_90 = arith.constant 0 : index
    %c129_91 = arith.constant 129 : index
    %108 = vector.load %arg9[%c0_89, %c0_90, %c129_91] : memref<2x16x640xf32, #tpu.memory_space<vmem>>, vector<1x16x384xf32>
    %109 = vector.shape_cast %108 : vector<1x16x384xf32> to vector<16x384xf32>
    %110 = vector.extract_strided_slice %78 {offsets = [5, 0, 0], sizes = [1, 16, 16], strides = [1, 1, 1]} : vector<9x16x16xf32> to vector<1x16x16xf32>
    %111 = vector.shape_cast %110 : vector<1x16x16xf32> to vector<16x16xf32>
    %cst_92 = arith.constant dense<0.000000e+00> : vector<16x384xf32>
    %112 = tpu.matmul %111, %109, %cst_92 {dimension_numbers = #tpu.dot_dimension_numbers<[1], [0], [0], [1], [0, 0, 1, 1], [], []>} : vector<16x16xf32>, vector<16x384xf32>, vector<16x384xf32> -> vector<16x384xf32>
    %113 = arith.addf %107, %112 : vector<16x384xf32>
    %c0_93 = arith.constant 0 : index
    %c0_94 = arith.constant 0 : index
    %c145_95 = arith.constant 145 : index
    %114 = vector.load %arg9[%c0_93, %c0_94, %c145_95] : memref<2x16x640xf32, #tpu.memory_space<vmem>>, vector<1x16x384xf32>
    %115 = vector.shape_cast %114 : vector<1x16x384xf32> to vector<16x384xf32>
    %116 = vector.extract_strided_slice %78 {offsets = [6, 0, 0], sizes = [1, 16, 16], strides = [1, 1, 1]} : vector<9x16x16xf32> to vector<1x16x16xf32>
    %117 = vector.shape_cast %116 : vector<1x16x16xf32> to vector<16x16xf32>
    %cst_96 = arith.constant dense<0.000000e+00> : vector<16x384xf32>
    %118 = tpu.matmul %117, %115, %cst_96 {dimension_numbers = #tpu.dot_dimension_numbers<[1], [0], [0], [1], [0, 0, 1, 1], [], []>} : vector<16x16xf32>, vector<16x384xf32>, vector<16x384xf32> -> vector<16x384xf32>
    %119 = arith.addf %113, %118 : vector<16x384xf32>
    %c0_97 = arith.constant 0 : index
    %c0_98 = arith.constant 0 : index
    %c146_99 = arith.constant 146 : index
    %120 = vector.load %arg9[%c0_97, %c0_98, %c146_99] : memref<2x16x640xf32, #tpu.memory_space<vmem>>, vector<1x16x384xf32>
    %121 = vector.shape_cast %120 : vector<1x16x384xf32> to vector<16x384xf32>
    %122 = vector.extract_strided_slice %78 {offsets = [7, 0, 0], sizes = [1, 16, 16], strides = [1, 1, 1]} : vector<9x16x16xf32> to vector<1x16x16xf32>
    %123 = vector.shape_cast %122 : vector<1x16x16xf32> to vector<16x16xf32>
    %cst_100 = arith.constant dense<0.000000e+00> : vector<16x384xf32>
    %124 = tpu.matmul %123, %121, %cst_100 {dimension_numbers = #tpu.dot_dimension_numbers<[1], [0], [0], [1], [0, 0, 1, 1], [], []>} : vector<16x16xf32>, vector<16x384xf32>, vector<16x384xf32> -> vector<16x384xf32>
    %125 = arith.addf %119, %124 : vector<16x384xf32>
    %c0_101 = arith.constant 0 : index
    %c0_102 = arith.constant 0 : index
    %c147_103 = arith.constant 147 : index
    %126 = vector.load %arg9[%c0_101, %c0_102, %c147_103] : memref<2x16x640xf32, #tpu.memory_space<vmem>>, vector<1x16x384xf32>
    %127 = vector.shape_cast %126 : vector<1x16x384xf32> to vector<16x384xf32>
    %128 = vector.extract_strided_slice %78 {offsets = [8, 0, 0], sizes = [1, 16, 16], strides = [1, 1, 1]} : vector<9x16x16xf32> to vector<1x16x16xf32>
    %129 = vector.shape_cast %128 : vector<1x16x16xf32> to vector<16x16xf32>
    %cst_104 = arith.constant dense<0.000000e+00> : vector<16x384xf32>
    %130 = tpu.matmul %129, %127, %cst_104 {dimension_numbers = #tpu.dot_dimension_numbers<[1], [0], [0], [1], [0, 0, 1, 1], [], []>} : vector<16x16xf32>, vector<16x384xf32>, vector<16x384xf32> -> vector<16x384xf32>
    %131 = arith.addf %125, %130 : vector<16x384xf32>
    %c0_105 = arith.constant 0 : index
    %c0_106 = arith.constant 0 : index
    %c0_107 = arith.constant 0 : index
    %132 = vector.load %arg4[%c0_105, %c0_106, %c0_107] : memref<2x16x1xf32, #tpu.memory_space<vmem>>, vector<1x16x1xf32>
    %133 = vector.shape_cast %132 : vector<1x16x1xf32> to vector<16x1xf32>
    %134 = vector.broadcast %133 : vector<16x1xf32> to vector<16x384xf32>
    %135 = arith.mulf %131, %134 : vector<16x384xf32>
    %c0_108 = arith.constant 0 : index
    %c0_109 = arith.constant 0 : index
    %c0_110 = arith.constant 0 : index
    %136 = vector.load %arg5[%c0_108, %c0_109, %c0_110] : memref<2x16x1xf32, #tpu.memory_space<vmem>>, vector<1x16x1xf32>
    %137 = vector.shape_cast %136 : vector<1x16x1xf32> to vector<16x1xf32>
    %138 = vector.broadcast %137 : vector<16x1xf32> to vector<16x384xf32>
    %139 = arith.addf %135, %138 : vector<16x384xf32>
    %cst_111 = arith.constant 0.000000e+00 : f32
    %140 = vector.broadcast %cst_111 : f32 to vector<16x384xf32>
    %141 = arith.maximumf %139, %140 : vector<16x384xf32>
    %142 = vector.broadcast %0 : vector<1x384xf32> to vector<16x384xf32>
    %143 = arith.mulf %141, %142 : vector<16x384xf32>
    %c1_112 = arith.constant 1 : index
    %c0_113 = arith.constant 0 : index
    %c128_114 = arith.constant 128 : index
    %144 = vector.load %arg9[%c1_112, %c0_113, %c128_114] : memref<2x16x640xf32, #tpu.memory_space<vmem>>, vector<1x16x384xf32>
    %145 = vector.shape_cast %144 : vector<1x16x384xf32> to vector<16x384xf32>
    %146 = vector.shape_cast %143 : vector<16x384xf32> to vector<1x16x384xf32>
    tpu.vector_store %arg9[%c1_112, %c0_113, %c128_114], %146 {strides = array<i32>} : memref<2x16x640xf32, #tpu.memory_space<vmem>>, vector<1x16x384xf32>,
    %c1_115 = arith.constant 1 : index
    %c0_116 = arith.constant 0 : index
    %c0_117 = arith.constant 0 : index
    %c0_118 = arith.constant 0 : index
    %147 = vector.load %arg3[%c1_115, %c0_116, %c0_117, %c0_118] : memref<2x9x16x16xf32, #tpu.memory_space<vmem>>, vector<1x9x16x16xf32>
    %148 = vector.shape_cast %147 : vector<1x9x16x16xf32> to vector<9x16x16xf32>
    %c1_119 = arith.constant 1 : index
    %c0_120 = arith.constant 0 : index
    %c109_121 = arith.constant 109 : index
    %149 = vector.load %arg9[%c1_119, %c0_120, %c109_121] : memref<2x16x640xf32, #tpu.memory_space<vmem>>, vector<1x16x384xf32>
    %150 = vector.shape_cast %149 : vector<1x16x384xf32> to vector<16x384xf32>
    %151 = vector.extract_strided_slice %148 {offsets = [0, 0, 0], sizes = [1, 16, 16], strides = [1, 1, 1]} : vector<9x16x16xf32> to vector<1x16x16xf32>
    %152 = vector.shape_cast %151 : vector<1x16x16xf32> to vector<16x16xf32>
    %cst_122 = arith.constant dense<0.000000e+00> : vector<16x384xf32>
    %153 = tpu.matmul %152, %150, %cst_122 {dimension_numbers = #tpu.dot_dimension_numbers<[1], [0], [0], [1], [0, 0, 1, 1], [], []>} : vector<16x16xf32>, vector<16x384xf32>, vector<16x384xf32> -> vector<16x384xf32>
    %c1_123 = arith.constant 1 : index
    %c0_124 = arith.constant 0 : index
    %c110_125 = arith.constant 110 : index
    %154 = vector.load %arg9[%c1_123, %c0_124, %c110_125] : memref<2x16x640xf32, #tpu.memory_space<vmem>>, vector<1x16x384xf32>
    %155 = vector.shape_cast %154 : vector<1x16x384xf32> to vector<16x384xf32>
    %156 = vector.extract_strided_slice %148 {offsets = [1, 0, 0], sizes = [1, 16, 16], strides = [1, 1, 1]} : vector<9x16x16xf32> to vector<1x16x16xf32>
    %157 = vector.shape_cast %156 : vector<1x16x16xf32> to vector<16x16xf32>
    %cst_126 = arith.constant dense<0.000000e+00> : vector<16x384xf32>
    %158 = tpu.matmul %157, %155, %cst_126 {dimension_numbers = #tpu.dot_dimension_numbers<[1], [0], [0], [1], [0, 0, 1, 1], [], []>} : vector<16x16xf32>, vector<16x384xf32>, vector<16x384xf32> -> vector<16x384xf32>
    %159 = arith.addf %153, %158 : vector<16x384xf32>
    %c1_127 = arith.constant 1 : index
    %c0_128 = arith.constant 0 : index
    %c111_129 = arith.constant 111 : index
    %160 = vector.load %arg9[%c1_127, %c0_128, %c111_129] : memref<2x16x640xf32, #tpu.memory_space<vmem>>, vector<1x16x384xf32>
    %161 = vector.shape_cast %160 : vector<1x16x384xf32> to vector<16x384xf32>
    %162 = vector.extract_strided_slice %148 {offsets = [2, 0, 0], sizes = [1, 16, 16], strides = [1, 1, 1]} : vector<9x16x16xf32> to vector<1x16x16xf32>
    %163 = vector.shape_cast %162 : vector<1x16x16xf32> to vector<16x16xf32>
    %cst_130 = arith.constant dense<0.000000e+00> : vector<16x384xf32>
    %164 = tpu.matmul %163, %161, %cst_130 {dimension_numbers = #tpu.dot_dimension_numbers<[1], [0], [0], [1], [0, 0, 1, 1], [], []>} : vector<16x16xf32>, vector<16x384xf32>, vector<16x384xf32> -> vector<16x384xf32>
    %165 = arith.addf %159, %164 : vector<16x384xf32>
    %c1_131 = arith.constant 1 : index
    %c0_132 = arith.constant 0 : index
    %c127_133 = arith.constant 127 : index
    %166 = vector.load %arg9[%c1_131, %c0_132, %c127_133] : memref<2x16x640xf32, #tpu.memory_space<vmem>>, vector<1x16x384xf32>
    %167 = vector.shape_cast %166 : vector<1x16x384xf32> to vector<16x384xf32>
    %168 = vector.extract_strided_slice %148 {offsets = [3, 0, 0], sizes = [1, 16, 16], strides = [1, 1, 1]} : vector<9x16x16xf32> to vector<1x16x16xf32>
    %169 = vector.shape_cast %168 : vector<1x16x16xf32> to vector<16x16xf32>
    %cst_134 = arith.constant dense<0.000000e+00> : vector<16x384xf32>
    %170 = tpu.matmul %169, %167, %cst_134 {dimension_numbers = #tpu.dot_dimension_numbers<[1], [0], [0], [1], [0, 0, 1, 1], [], []>} : vector<16x16xf32>, vector<16x384xf32>, vector<16x384xf32> -> vector<16x384xf32>
    %171 = arith.addf %165, %170 : vector<16x384xf32>
    %c1_135 = arith.constant 1 : index
    %c0_136 = arith.constant 0 : index
    %c128_137 = arith.constant 128 : index
    %172 = vector.load %arg9[%c1_135, %c0_136, %c128_137] : memref<2x16x640xf32, #tpu.memory_space<vmem>>, vector<1x16x384xf32>
    %173 = vector.shape_cast %172 : vector<1x16x384xf32> to vector<16x384xf32>
    %174 = vector.extract_strided_slice %148 {offsets = [4, 0, 0], sizes = [1, 16, 16], strides = [1, 1, 1]} : vector<9x16x16xf32> to vector<1x16x16xf32>
    %175 = vector.shape_cast %174 : vector<1x16x16xf32> to vector<16x16xf32>
    %cst_138 = arith.constant dense<0.000000e+00> : vector<16x384xf32>
    %176 = tpu.matmul %175, %173, %cst_138 {dimension_numbers = #tpu.dot_dimension_numbers<[1], [0], [0], [1], [0, 0, 1, 1], [], []>} : vector<16x16xf32>, vector<16x384xf32>, vector<16x384xf32> -> vector<16x384xf32>
    %177 = arith.addf %171, %176 : vector<16x384xf32>
    %c1_139 = arith.constant 1 : index
    %c0_140 = arith.constant 0 : index
    %c129_141 = arith.constant 129 : index
    %178 = vector.load %arg9[%c1_139, %c0_140, %c129_141] : memref<2x16x640xf32, #tpu.memory_space<vmem>>, vector<1x16x384xf32>
    %179 = vector.shape_cast %178 : vector<1x16x384xf32> to vector<16x384xf32>
    %180 = vector.extract_strided_slice %148 {offsets = [5, 0, 0], sizes = [1, 16, 16], strides = [1, 1, 1]} : vector<9x16x16xf32> to vector<1x16x16xf32>
    %181 = vector.shape_cast %180 : vector<1x16x16xf32> to vector<16x16xf32>
    %cst_142 = arith.constant dense<0.000000e+00> : vector<16x384xf32>
    %182 = tpu.matmul %181, %179, %cst_142 {dimension_numbers = #tpu.dot_dimension_numbers<[1], [0], [0], [1], [0, 0, 1, 1], [], []>} : vector<16x16xf32>, vector<16x384xf32>, vector<16x384xf32> -> vector<16x384xf32>
    %183 = arith.addf %177, %182 : vector<16x384xf32>
    %c1_143 = arith.constant 1 : index
    %c0_144 = arith.constant 0 : index
    %c145_145 = arith.constant 145 : index
    %184 = vector.load %arg9[%c1_143, %c0_144, %c145_145] : memref<2x16x640xf32, #tpu.memory_space<vmem>>, vector<1x16x384xf32>
    %185 = vector.shape_cast %184 : vector<1x16x384xf32> to vector<16x384xf32>
    %186 = vector.extract_strided_slice %148 {offsets = [6, 0, 0], sizes = [1, 16, 16], strides = [1, 1, 1]} : vector<9x16x16xf32> to vector<1x16x16xf32>
    %187 = vector.shape_cast %186 : vector<1x16x16xf32> to vector<16x16xf32>
    %cst_146 = arith.constant dense<0.000000e+00> : vector<16x384xf32>
    %188 = tpu.matmul %187, %185, %cst_146 {dimension_numbers = #tpu.dot_dimension_numbers<[1], [0], [0], [1], [0, 0, 1, 1], [], []>} : vector<16x16xf32>, vector<16x384xf32>, vector<16x384xf32> -> vector<16x384xf32>
    %189 = arith.addf %183, %188 : vector<16x384xf32>
    %c1_147 = arith.constant 1 : index
    %c0_148 = arith.constant 0 : index
    %c146_149 = arith.constant 146 : index
    %190 = vector.load %arg9[%c1_147, %c0_148, %c146_149] : memref<2x16x640xf32, #tpu.memory_space<vmem>>, vector<1x16x384xf32>
    %191 = vector.shape_cast %190 : vector<1x16x384xf32> to vector<16x384xf32>
    %192 = vector.extract_strided_slice %148 {offsets = [7, 0, 0], sizes = [1, 16, 16], strides = [1, 1, 1]} : vector<9x16x16xf32> to vector<1x16x16xf32>
    %193 = vector.shape_cast %192 : vector<1x16x16xf32> to vector<16x16xf32>
    %cst_150 = arith.constant dense<0.000000e+00> : vector<16x384xf32>
    %194 = tpu.matmul %193, %191, %cst_150 {dimension_numbers = #tpu.dot_dimension_numbers<[1], [0], [0], [1], [0, 0, 1, 1], [], []>} : vector<16x16xf32>, vector<16x384xf32>, vector<16x384xf32> -> vector<16x384xf32>
    %195 = arith.addf %189, %194 : vector<16x384xf32>
    %c1_151 = arith.constant 1 : index
    %c0_152 = arith.constant 0 : index
    %c147_153 = arith.constant 147 : index
    %196 = vector.load %arg9[%c1_151, %c0_152, %c147_153] : memref<2x16x640xf32, #tpu.memory_space<vmem>>, vector<1x16x384xf32>
    %197 = vector.shape_cast %196 : vector<1x16x384xf32> to vector<16x384xf32>
    %198 = vector.extract_strided_slice %148 {offsets = [8, 0, 0], sizes = [1, 16, 16], strides = [1, 1, 1]} : vector<9x16x16xf32> to vector<1x16x16xf32>
    %199 = vector.shape_cast %198 : vector<1x16x16xf32> to vector<16x16xf32>
    %cst_154 = arith.constant dense<0.000000e+00> : vector<16x384xf32>
    %200 = tpu.matmul %199, %197, %cst_154 {dimension_numbers = #tpu.dot_dimension_numbers<[1], [0], [0], [1], [0, 0, 1, 1], [], []>} : vector<16x16xf32>, vector<16x384xf32>, vector<16x384xf32> -> vector<16x384xf32>
    %201 = arith.addf %195, %200 : vector<16x384xf32>
    %c1_155 = arith.constant 1 : index
    %c0_156 = arith.constant 0 : index
    %c0_157 = arith.constant 0 : index
    %202 = vector.load %arg4[%c1_155, %c0_156, %c0_157] : memref<2x16x1xf32, #tpu.memory_space<vmem>>, vector<1x16x1xf32>
    %203 = vector.shape_cast %202 : vector<1x16x1xf32> to vector<16x1xf32>
    %204 = vector.broadcast %203 : vector<16x1xf32> to vector<16x384xf32>
    %205 = arith.mulf %201, %204 : vector<16x384xf32>
    %c1_158 = arith.constant 1 : index
    %c0_159 = arith.constant 0 : index
    %c0_160 = arith.constant 0 : index
    %206 = vector.load %arg5[%c1_158, %c0_159, %c0_160] : memref<2x16x1xf32, #tpu.memory_space<vmem>>, vector<1x16x1xf32>
    %207 = vector.shape_cast %206 : vector<1x16x1xf32> to vector<16x1xf32>
    %208 = vector.broadcast %207 : vector<16x1xf32> to vector<16x384xf32>
    %209 = arith.addf %205, %208 : vector<16x384xf32>
    %cst_161 = arith.constant 0.000000e+00 : f32
    %210 = vector.broadcast %cst_161 : f32 to vector<16x384xf32>
    %211 = arith.maximumf %209, %210 : vector<16x384xf32>
    %212 = vector.broadcast %0 : vector<1x384xf32> to vector<16x384xf32>
    %213 = arith.mulf %211, %212 : vector<16x384xf32>
    %c0_162 = arith.constant 0 : index
    %c0_163 = arith.constant 0 : index
    %c128_164 = arith.constant 128 : index
    %214 = vector.load %arg9[%c0_162, %c0_163, %c128_164] : memref<2x16x640xf32, #tpu.memory_space<vmem>>, vector<1x16x384xf32>
    %215 = vector.shape_cast %214 : vector<1x16x384xf32> to vector<16x384xf32>
    %216 = vector.shape_cast %213 : vector<16x384xf32> to vector<1x16x384xf32>
    tpu.vector_store %arg9[%c0_162, %c0_163, %c128_164], %216 {strides = array<i32>} : memref<2x16x640xf32, #tpu.memory_space<vmem>>, vector<1x16x384xf32>,
    %c0_165 = arith.constant 0 : index
    %c0_166 = arith.constant 0 : index
    %c109_167 = arith.constant 109 : index
    %217 = vector.load %arg9[%c0_165, %c0_166, %c109_167] : memref<2x16x640xf32, #tpu.memory_space<vmem>>, vector<1x16x384xf32>
    %218 = vector.shape_cast %217 : vector<1x16x384xf32> to vector<16x384xf32>
    %c0_168 = arith.constant 0 : index
    %c0_169 = arith.constant 0 : index
    %c0_170 = arith.constant 0 : index
    %219 = vector.load %arg6[%c0_168, %c0_169, %c0_170] : memref<9x8x16xf32, #tpu.memory_space<vmem>>, vector<1x8x16xf32>
    %220 = vector.shape_cast %219 : vector<1x8x16xf32> to vector<8x16xf32>
    %cst_171 = arith.constant dense<0.000000e+00> : vector<8x384xf32>
    %221 = tpu.matmul %220, %218, %cst_171 {dimension_numbers = #tpu.dot_dimension_numbers<[1], [0], [0], [1], [0, 0, 1, 1], [], []>} : vector<8x16xf32>, vector<16x384xf32>, vector<8x384xf32> -> vector<8x384xf32>
    %c0_172 = arith.constant 0 : index
    %c0_173 = arith.constant 0 : index
    %c110_174 = arith.constant 110 : index
    %222 = vector.load %arg9[%c0_172, %c0_173, %c110_174] : memref<2x16x640xf32, #tpu.memory_space<vmem>>, vector<1x16x384xf32>
    %223 = vector.shape_cast %222 : vector<1x16x384xf32> to vector<16x384xf32>
    %c1_175 = arith.constant 1 : index
    %c0_176 = arith.constant 0 : index
    %c0_177 = arith.constant 0 : index
    %224 = vector.load %arg6[%c1_175, %c0_176, %c0_177] : memref<9x8x16xf32, #tpu.memory_space<vmem>>, vector<1x8x16xf32>
    %225 = vector.shape_cast %224 : vector<1x8x16xf32> to vector<8x16xf32>
    %cst_178 = arith.constant dense<0.000000e+00> : vector<8x384xf32>
    %226 = tpu.matmul %225, %223, %cst_178 {dimension_numbers = #tpu.dot_dimension_numbers<[1], [0], [0], [1], [0, 0, 1, 1], [], []>} : vector<8x16xf32>, vector<16x384xf32>, vector<8x384xf32> -> vector<8x384xf32>
    %227 = arith.addf %221, %226 : vector<8x384xf32>
    %c0_179 = arith.constant 0 : index
    %c0_180 = arith.constant 0 : index
    %c111_181 = arith.constant 111 : index
    %228 = vector.load %arg9[%c0_179, %c0_180, %c111_181] : memref<2x16x640xf32, #tpu.memory_space<vmem>>, vector<1x16x384xf32>
    %229 = vector.shape_cast %228 : vector<1x16x384xf32> to vector<16x384xf32>
    %c2_182 = arith.constant 2 : index
    %c0_183 = arith.constant 0 : index
    %c0_184 = arith.constant 0 : index
    %230 = vector.load %arg6[%c2_182, %c0_183, %c0_184] : memref<9x8x16xf32, #tpu.memory_space<vmem>>, vector<1x8x16xf32>
    %231 = vector.shape_cast %230 : vector<1x8x16xf32> to vector<8x16xf32>
    %cst_185 = arith.constant dense<0.000000e+00> : vector<8x384xf32>
    %232 = tpu.matmul %231, %229, %cst_185 {dimension_numbers = #tpu.dot_dimension_numbers<[1], [0], [0], [1], [0, 0, 1, 1], [], []>} : vector<8x16xf32>, vector<16x384xf32>, vector<8x384xf32> -> vector<8x384xf32>
    %233 = arith.addf %227, %232 : vector<8x384xf32>
    %c0_186 = arith.constant 0 : index
    %c0_187 = arith.constant 0 : index
    %c127_188 = arith.constant 127 : index
    %234 = vector.load %arg9[%c0_186, %c0_187, %c127_188] : memref<2x16x640xf32, #tpu.memory_space<vmem>>, vector<1x16x384xf32>
    %235 = vector.shape_cast %234 : vector<1x16x384xf32> to vector<16x384xf32>
    %c3_189 = arith.constant 3 : index
    %c0_190 = arith.constant 0 : index
    %c0_191 = arith.constant 0 : index
    %236 = vector.load %arg6[%c3_189, %c0_190, %c0_191] : memref<9x8x16xf32, #tpu.memory_space<vmem>>, vector<1x8x16xf32>
    %237 = vector.shape_cast %236 : vector<1x8x16xf32> to vector<8x16xf32>
    %cst_192 = arith.constant dense<0.000000e+00> : vector<8x384xf32>
    %238 = tpu.matmul %237, %235, %cst_192 {dimension_numbers = #tpu.dot_dimension_numbers<[1], [0], [0], [1], [0, 0, 1, 1], [], []>} : vector<8x16xf32>, vector<16x384xf32>, vector<8x384xf32> -> vector<8x384xf32>
    %239 = arith.addf %233, %238 : vector<8x384xf32>
    %c0_193 = arith.constant 0 : index
    %c0_194 = arith.constant 0 : index
    %c128_195 = arith.constant 128 : index
    %240 = vector.load %arg9[%c0_193, %c0_194, %c128_195] : memref<2x16x640xf32, #tpu.memory_space<vmem>>, vector<1x16x384xf32>
    %241 = vector.shape_cast %240 : vector<1x16x384xf32> to vector<16x384xf32>
    %c4_196 = arith.constant 4 : index
    %c0_197 = arith.constant 0 : index
    %c0_198 = arith.constant 0 : index
    %242 = vector.load %arg6[%c4_196, %c0_197, %c0_198] : memref<9x8x16xf32, #tpu.memory_space<vmem>>, vector<1x8x16xf32>
    %243 = vector.shape_cast %242 : vector<1x8x16xf32> to vector<8x16xf32>
    %cst_199 = arith.constant dense<0.000000e+00> : vector<8x384xf32>
    %244 = tpu.matmul %243, %241, %cst_199 {dimension_numbers = #tpu.dot_dimension_numbers<[1], [0], [0], [1], [0, 0, 1, 1], [], []>} : vector<8x16xf32>, vector<16x384xf32>, vector<8x384xf32> -> vector<8x384xf32>
    %245 = arith.addf %239, %244 : vector<8x384xf32>
    %c0_200 = arith.constant 0 : index
    %c0_201 = arith.constant 0 : index
    %c129_202 = arith.constant 129 : index
    %246 = vector.load %arg9[%c0_200, %c0_201, %c129_202] : memref<2x16x640xf32, #tpu.memory_space<vmem>>, vector<1x16x384xf32>
    %247 = vector.shape_cast %246 : vector<1x16x384xf32> to vector<16x384xf32>
    %c5_203 = arith.constant 5 : index
    %c0_204 = arith.constant 0 : index
    %c0_205 = arith.constant 0 : index
    %248 = vector.load %arg6[%c5_203, %c0_204, %c0_205] : memref<9x8x16xf32, #tpu.memory_space<vmem>>, vector<1x8x16xf32>
    %249 = vector.shape_cast %248 : vector<1x8x16xf32> to vector<8x16xf32>
    %cst_206 = arith.constant dense<0.000000e+00> : vector<8x384xf32>
    %250 = tpu.matmul %249, %247, %cst_206 {dimension_numbers = #tpu.dot_dimension_numbers<[1], [0], [0], [1], [0, 0, 1, 1], [], []>} : vector<8x16xf32>, vector<16x384xf32>, vector<8x384xf32> -> vector<8x384xf32>
    %251 = arith.addf %245, %250 : vector<8x384xf32>
    %c0_207 = arith.constant 0 : index
    %c0_208 = arith.constant 0 : index
    %c145_209 = arith.constant 145 : index
    %252 = vector.load %arg9[%c0_207, %c0_208, %c145_209] : memref<2x16x640xf32, #tpu.memory_space<vmem>>, vector<1x16x384xf32>
    %253 = vector.shape_cast %252 : vector<1x16x384xf32> to vector<16x384xf32>
    %c6_210 = arith.constant 6 : index
    %c0_211 = arith.constant 0 : index
    %c0_212 = arith.constant 0 : index
    %254 = vector.load %arg6[%c6_210, %c0_211, %c0_212] : memref<9x8x16xf32, #tpu.memory_space<vmem>>, vector<1x8x16xf32>
    %255 = vector.shape_cast %254 : vector<1x8x16xf32> to vector<8x16xf32>
    %cst_213 = arith.constant dense<0.000000e+00> : vector<8x384xf32>
    %256 = tpu.matmul %255, %253, %cst_213 {dimension_numbers = #tpu.dot_dimension_numbers<[1], [0], [0], [1], [0, 0, 1, 1], [], []>} : vector<8x16xf32>, vector<16x384xf32>, vector<8x384xf32> -> vector<8x384xf32>
    %257 = arith.addf %251, %256 : vector<8x384xf32>
    %c0_214 = arith.constant 0 : index
    %c0_215 = arith.constant 0 : index
    %c146_216 = arith.constant 146 : index
    %258 = vector.load %arg9[%c0_214, %c0_215, %c146_216] : memref<2x16x640xf32, #tpu.memory_space<vmem>>, vector<1x16x384xf32>
    %259 = vector.shape_cast %258 : vector<1x16x384xf32> to vector<16x384xf32>
    %c7_217 = arith.constant 7 : index
    %c0_218 = arith.constant 0 : index
    %c0_219 = arith.constant 0 : index
    %260 = vector.load %arg6[%c7_217, %c0_218, %c0_219] : memref<9x8x16xf32, #tpu.memory_space<vmem>>, vector<1x8x16xf32>
    %261 = vector.shape_cast %260 : vector<1x8x16xf32> to vector<8x16xf32>
    %cst_220 = arith.constant dense<0.000000e+00> : vector<8x384xf32>
    %262 = tpu.matmul %261, %259, %cst_220 {dimension_numbers = #tpu.dot_dimension_numbers<[1], [0], [0], [1], [0, 0, 1, 1], [], []>} : vector<8x16xf32>, vector<16x384xf32>, vector<8x384xf32> -> vector<8x384xf32>
    %263 = arith.addf %257, %262 : vector<8x384xf32>
    %c0_221 = arith.constant 0 : index
    %c0_222 = arith.constant 0 : index
    %c147_223 = arith.constant 147 : index
    %264 = vector.load %arg9[%c0_221, %c0_222, %c147_223] : memref<2x16x640xf32, #tpu.memory_space<vmem>>, vector<1x16x384xf32>
    %265 = vector.shape_cast %264 : vector<1x16x384xf32> to vector<16x384xf32>
    %c8_224 = arith.constant 8 : index
    %c0_225 = arith.constant 0 : index
    %c0_226 = arith.constant 0 : index
    %266 = vector.load %arg6[%c8_224, %c0_225, %c0_226] : memref<9x8x16xf32, #tpu.memory_space<vmem>>, vector<1x8x16xf32>
    %267 = vector.shape_cast %266 : vector<1x8x16xf32> to vector<8x16xf32>
    %cst_227 = arith.constant dense<0.000000e+00> : vector<8x384xf32>
    %268 = tpu.matmul %267, %265, %cst_227 {dimension_numbers = #tpu.dot_dimension_numbers<[1], [0], [0], [1], [0, 0, 1, 1], [], []>} : vector<8x16xf32>, vector<16x384xf32>, vector<8x384xf32> -> vector<8x384xf32>
    %269 = arith.addf %263, %268 : vector<8x384xf32>
    %270 = vector.broadcast %0 : vector<1x384xf32> to vector<8x384xf32>
    %271 = arith.mulf %269, %270 : vector<8x384xf32>
    %c0_228 = arith.constant 0 : index
    %c0_229 = arith.constant 0 : index
    %c0_230 = arith.constant 0 : index
    %272 = vector.load %arg8[%c0_228, %c0_229, %c0_230] : memref<1x8x384xf32, #tpu.memory_space<vmem>>, vector<1x8x384xf32>
    %273 = vector.shape_cast %272 : vector<1x8x384xf32> to vector<8x384xf32>
    %274 = vector.shape_cast %271 : vector<8x384xf32> to vector<1x8x384xf32>
    tpu.vector_store %arg8[%c0_228, %c0_229, %c0_230], %274 {strides = array<i32>} : memref<1x8x384xf32, #tpu.memory_space<vmem>>, vector<1x8x384xf32>,
    return
  }
  func.func @transform_0(%arg0: i32) -> (i32, i32, i32) {
    %c0_i32 = arith.constant 0 : i32
    %c0_i32_0 = arith.constant 0 : i32
    %c0_i32_1 = arith.constant 0 : i32
    return %arg0, %c0_i32, %c0_i32_0 : i32, i32, i32
  }
  func.func @transform_1(%arg0: i32) -> (i32, i32, i32) {
    %c0_i32 = arith.constant 0 : i32
    %c0_i32_0 = arith.constant 0 : i32
    %c0_i32_1 = arith.constant 0 : i32
    %c0_i32_2 = arith.constant 0 : i32
    return %c0_i32, %c0_i32_0, %c0_i32_1 : i32, i32, i32
  }
  func.func @transform_2(%arg0: i32) -> (i32, i32, i32, i32) {
    %c0_i32 = arith.constant 0 : i32
    %c0_i32_0 = arith.constant 0 : i32
    %c0_i32_1 = arith.constant 0 : i32
    %c0_i32_2 = arith.constant 0 : i32
    %c0_i32_3 = arith.constant 0 : i32
    return %c0_i32, %c0_i32_0, %c0_i32_1, %c0_i32_2 : i32, i32, i32, i32
  }
  func.func @transform_3(%arg0: i32) -> (i32, i32, i32) {
    %c0_i32 = arith.constant 0 : i32
    %c0_i32_0 = arith.constant 0 : i32
    %c0_i32_1 = arith.constant 0 : i32
    %c0_i32_2 = arith.constant 0 : i32
    return %c0_i32, %c0_i32_0, %c0_i32_1 : i32, i32, i32
  }
  func.func @transform_4(%arg0: i32) -> (i32, i32, i32) {
    %c0_i32 = arith.constant 0 : i32
    %c0_i32_0 = arith.constant 0 : i32
    %c0_i32_1 = arith.constant 0 : i32
    %c0_i32_2 = arith.constant 0 : i32
    return %c0_i32, %c0_i32_0, %c0_i32_1 : i32, i32, i32
  }
  func.func @transform_5(%arg0: i32) -> (i32, i32, i32) {
    %c0_i32 = arith.constant 0 : i32
    %c0_i32_0 = arith.constant 0 : i32
    %c0_i32_1 = arith.constant 0 : i32
    %c0_i32_2 = arith.constant 0 : i32
    return %c0_i32, %c0_i32_0, %c0_i32_1 : i32, i32, i32
  }
  func.func @transform_6(%arg0: i32) -> (i32, i32) {
    %c0_i32 = arith.constant 0 : i32
    %c0_i32_0 = arith.constant 0 : i32
    %c0_i32_1 = arith.constant 0 : i32
    return %c0_i32, %c0_i32_0 : i32, i32
  }
  func.func @transform_7(%arg0: i32) -> (i32, i32, i32) {
    %c0_i32 = arith.constant 0 : i32
    %c0_i32_0 = arith.constant 0 : i32
    %c0_i32_1 = arith.constant 0 : i32
    return %arg0, %c0_i32, %c0_i32_0 : i32, i32, i32
  }
}

</mosaic_0001>

<bundles_post_ra>
// kernel: tpu_custom_call.1
= control target key start
LH: loop header
LB: loop body
LE: loop exit
PB: predicated region body
PF: predicated region fallthrough
CT: control target
= control target key end

     0   :  { %s10119_s0 = inlined_call_operand.hbm [shape: f32[2,8,640], index: 0, kind: input, shape index: {}]   ;;  %s10120_s1 = inlined_call_operand.vmem [shape: f32[9,16,8], index: 1, kind: input, shape index: {}]   ;;  %s10121_s2 = inlined_call_operand.vmem [shape: f32[2,9,16,16], index: 2, kind: input, shape index: {}]   ;;  %s10122_s3 = inlined_call_operand.vmem [shape: f32[2,16,1], index: 3, kind: input, shape index: {}]   ;;  %s10123_s4 = inlined_call_operand.vmem [shape: f32[2,16,1], index: 4, kind: input, shape index: {}]   ;;  %s10124_s5 = inlined_call_operand.hbm [shape: f32[9,8,16], index: 5, kind: input, shape index: {}]   ;;  %s10125_s6 = inlined_call_operand.vmem [shape: f32[1,384], index: 6, kind: input, shape index: {}]   ;;  %s10126_s7 = inlined_call_operand.hbm [shape: f32[2,8,384], index: 7, kind: output, shape index: {}]  }
   0x1   :  { %10138 = sst [smem:[#allocation12_spill]] %s10124_s5 }
   0x2   :  { %12 = vsyncpa [#allocation4], 0 }
   0x3   :  { %14 = vsyncpa [#allocation4 + $0x1], 0 }
   0x4   :  { %15 = vsyncpa [#allocation7], 0 }
   0x5   :  { %16 = vsyncpa [#allocation5], 0 }
   0x6   :  { %18 = vsyncpa [#allocation5 + $0x1], 0  ;;  %s8922_s24 = smov 0   ;;  %s8924_s25 = smov 0  }
   0x7   :  { %s8926_s26 = smov 0   ;;  %s8928_s27 = smov 0  }
   0x8 LB: > { %s8943_s28 = sadd.s32 4294967295, %s8863_s27   ;;  %s7260_s29 = sadd.s32 4294967294, %s8863_s27   ;;  %s8863_s27 = sphi %s8928_s27, %s10160_s27   ;;  %s8859_s26 = sphi %s8926_s26, %s10159_s26   ;;  %s8855_s25 = sphi %s8924_s25, %s10158_s25   ;;  %s8851_s24 = sphi %s8922_s24, %s10157_s24  }
   0x9   : > { %p44_p0 = scmp.ne.s32.totalorder %s8855_s25, %s8851_s24  ;;  %p10127_p1 = scmp.eq.s32.totalorder %s8943_s28, 0 }
   0xa   : > { %p200_p3 = scmp.eq.s32.totalorder %s7260_s29, 1  ;;  %p7261_p5 = scmp.ge.s32.totalorder %s8863_s27, 1 }
   0xb   : > { %p8952_p4 = por %p10127_p1, %p44_p0  ;;  %p207_p7 = scmp.lt.s32.totalorder %s8863_s27, 3 }
   0xc   : > { %p8957_p6 = por %p200_p3, %p44_p0  ;;  %s8865_s10 = smov [#allocation6]  }
   0xd   : > { %s10139_s30 = scalar_select %p8952_p4, 1, 0 }
   0xe   : > { %s10140_s8 = scalar_select %p8957_p6, 1, 0 }
   0xf   : > { %p8962_p8 = pnand %p7261_p5, %p207_p7  ;;  %s231_s11 = sshll.u32 %s8865_s10, 4  ;;  %s8966_s11 = int_to_ptr.vmem [resolvable:$true] %s231_s11 }
  0x10   : > { %s8978_s13 = sadd.s32 1, %s8863_s27   ;;  %s31_s14 = sadd.s32 1, %s8859_s26 }
  0x11   : > { %s10141_s9 = scalar_select %p8962_p8, 1, 0 }
  0x12   : > { %p8190_p9 = pneg %p8962_p8  ;;  %s28_s15 = ssub.s32 %s8863_s27, %s8978_s13 }
  0x13   : > { %s10143_s5 = sld [smem:[#allocation12_spill]] }
  0x14   : > { %p8973_p11 = pnand %p8190_p9, %p10127_p1 }
  0x16   : > { %p8737_p13 = pneg %p8973_p11 }
  0x19   : > { %s8735_s18 = scalar_lea.hbm %s10143_s5, 1152 }
  0x1a   : > { %p8736_p12 = scmp.ne.s32.totalorder %s10143_s5, %s8735_s18  ;;  %p8742_p5 = scmp.lt.u32.totalorder %s8735_s18, %s10143_s5 }
  0x1c   : > { %p8738_p0 = pnand %p8737_p13, %p8736_p12 }
  0x1e   : > { %p8739_p3 = pneg %p8738_p0 }
  0x20   : > { %p8744_p7 = pnand %p8742_p5, %p8739_p3 }
  0x22   : > { %8747 = shalt.err (!%p8744_p7)
}
  0x23   : > { %s8748_s23 = scalar_lea.vmem %s8966_s11, 1152  ;;  %p8756_p2 = scmp.lt.s32.totalorder %s8966_s11, %s8966_s11 }
  0x24   : > { %p8749_p9 = scmp.ne.s32.totalorder %s8966_s11, %s8748_s23  ;;  %p8757_p6 = scmp.lt.s32.totalorder %s8748_s23, %s8748_s23 }
  0x26   : > { %p8751_p10 = pnand %p8749_p9, %p8737_p13  ;;  %p8758_p4 = por %p8757_p6, %p8756_p2 }
  0x28   : > { %p8752_p1 = pneg %p8751_p10 }
  0x2a   : > { %p8759_p8 = pnand %p8758_p4, %p8752_p1 }
  0x2c   : > { %8762 = shalt.err (!%p8759_p8)
}
  0x2d   : > { %s8866_s29 = smov 128   ;;  %s8867_s10 = smov 8  }
  0x2e   : > { %8193 = dma.hbm_to_vmem [thread:$0]  (!%p8973_p11), %s10143_s5, 1152, %s8966_s11, [#allocation7], %s8866_s29, %s8866_s29, %s8867_s10  }
  0x2f   : > { %p29_p2 = scmp.eq.s32.totalorder %s28_s15, 0  ;;  %p38_p1 = scmp.ne.s32.totalorder %s8859_s26, %s8855_s25 }
  0x30   : > { %p39_p4 = scmp.eq.s32.totalorder %s8863_s27, 0  ;;  %p8203_p6 = scmp.lt.s32.totalorder %s8863_s27, 2 }
  0x31   : > { %s9009_s18 = scalar_select %p29_p2, %s8859_s26, %s31_s14  }
  0x32   : > { %p40_p8 = por %p39_p4, %p38_p1  ;;  %p10144_p10 = scmp.eq.s32.totalorder %s8943_s28, 1 }
  0x33   : > { %s248_s20 = sand.u32 1, %s8859_s26   ;;  %s8178_s21 = smul.u32 640, %s8863_s27 }
  0x34   : > { %p9013_p12 = por %p10144_p10, %p38_p1  ;;  %s8177_s22 = smul.u32 40, %s248_s20 }
  0x35   : > { %p9019_p13 = pnand %p8203_p6, %p40_p8  ;;  %s9026_s14 = scalar_lea.hbm %s10119_s0, %s8178_s21 }
  0x36   : > { %s252_s23 = scalar_lea.vmem [#allocation3], %s8177_s22  ;;  %s249_s10 = scalar_lea.sflag [#allocation4], %s248_s20 }
  0x37   : > { %s260_s29 = sshll.u32 %s252_s23, 4  ;;  %s8763_s16 = scalar_lea.hbm %s9026_s14, 640  ;;  %s9028_s29 = int_to_ptr.vmem [resolvable:$true] %s260_s29 }
  0x38   : > { %p8764_p11 = scmp.ne.s32.totalorder %s9026_s14, %s8763_s16  ;;  %p8765_p0 = pneg %p9019_p13 }
  0x39   : > { %s8768_s11 = scalar_lea.hbm %s10119_s0, 1280  ;;  %p8769_p7 = scmp.lt.u32.totalorder %s9026_s14, %s10119_s0 }
  0x3a   : > { %p8766_p3 = pnand %p8765_p0, %p8764_p11  ;;  %p8770_p9 = scmp.lt.u32.totalorder %s8768_s11, %s8763_s16 }
  0x3b   : > { %p8772_p1 = scmp.lt.u32.totalorder %s8763_s16, %s9026_s14 }
  0x3c   : > { %p8767_p5 = pneg %p8766_p3  ;;  %p8771_p2 = por %p8770_p9, %p8769_p7 }
  0x3e   : > { %p8773_p4 = por %p8772_p1, %p8771_p2 }
  0x40   : > { %p8774_p6 = pnand %p8773_p4, %p8767_p5 }
  0x42   : > { %8777 = shalt.err (!%p8774_p6)
}
  0x43   : > { %s8778_s20 = scalar_lea.vmem %s9028_s29, 640  ;;  %s8868_s22 = smov [#allocation3]  }
  0x44   : > { %p8779_p8 = scmp.ne.s32.totalorder %s9028_s29, %s8778_s20  ;;  %s8783_s23 = sshll.u32 %s8868_s22, 4  ;;  %s8784_s23 = int_to_ptr.vmem [resolvable:$false] %s8783_s23 }
  0x45   : > { %s8785_s5 = scalar_lea.vmem %s8784_s23, 1280  ;;  %p8786_p3 = scmp.lt.s32.totalorder %s9028_s29, %s8784_s23 }
  0x46   : > { %p8781_p10 = pnand %p8779_p8, %p8765_p0  ;;  %p8787_p7 = scmp.lt.s32.totalorder %s8785_s5, %s8778_s20 }
  0x48   : > { %p8782_p11 = pneg %p8781_p10  ;;  %p8788_p9 = por %p8787_p7, %p8786_p3 }
  0x4a   : > { %p8789_p2 = pnand %p8788_p9, %p8782_p11 }
  0x4c   : > { %8792 = shalt.err (!%p8789_p2)
}
  0x4d   : > { %8197 = dma.hbm_to_vmem [thread:$0]  (!%p9019_p13), %s9026_s14, 640, %s9028_s29, %s249_s10  }
  0x4e   : > { %p10147_p5 = scmp.ne.s32.totalorder %s10141_s9, 0 }
  0x4f   : > { %s9058_s16 = sand.u32 (!%p10147_p5), 1, %s8855_s25   ;;  %p10148_p0 = scmp.ne.s32.totalorder (!%p10147_p5), %s10139_s30, 0 }
  0x50   : > { %269 = sbr.rel (%p10147_p5) target bundleno = 1805 (0x70d), region = 48  ;;  %s272_s21 = scalar_lea.sflag (!%p10147_p5), [#allocation4], %s9058_s16 }
  0x51   : > { %s8179_s17 = smul.u32 (!%p10147_p5), 40, %s9058_s16 }
  0x53   : > { %s9062_s11 = scalar_lea.vmem (!%p10147_p5), [#allocation3], %s8179_s17 }
  0x57   : > { %8838 = dma.done.wait (%p10148_p0), %s272_s21, 640  }
  0x58   : > { %8840 = vsyncadd (%p10148_p0), %s272_s21, 4294966656  ;;  %p10149_p13 = scmp.eq.s32.totalorder %s8943_s28, 0 }
  0x5a   : > { %8842 = dma.done.wait (%p10149_p13), [#allocation7], 1152   ;;  %p10150_p1 = pmov %p10149_p13 }
  0x5b   : > { %v8869_v0 = vmov 0.0   ;;  %v9074_v1 = vld [vmem:[%s9062_s11 + $0x8] sm:$0xff]  ;;  %v320_v2 = vld [vmem:[%s9062_s11] sm:$0xff]  ;;  %vm348_vm0 = vcmask 64512   ;;  %s8870_s9 = smov 18   ;;  %v9081_v3 = vld [vmem:[%s9062_s11 + $0x10] sm:$0xff] }
  0x5c   : > { %8844 = vsyncadd (%p10150_p1), [#allocation7], 4294966144  ;;  %419 = vmatprep.mubr.f32.mxu0 %v8869_v0  ;;  %335 = vrot.lane.b32.xlu0 %v9074_v1, %s8870_s9  ;;  %v9084_v4 = vld [vmem:[%s9062_s11 + $0x18] sm:$0xff]  ;;  %v7267_v5 = vld [vmem:[%s10120_s1 + $0x10] sm:$0xff]  ;;  %s8871_s14 = smov 19   ;;  %s8872_s29 = smov 17  }
  0x5d   : > { %333 = vrot.lane.b32.xlu1 %v320_v2, %s8870_s9  ;;  %7562 = vmatprep.mubr.msk.f32.mxu1 %vm348_vm0, %v7267_v5  ;;  %s10136_s10 = smov 1   ;;  %s10134_s15 = smov 127   ;;  %v1214_v6 = vld [vmem:[%s9062_s11 + $0x20] sm:$0xff]  ;;  %vm341_vm1 = vcmask 146432   ;;  %v7268_v13 = vld [vmem:[%s10120_s1 + $0x18] sm:$0xff]  ;;  %vm515_vm2 = vcmask 154624  }
  0x5e   : > { %s10132_s20 = smov 111   ;;  %s10130_s22 = smov 110   ;;  %v324_v15 = vld [vmem:[%s10120_s1] sm:$0xff]  ;;  %v325_v23 = vld [vmem:[%s10120_s1 + $0x8] sm:$0xff]  ;;  %vm691_vm3 = vcmask 138240   ;;  %vm873_vm4 = vcmask 7168  }
  0x5f   : > { %s8877_s23 = smov 109   ;;  %v7277_v24 = vld [vmem:[%s10120_s1 + $0x20] sm:$0xff]  ;;  %v7278_v32 = vld [vmem:[%s10120_s1 + $0x28] sm:$0xff]  ;;  %v7283_v33 = vld [vmem:[%s10120_s1 + $0x30] sm:$0xff]  ;;  %vm1230_vm5 = vcmask 1039360   ;;  %vm1412_vm6 = vcmask 908288  }
  0x60   : > { %337 = vrot.lane.b32.xlu0 %v9081_v3, %s8870_s9  ;;  %v7284_v41 = vld [vmem:[%s10120_s1 + $0x38] sm:$0xff]  ;;  %v7289_v42 = vld [vmem:[%s10120_s1 + $0x40] sm:$0xff]  ;;  %v7290_v48 = vld [vmem:[%s10120_s1 + $0x48] sm:$0xff]  ;;  %vm1594_vm7 = vcmask 900096   ;;  %vm1776_vm8 = vcmask 891904   ;;  %vm2043_vm9 = vcmask 130048  }
  0x61   : > { %339 = vrot.lane.b32.xlu1 %v9084_v4, %s8870_s9  ;;  %v7295_v51 = vld [vmem:[%s10120_s1 + $0x50] sm:$0xff]  ;;  %v7296_v57 = vld [vmem:[%s10120_s1 + $0x58] sm:$0xff]  ;;  %v7301_v60 = vld [vmem:[%s10120_s1 + $0x60] sm:$0xff]  ;;  %s10151_s21 = smov 111   ;;  %s10152_s11 = smov 110   ;;  %vm8880_vm10 = vmmov 0  }
  0x62   : > { %s10153_s5 = smov 1  }
  0x64   : > { %509 = vrot.lane.b32.xlu0 %v9074_v1, %s8871_s14 }
  0x65   : > { %511 = vrot.lane.b32.xlu1 %v9081_v3, %s8871_s14 }
  0x68   : > { %507 = vrot.lane.b32.xlu0 %v320_v2, %s8871_s14 }
  0x69   : > { %513 = vrot.lane.b32.xlu1 %v9084_v4, %s8871_s14 }
  0x6c   : > { %685 = vrot.lane.b32.xlu0 %v9074_v1, %s8872_s29 }
  0x6d   : > { %687 = vrot.lane.b32.xlu1 %v9081_v3, %s8872_s29 }
  0x70   : > { %683 = vrot.lane.b32.xlu0 %v320_v2, %s8872_s29 }
  0x71   : > { %689 = vrot.lane.b32.xlu1 %v9084_v4, %s8872_s29 }
  0x74   : > { %867 = vrot.lane.b32.xlu0 %v9074_v1, %s10136_s10 }
  0x75   : > { %869 = vrot.lane.b32.xlu1 %v9081_v3, %s10136_s10 }
  0x78   : > { %865 = vrot.lane.b32.xlu0 %v320_v2, %s10136_s10 }
  0x79   : > { %871 = vrot.lane.b32.xlu1 %v9084_v4, %s10136_s10 }
  0x7c   : > { %1224 = vrot.lane.b32.xlu0 %v9081_v3, %s10134_s15 }
  0x7d   : > { %1226 = vrot.lane.b32.xlu1 %v9084_v4, %s10134_s15 }
  0x80   : > { %1222 = vrot.lane.b32.xlu0 %v9074_v1, %s10134_s15 }
  0x81   : > { %1228 = vrot.lane.b32.xlu1 %v1214_v6, %s10134_s15 }
  0x84   : > { %1406 = vrot.lane.b32.xlu0 %v9081_v3, %s10132_s20 }
  0x85   : > { %1408 = vrot.lane.b32.xlu1 %v9084_v4, %s10132_s20 }
  0x88   : > { %1404 = vrot.lane.b32.xlu0 %v9074_v1, %s10132_s20 }
  0x89   : > { %1410 = vrot.lane.b32.xlu1 %v1214_v6, %s10132_s20 }
  0x8c   : > { %1588 = vrot.lane.b32.xlu0 %v9081_v3, %s10130_s22 }
  0x8d   : > { %1590 = vrot.lane.b32.xlu1 %v9084_v4, %s10130_s22 }
  0x90   : > { %1586 = vrot.lane.b32.xlu0 %v9074_v1, %s10130_s22 }
  0x91   : > { %1592 = vrot.lane.b32.xlu1 %v1214_v6, %s10130_s22 }
  0x94   : > { %1770 = vrot.lane.b32.xlu0 %v9081_v3, %s8877_s23 }
  0x95   : > { %1772 = vrot.lane.b32.xlu1 %v9084_v4, %s8877_s23 }
  0x98   : > { %1768 = vrot.lane.b32.xlu0 %v9074_v1, %s8877_s23 }
  0x99   : > { %1774 = vrot.lane.b32.xlu1 %v1214_v6, %s8877_s23  ;;  %v7307_v6 = vld [vmem:[%s10120_s1 + $0x70] sm:$0xff] }
  0xce   : > { %v336_v7 = vpop.permute.xlu0 %335 }
  0xcf   : > { %v334_v8 = vpop.permute.xlu1 %333 }
  0xd0   : > { %v342_v14 = vsel %vm341_vm1, %v334_v8, %v336_v7 }
  0xd2   : > { %v338_v9 = vpop.permute.xlu0 %337 }
  0xd3   : > { %v340_v10 = vpop.permute.xlu1 %339  ;;  %v343_v11 = vsel %vm341_vm1, %v336_v7, %v338_v9 }
  0xd4   : > { %v344_v12 = vsel %vm341_vm1, %v338_v9, %v340_v10  ;;  %355 = vmatprep.subr.mxu0 %v343_v11 }
  0xd5   : > { %7560 = vmatprep.subr.mxu1 %v344_v12  ;;  %356 = vmatpush1.msra.mxu0 %v342_v14 }
  0xd6   : > { %7561 = vmatpush3.msra.mxu1 %v344_v12  ;;  %v510_v16 = vpop.permute.xlu0 %509  ;;  %7269 = vmatmul.mubr.msk.f32.vlgmr.msra.gmra.mrb[0].mxu0 %vm348_vm0, %v7267_v5  ;;  %v7308_v12 = vld [vmem:[%s10120_s1 + $0x78] sm:$0xff] }
  0xd7   : > { %7563 = vmatmul.mubr.msk.f32.vlgmr.msra.gmra.mrb[0].mxu1 %vm348_vm0, %v7268_v13  ;;  %v512_v17 = vpop.permute.xlu1 %511  ;;  %425 = vmatprep.mubr.f32.mxu0 %v8869_v0 }
  0xd8   : > { %v517_v18 = vsel %vm515_vm2, %v510_v16, %v512_v17  ;;  %7567 = vmatprep.mubr.msk.f32.mxu1 %vm348_vm0, %v324_v15 }
  0xd9   : > { %528 = vmatprep.subr.mxu0 %v517_v18 }
  0xda   : > { %v508_v19 = vpop.permute.xlu0 %507  ;;  %7270 = vmatmul.mubr.msk.f32.gmra.mrb[2].mxu0 %vm348_vm0, %v7268_v13 }
  0xdb   : > { %v514_v20 = vpop.permute.xlu1 %513  ;;  %v516_v21 = vsel %vm515_vm2, %v508_v19, %v510_v16  ;;  %592 = vmatprep.mubr.f32.mxu0 %v8869_v0  ;;  %v7314_v16 = vld [vmem:[%s10120_s1 + $0x88] sm:$0xff] }
  0xdc   : > { %v518_v22 = vsel %vm515_vm2, %v512_v17, %v514_v20  ;;  %529 = vmatpush1.msra.mxu0 %v516_v21  ;;  %v1954_v17 = vlaneseq  ;;  %v310_v21 = vld [vmem:[%s10125_s6] sm:$0x7] }
  0xdd   : > { %7565 = vmatprep.subr.mxu1 %v518_v22 }
  0xde   : > { %7566 = vmatpush3.msra.mxu1 %v518_v22  ;;  %v686_v25 = vpop.permute.xlu0 %685  ;;  %7273 = vmatmul.mubr.msk.f32.vlgmr.msra.gmra.mrb[0].mxu0 %vm348_vm0, %v324_v15  ;;  %v7313_v15 = vld [vmem:[%s10120_s1 + $0x80] sm:$0xff]  ;;  %v1955_v18 = vshrl.u32 %v1954_v17, 7 }
  0xdf   : > { %7568 = vmatmul.mubr.msk.f32.vlgmr.msra.gmra.mrb[0].mxu1 %vm348_vm0, %v325_v23  ;;  %v688_v26 = vpop.permute.xlu1 %687  ;;  %598 = vmatprep.mubr.f32.mxu0 %v8869_v0 }
  0xe0   : > { %v693_v27 = vsel %vm691_vm3, %v686_v25, %v688_v26  ;;  %7572 = vmatprep.mubr.msk.f32.mxu1 %vm348_vm0, %v7277_v24  ;;  %v1956_v19 = vsub.s32 0, %v1955_v18  ;;  %v1964_v20 = vsub.s32 2, %v1955_v18  ;;  %v1960_v22 = vsub.s32 1, %v1955_v18 }
  0xe1   : > { %704 = vmatprep.subr.mxu0 %v693_v27 }
  0xe2   : > { %v684_v28 = vpop.permute.xlu0 %683  ;;  %7274 = vmatmul.mubr.msk.f32.gmra.mrb[2].mxu0 %vm348_vm0, %v325_v23  ;;  %v9279_v23 = vrot.slane %v310_v21, %v1956_v19  ;;  %v9283_v27 = vrot.slane %v310_v21, %v1960_v22 }
  0xe3   : > { %v690_v29 = vpop.permute.xlu1 %689  ;;  %v692_v30 = vsel %vm691_vm3, %v684_v28, %v686_v25  ;;  %768 = vmatprep.mubr.f32.mxu0 %v8869_v0 }
  0xe4   : > { %v694_v31 = vsel %vm691_vm3, %v688_v26, %v690_v29  ;;  %705 = vmatpush1.msra.mxu0 %v692_v30 }
  0xe5   : > { %7570 = vmatprep.subr.mxu1 %v694_v31 }
  0xe6   : > { %7571 = vmatpush3.msra.mxu1 %v694_v31  ;;  %v868_v34 = vpop.permute.xlu0 %867  ;;  %7279 = vmatmul.mubr.msk.f32.vlgmr.msra.gmra.mrb[0].mxu0 %vm348_vm0, %v7277_v24  ;;  %v9281_v24 = vrot.slane %v310_v21, %v1964_v20  ;;  %v9408_v20 = vld [vmem:[%s10121_s2] sm:$0xff] }
  0xe7   : > { %7573 = vmatmul.mubr.msk.f32.vlgmr.msra.gmra.mrb[0].mxu1 %vm348_vm0, %v7278_v32  ;;  %v870_v35 = vpop.permute.xlu1 %869  ;;  %774 = vmatprep.mubr.f32.mxu0 %v8869_v0 }
  0xe8   : > { %v875_v36 = vsel %vm873_vm4, %v868_v34, %v870_v35  ;;  %7577 = vmatprep.mubr.msk.f32.mxu1 %vm348_vm0, %v7283_v33 }
  0xe9   : > { %886 = vmatprep.subr.mxu0 %v875_v36 }
  0xea   : > { %v866_v37 = vpop.permute.xlu0 %865  ;;  %7280 = vmatmul.mubr.msk.f32.gmra.mrb[2].mxu0 %vm348_vm0, %v7278_v32 }
  0xeb   : > { %v872_v38 = vpop.permute.xlu1 %871  ;;  %v874_v39 = vsel %vm873_vm4, %v866_v37, %v868_v34  ;;  %950 = vmatprep.mubr.f32.mxu0 %v8869_v0 }
  0xec   : > { %v876_v40 = vsel %vm873_vm4, %v870_v35, %v872_v38  ;;  %887 = vmatpush1.msra.mxu0 %v874_v39 }
  0xed   : > { %7575 = vmatprep.subr.mxu1 %v876_v40  ;;  %1053 = vmatprep.subr.mxu0 %v9081_v3  ;;  %v7302_v3 = vld [vmem:[%s10120_s1 + $0x68] sm:$0xff] }
  0xee   : > { %7576 = vmatpush3.msra.mxu1 %v876_v40  ;;  %7285 = vmatmul.mubr.msk.f32.vlgmr.msra.gmra.mrb[0].mxu0 %vm348_vm0, %v7283_v33  ;;  %v1225_v43 = vpop.permute.xlu0 %1224 }
  0xef   : > { %7578 = vmatmul.mubr.msk.f32.vlgmr.msra.gmra.mrb[0].mxu1 %vm348_vm0, %v7284_v41  ;;  %v1227_v44 = vpop.permute.xlu1 %1226  ;;  %956 = vmatprep.mubr.f32.mxu0 %v8869_v0 }
  0xf0   : > { %1054 = vmatpush1.msra.mxu0 %v9074_v1  ;;  %v1232_v45 = vsel %vm1230_vm5, %v1225_v43, %v1227_v44  ;;  %7580 = vmatprep.subr.mxu1 %v9084_v4 }
  0xf1   : > { %7582 = vmatprep.mubr.msk.f32.mxu1 %vm348_vm0, %v7289_v42  ;;  %7581 = vmatpush3.msra.mxu1 %v9084_v4 }
  0xf2   : > { %1243 = vmatprep.subr.mxu0 %v1232_v45  ;;  %7286 = vmatmul.mubr.msk.f32.gmra.mrb[2].mxu0 %vm348_vm0, %v7284_v41  ;;  %v1223_v46 = vpop.permute.xlu0 %1222 }
  0xf3   : > { %v1229_v47 = vpop.permute.xlu1 %1228  ;;  %1117 = vmatprep.mubr.f32.mxu0 %v8869_v0  ;;  %v1231_v50 = vsel %vm1230_vm5, %v1223_v46, %v1225_v43 }
  0xf4   : > { %v1233_v49 = vsel %vm1230_vm5, %v1227_v44, %v1229_v47 }
  0xf5   : > { %7585 = vmatprep.subr.mxu1 %v1233_v49 }
  0xf6   : > { %7291 = vmatmul.mubr.msk.f32.vlgmr.msra.gmra.mrb[0].mxu0 %vm348_vm0, %v7289_v42  ;;  %v1407_v52 = vpop.permute.xlu0 %1406 }
  0xf7   : > { %7583 = vmatmul.mubr.msk.f32.vlgmr.msra.gmra.mrb[0].mxu1 %vm348_vm0, %v7290_v48  ;;  %v1409_v53 = vpop.permute.xlu1 %1408  ;;  %1244 = vmatpush1.msra.mxu0 %v1231_v50  ;;  %v9311_v50 = vld [vmem:[%s10121_s2 + $0x10] sm:$0xff] }
  0xf8   : > { %1123 = vmatprep.mubr.f32.mxu0 %v8869_v0  ;;  %v1414_v54 = vsel %vm1412_vm6, %v1407_v52, %v1409_v53  ;;  %7586 = vmatpush3.msra.mxu1 %v1233_v49 }
  0xf9   : > { %7587 = vmatprep.mubr.msk.f32.mxu1 %vm348_vm0, %v7295_v51  ;;  %1425 = vmatprep.subr.mxu0 %v1414_v54  ;;  %v3721_v54 = vld [vmem:[%s10122_s3 + $0x8] sm:$0xff] }
  0xfa   : > { %7292 = vmatmul.mubr.msk.f32.gmra.mrb[2].mxu0 %vm348_vm0, %v7290_v48  ;;  %v1405_v55 = vpop.permute.xlu0 %1404 }
  0xfb   : > { %v1411_v56 = vpop.permute.xlu1 %1410  ;;  %1307 = vmatprep.mubr.f32.mxu0 %v8869_v0  ;;  %v1413_v59 = vsel %vm1412_vm6, %v1405_v55, %v1407_v52  ;;  %v3720_v55 = vld [vmem:[%s10122_s3] sm:$0xff] }
  0xfc   : > { %v1415_v58 = vsel %vm1412_vm6, %v1409_v53, %v1411_v56  ;;  %v8878_v56 = vmov 0  }
  0xfd   : > { %7590 = vmatprep.subr.mxu1 %v1415_v58  ;;  %8414 = vset.pattern.permute.xlu1 %v8878_v56 }
  0xfe   : > { %7297 = vmatmul.mubr.msk.f32.vlgmr.msra.gmra.mrb[0].mxu0 %vm348_vm0, %v7295_v51  ;;  %v1589_v61 = vpop.permute.xlu0 %1588  ;;  %8413 = vset.pattern.permute.xlu0 %v8878_v56  ;;  %v1985_v56 = vld [vmem:[%s10121_s2 + $0x20] sm:$0xff] }
  0xff   : > { %7588 = vmatmul.mubr.msk.f32.vlgmr.msra.gmra.mrb[0].mxu1 %vm348_vm0, %v7296_v57  ;;  %v1591_v62 = vpop.permute.xlu1 %1590  ;;  %1426 = vmatpush1.msra.mxu0 %v1413_v59 }
 0x100   : > { %1313 = vmatprep.mubr.f32.mxu0 %v8869_v0  ;;  %v1596_v63 = vsel %vm1594_vm7, %v1589_v61, %v1591_v62  ;;  %7591 = vmatpush3.msra.mxu1 %v1415_v58  ;;  %v3739_v58 = vld [vmem:[%s10123_s4 + $0x8] sm:$0xff] }
 0x101   : > { %7592 = vmatprep.mubr.msk.f32.mxu1 %vm348_vm0, %v7301_v60  ;;  %1607 = vmatprep.subr.mxu0 %v1596_v63 }
 0x102   : > { %7298 = vmatmul.mubr.msk.f32.gmra.mrb[2].mxu0 %vm348_vm0, %v7296_v57  ;;  %v1587_v1 = vpop.permute.xlu0 %1586  ;;  %v3738_v57 = vld [vmem:[%s10123_s4] sm:$0xff] }
 0x103   : > { %v1593_v2 = vpop.permute.xlu1 %1592  ;;  %1489 = vmatprep.mubr.f32.mxu0 %v8869_v0  ;;  %v1595_v5 = vsel %vm1594_vm7, %v1587_v1, %v1589_v61 }
 0x104   : > { %v1597_v4 = vsel %vm1594_vm7, %v1591_v62, %v1593_v2 }
 0x105   : > { %7595 = vmatprep.subr.mxu1 %v1597_v4 }
 0x106   : > { %7303 = vmatmul.mubr.msk.f32.vlgmr.msra.gmra.mrb[0].mxu0 %vm348_vm0, %v7301_v60  ;;  %v1771_v7 = vpop.permute.xlu0 %1770 }
 0x107   : > { %7593 = vmatmul.mubr.msk.f32.vlgmr.msra.gmra.mrb[0].mxu1 %vm348_vm0, %v7302_v3  ;;  %v1773_v8 = vpop.permute.xlu1 %1772  ;;  %1608 = vmatpush1.msra.mxu0 %v1595_v5 }
 0x108   : > { %1495 = vmatprep.mubr.f32.mxu0 %v8869_v0  ;;  %v1778_v9 = vsel %vm1776_vm8, %v1771_v7, %v1773_v8  ;;  %7596 = vmatpush3.msra.mxu1 %v1597_v4 }
 0x109   : > { %7597 = vmatprep.mubr.msk.f32.mxu1 %vm348_vm0, %v7307_v6  ;;  %1789 = vmatprep.subr.mxu0 %v1778_v9 }
 0x10a   : > { %7304 = vmatmul.mubr.msk.f32.gmra.mrb[2].mxu0 %vm348_vm0, %v7302_v3  ;;  %v1769_v10 = vpop.permute.xlu0 %1768 }
 0x10b   : > { %v1775_v11 = vpop.permute.xlu1 %1774  ;;  %1671 = vmatprep.mubr.f32.mxu0 %v8869_v0  ;;  %v1777_v14 = vsel %vm1776_vm8, %v1769_v10, %v1771_v7 }
 0x10c   : > { %v1779_v13 = vsel %vm1776_vm8, %v1773_v8, %v1775_v11 }
 0x10d   : > { %7600 = vmatprep.subr.mxu1 %v1779_v13 }
 0x10e   : > { %7309 = vmatmul.mubr.msk.f32.vlgmr.msra.gmra.mrb[0].mxu0 %vm348_vm0, %v7307_v6 }
 0x10f   : > { %7598 = vmatmul.mubr.msk.f32.vlgmr.msra.gmra.mrb[0].mxu1 %vm348_vm0, %v7308_v12  ;;  %1790 = vmatpush1.msra.mxu0 %v1777_v14  ;;  %v9397_v14 = vld [vmem:[%s10121_s2 + $0x18] sm:$0xff] }
 0x110   : > { %1677 = vmatprep.mubr.f32.mxu0 %v8869_v0  ;;  %7601 = vmatpush3.msra.mxu1 %v1779_v13 }
 0x111   : > { %7602 = vmatprep.mubr.msk.f32.mxu1 %vm348_vm0, %v7313_v15 }
 0x112   : > { %7310 = vmatmul.mubr.msk.f32.gmra.mrb[2].mxu0 %vm348_vm0, %v7308_v12 }
 0x113   : > { %1853 = vmatprep.mubr.f32.mxu0 %v8869_v0 }
 0x116   : > { %7315 = vmatmul.mubr.msk.f32.vlgmr.msra.gmra.mrb[0].mxu0 %vm348_vm0, %v7313_v15 }
 0x117   : > { %7603 = vmatmul.mubr.msk.f32.vlgmr.msra.gmra.mrb[0].mxu1 %vm348_vm0, %v7314_v16  ;;  %1859 = vmatprep.mubr.f32.mxu0 %v8869_v0 }
 0x118   : > { %7609 = vmatprep.mubr.msk.f32.mxu1 %vm2043_vm9, %v9311_v50 }
 0x11a   : > { %7316 = vmatmul.mubr.msk.f32.gmra.mrb[2].mxu0 %vm348_vm0, %v7314_v16 }
 0x11b   : > { %2114 = vmatprep.mubr.f32.mxu0 %v8869_v0 }
 0x1e9   : > { %v1855_v25 = vpop.f32.mrb[0].mxu0 }
 0x1ea   : > { %v7604_v26 = vpop.f32.mrb[0].mxu1  ;;  %v1947_v28 = vmax.f32 %v1855_v25, 0.0  ;;  %v1857_v30 = vpop.f32.mrb[1].mxu0 }
 0x1eb   : > { %v1952_v29 = vmax.f32 %v7604_v26, 0.0  ;;  %v1932_v31 = vpop.f32.mrb[1].mxu1  ;;  %v1948_v32 = vmax.f32 %v1857_v30, 0.0 }
 0x1ec   : > { %v1949_v33 = vmax.f32 %v1932_v31, 0.0  ;;  %v9286_v34 = vmul.f32 %v9279_v23, %v1947_v28 }
 0x1ed   : > { %v1974_v35 = vmul.f32 %v9281_v24, %v1952_v29  ;;  %v9290_v36 = vmul.f32 %v9283_v27, %v1948_v32  ;;  %v1861_v38 = vpop.f32.mrb[2].mxu0 }
 0x1ee   : > { %v1971_v37 = vmul.f32 %v9281_v24, %v1949_v33  ;;  %v1950_v39 = vmax.f32 %v1861_v38, 0.0  ;;  %v1863_v40 = vpop.f32.mrb[3].mxu0 }
 0x1ef   : > { %v1951_v41 = vmax.f32 %v1863_v40, 0.0  ;;  %v8268_v43 = vpack.i.bf16 %v9290_v36, %v9286_v34 }
 0x1f0   : > { %v8253_v42 = vpack.i.bf16 %v1971_v37, %v9290_v36  ;;  %v9297_v44 = vmul.f32 %v9279_v23, %v1950_v39  ;;  %v8288_v45 = vpack.i.bf16 %v1974_v35, %v1971_v37  ;;  %v9321_v53 = vpack.c.bf16 %v1974_v35, %v1971_v37 }
 0x1f1   : > { %v9300_v46 = vmul.f32 %v9283_v27, %v1951_v41  ;;  %v9421_v41 = vld [vmem:[%s10121_s2 + $0x8] sm:$0xff] }
 0x1f2   : > { %8254 = vrot.lane.b32.xlu0 %v8253_v42, %s8870_s9  ;;  %v8323_v47 = vpack.i.bf16 %v9297_v44, %v9286_v34  ;;  %v7828_v52 = vpack.c.bf16 %v9297_v44, %v9286_v34 }
 0x1f3   : > { %v8258_v48 = vpack.i.bf16 %v1974_v35, %v9300_v46  ;;  %v8278_v49 = vpack.i.bf16 %v9300_v46, %v9297_v44  ;;  %v7826_v51 = vpack.c.bf16 %v9300_v46, %v9290_v36  ;;  %v1989_v46 = vld [vmem:[%s10121_s2 + $0x40] sm:$0xff] }
 0x1f5   : > { %8259 = vrot.lane.b32.xlu1 %v8258_v48, %s8870_s9 }
 0x1f6   : > { %8264 = vrot.lane.b32.xlu0 %v8253_v42, %s8871_s14 }
 0x1f9   : > { %8274 = vrot.lane.b32.xlu1 %v8258_v48, %s8871_s14 }
 0x1fa   : > { %8269 = vrot.lane.b32.xlu0 %v8268_v43, %s8872_s29 }
 0x1fd   : > { %8279 = vrot.lane.b32.xlu1 %v8278_v49, %s8872_s29 }
 0x1fe   : > { %8284 = vrot.lane.b32.xlu0 %v8869_v0, %s8872_s29 }
 0x201   : > { %8289 = vrot.lane.b32.xlu1 %v8288_v45, %s8872_s29 }
 0x202   : > { %8294 = vrot.lane.b32.xlu0 %v8268_v43, %s10136_s10 }
 0x205   : > { %8299 = vrot.lane.b32.xlu1 %v8278_v49, %s10136_s10 }
 0x206   : > { %8304 = vrot.lane.b32.xlu0 %v8869_v0, %s10136_s10 }
 0x209   : > { %8309 = vrot.lane.b32.xlu1 %v8288_v45, %s10136_s10 }
 0x20a   : > { %8314 = vrot.lane.b32.xlu0 %v8253_v42, %s10134_s15 }
 0x20d   : > { %8319 = vrot.lane.b32.xlu1 %v8258_v48, %s10134_s15 }
 0x20e   : > { %8324 = vrot.lane.b32.xlu0 %v8323_v47, %s10134_s15 }
 0x211   : > { %8329 = vrot.lane.b32.xlu1 %v8869_v0, %s10134_s15 }
 0x212   : > { %8334 = vrot.lane.b32.xlu0 %v8253_v42, %s10132_s20 }
 0x215   : > { %8339 = vrot.lane.b32.xlu1 %v8258_v48, %s10132_s20 }
 0x216   : > { %8344 = vrot.lane.b32.xlu0 %v8323_v47, %s10132_s20 }
 0x219   : > { %8349 = vrot.lane.b32.xlu1 %v8869_v0, %s10132_s20 }
 0x21a   : > { %8354 = vrot.lane.b32.xlu0 %v8253_v42, %s10130_s22 }
 0x21d   : > { %8364 = vrot.lane.b32.xlu1 %v8258_v48, %s10130_s22 }
 0x21e   : > { %8359 = vrot.lane.b32.xlu0 %v8323_v47, %s10130_s22 }
 0x221   : > { %8369 = vrot.lane.b32.xlu1 %v8323_v47, %s8870_s9 }
 0x222   : > { %8374 = vrot.lane.b32.xlu0 %v8869_v0, %s8870_s9 }
 0x225   : > { %8379 = vrot.lane.b32.xlu1 %v8869_v0, %s10130_s22 }
 0x226   : > { %8384 = vrot.lane.b32.xlu0 %v8323_v47, %s8871_s14 }
 0x229   : > { %8389 = vrot.lane.b32.xlu1 %v8253_v42, %s8877_s23 }
 0x22a   : > { %8399 = vrot.lane.b32.xlu0 %v8258_v48, %s8877_s23 }
 0x22d   : > { %8394 = vrot.lane.b32.xlu1 %v8869_v0, %s8871_s14 }
 0x22e   : > { %8404 = vrot.lane.b32.xlu0 %v8323_v47, %s8877_s23 }
 0x231   : > { %8409 = vrot.lane.b32.xlu1 %v8869_v0, %s8877_s23 }
 0x232   : > { %3724 = vperm.xlu0 %8413, %v3720_v55  }
 0x235   : > { %3729 = vperm.xlu1 %8414, %v3721_v54  }
 0x236   : > { %3747 = vperm.xlu0 %8413, %v3739_v58  }
 0x239   : > { %3742 = vperm.xlu1 %8414, %v3738_v57  }
 0x264   : > { %v9372_v59 = vpop.permute.xlu0 %8254 }
 0x265   : > { %v8257_v60 = vunpack.i.h.bf16 %v9372_v59  ;;  %v8256_v61 = vunpack.i.l.bf16 %v9372_v59 }
 0x267   : > { %v9376_v62 = vpop.permute.xlu1 %8259  ;;  %v2033_v5 = vsel %vm341_vm1, %v8256_v61, %v8257_v60 }
 0x268   : > { %v9378_v63 = vpop.permute.xlu0 %8264  ;;  %v8262_v1 = vunpack.i.h.bf16 %v9376_v62  ;;  %v8261_v2 = vunpack.i.l.bf16 %v9376_v62 }
 0x269   : > { %v8267_v3 = vunpack.i.h.bf16 %v9378_v63  ;;  %v8266_v4 = vunpack.i.l.bf16 %v9378_v63 }
 0x26a   : > { %v2036_v6 = vsel %vm341_vm1, %v8261_v2, %v8262_v1 }
 0x26b   : > { %v9390_v7 = vpop.permute.xlu1 %8274  ;;  %v7798_v9 = vpack.c.bf16 %v2036_v6, %v2033_v5  ;;  %v2220_v15 = vsel %vm515_vm2, %v8266_v4, %v8267_v3 }
 0x26c   : > { %v8270_v8 = vpop.permute.xlu0 %8269  ;;  %v8277_v10 = vunpack.i.h.bf16 %v9390_v7  ;;  %v8276_v11 = vunpack.i.l.bf16 %v9390_v7 }
 0x26d   : > { %7799 = vmatprep.subr.bf16.mxu1 %v7798_v9  ;;  %v8272_v12 = vunpack.i.h.bf16 %v8270_v8  ;;  %v8271_v13 = vunpack.i.l.bf16 %v8270_v8 }
 0x26e   : > { %7801 = vmatpush3.bf16.msra.mxu1 %v7798_v9  ;;  %v2223_v16 = vsel %vm515_vm2, %v8276_v11, %v8277_v10  ;;  %v1986_v10 = vld [vmem:[%s10121_s2 + $0x28] sm:$0xff] }
 0x26f   : > { %v8280_v17 = vpop.permute.xlu1 %8279  ;;  %v7806_v19 = vpack.c.bf16 %v2223_v16, %v2220_v15  ;;  %v2405_v28 = vsel %vm691_vm3, %v8271_v13, %v8272_v12 }
 0x270   : > { %v8285_v18 = vpop.permute.xlu0 %8284  ;;  %v8282_v21 = vunpack.i.h.bf16 %v8280_v17  ;;  %v8281_v22 = vunpack.i.l.bf16 %v8280_v17 }
 0x271   : > { %v8287_v25 = vunpack.i.h.bf16 %v8285_v18  ;;  %v8286_v26 = vunpack.i.l.bf16 %v8285_v18  ;;  %7610 = vmatmul.mubr.msk.f32.vlgmr.msra.gmra.mrb[2].mxu1 %vm2043_vm9, %v9397_v14  ;;  %7807 = vmatprep.subr.bf16.mxu1 %v7806_v19 }
 0x272   : > { %7809 = vmatpush3.bf16.msra.mxu1 %v7806_v19  ;;  %v2408_v29 = vsel %vm691_vm3, %v8281_v22, %v8282_v21  ;;  %7616 = vmatprep.mubr.msk.f32.mxu1 %vm2043_vm9, %v9408_v20 }
 0x273   : > { %v8290_v30 = vpop.permute.xlu1 %8289  ;;  %v7810_v32 = vpack.c.bf16 %v2408_v29, %v2405_v28  ;;  %v2407_v37 = vsel %vm691_vm3, %v8287_v25, %v8281_v22  ;;  %v2404_v38 = vsel %vm691_vm3, %v8286_v26, %v8271_v13  ;;  %v1987_v26 = vld [vmem:[%s10121_s2 + $0x30] sm:$0xff] }
 0x274   : > { %v8295_v31 = vpop.permute.xlu0 %8294  ;;  %v8292_v33 = vunpack.i.h.bf16 %v8290_v30  ;;  %v8291_v35 = vunpack.i.l.bf16 %v8290_v30  ;;  %v7812_v49 = vpack.c.bf16 %v2407_v37, %v2404_v38  ;;  %v1988_v30 = vld [vmem:[%s10121_s2 + $0x38] sm:$0xff] }
 0x275   : > { %7811 = vmatprep.subr.bf16.mxu1 %v7810_v32  ;;  %v8297_v39 = vunpack.i.h.bf16 %v8295_v31  ;;  %v8296_v40 = vunpack.i.l.bf16 %v8295_v31 }
 0x276   : > { %v2406_v42 = vsel %vm691_vm3, %v8272_v12, %v8291_v35  ;;  %v2409_v43 = vsel %vm691_vm3, %v8282_v21, %v8292_v33 }
 0x277   : > { %v8300_v45 = vpop.permute.xlu1 %8299  ;;  %v7814_v48 = vpack.c.bf16 %v2409_v43, %v2406_v42  ;;  %v2597_v57 = vsel %vm873_vm4, %v8296_v40, %v8297_v39 }
 0x278   : > { %v8305_v47 = vpop.permute.xlu0 %8304  ;;  %v8302_v54 = vunpack.i.h.bf16 %v8300_v45  ;;  %v8301_v55 = vunpack.i.l.bf16 %v8300_v45 }
 0x279   : > { %7617 = vmatmul.mubr.msk.f32.vlgmr.msra.gmra.mrb[2].mxu1 %vm2043_vm9, %v9421_v41  ;;  %v8307_v5 = vunpack.i.h.bf16 %v8305_v47  ;;  %v8306_v6 = vunpack.i.l.bf16 %v8305_v47 }
 0x27a   : > { %7813 = vmatpush1.bf16.msra.mxu1 %v7812_v49  ;;  %2486 = vmatprep.mubr.f32.mxu1 %v8869_v0  ;;  %v2600_v58 = vsel %vm873_vm4, %v8301_v55, %v8302_v54 }
 0x27b   : > { %7815 = vmatprep.subr.bf16.mxu1 %v7814_v48  ;;  %v8310_v60 = vpop.permute.xlu1 %8309  ;;  %v7818_v3 = vpack.c.bf16 %v2600_v58, %v2597_v57  ;;  %v2599_v15 = vsel %vm873_vm4, %v8307_v5, %v8301_v55  ;;  %v2596_v16 = vsel %vm873_vm4, %v8306_v6, %v8296_v40 }
 0x27c   : > { %v9433_v1 = vpop.permute.xlu0 %8314  ;;  %v8312_v8 = vunpack.i.h.bf16 %v8310_v60  ;;  %v8311_v9 = vunpack.i.l.bf16 %v8310_v60  ;;  %v7820_v22 = vpack.c.bf16 %v2599_v15, %v2596_v16  ;;  %v1990_v60 = vld [vmem:[%s10121_s2 + $0x48] sm:$0xff] }
 0x27d   : > { %7327 = vmatmul.mubr.msk.f32.vlgmr.msra.gmra.mrb[4].mxu1 %vm2043_vm9, %v1985_v56  ;;  %v8317_v37 = vunpack.i.h.bf16 %v9433_v1  ;;  %v8316_v38 = vunpack.i.l.bf16 %v9433_v1 }
 0x27e   : > { %7817 = vmatpush3.bf16.msra.mxu1 %v7814_v48  ;;  %2492 = vmatprep.mubr.f32.mxu1 %v8869_v0  ;;  %v2598_v17 = vsel %vm873_vm4, %v8297_v39, %v8311_v9  ;;  %v2601_v18 = vsel %vm873_vm4, %v8302_v54, %v8312_v8 }
 0x27f   : > { %7819 = vmatprep.subr.bf16.mxu1 %v7818_v3  ;;  %v9440_v12 = vpop.permute.xlu1 %8319  ;;  %v7822_v25 = vpack.c.bf16 %v2601_v18, %v2598_v17  ;;  %v2969_v45 = vsel %vm1230_vm5, %v8316_v38, %v8317_v37 }
 0x280   : > { %v9442_v13 = vpop.permute.xlu0 %8324  ;;  %v8322_v33 = vunpack.i.h.bf16 %v9440_v12  ;;  %v8321_v35 = vunpack.i.l.bf16 %v9440_v12 }
 0x281   : > { %7328 = vmatmul.mubr.msk.f32.gmra.mrb[6].mxu1 %vm2043_vm9, %v1986_v10  ;;  %v8327_v40 = vunpack.i.h.bf16 %v9442_v13 }
 0x282   : > { %7623 = vmatprep.mubr.msk.f32.mxu1 %vm2043_vm9, %v1985_v56 }
 0x283   : > { %v9450_v19 = vpop.permute.xlu1 %8329 }
 0x284   : > { %v9452_v21 = vpop.permute.xlu0 %8334  ;;  %v8332_v49 = vunpack.i.h.bf16 %v9450_v19  ;;  %v8331_v54 = vunpack.i.l.bf16 %v9450_v19 }
 0x285   : > { %7624 = vmatmul.mubr.msk.f32.vlgmr.msra.gmra.mrb[2].mxu1 %vm2043_vm9, %v1986_v10  ;;  %v8337_v19 = vunpack.i.h.bf16 %v9452_v21 }
 0x286   : > { %7821 = vmatpush1.bf16.msra.mxu1 %v7820_v22  ;;  %2678 = vmatprep.mubr.f32.mxu1 %v8869_v0  ;;  %v2970_v10 = vsel %vm1230_vm5, %v8317_v37, %v8331_v54  ;;  %v2973_v12 = vsel %vm1230_vm5, %v8322_v33, %v8332_v49  ;;  %v8336_v22 = vunpack.i.l.bf16 %v9452_v21 }
 0x287   : > { %7823 = vmatprep.subr.bf16.mxu1 %v7822_v25  ;;  %v9459_v28 = vpop.permute.xlu1 %8339  ;;  %v7838_v63 = vpack.c.bf16 %v2973_v12, %v2970_v10 }
 0x288   : > { %v9461_v29 = vpop.permute.xlu0 %8344  ;;  %v8341_v62 = vunpack.i.l.bf16 %v9459_v28 }
 0x289   : > { %7331 = vmatmul.mubr.msk.f32.vlgmr.msra.gmra.mrb[4].mxu1 %vm2043_vm9, %v1987_v26 }
 0x28a   : > { %7825 = vmatpush3.bf16.msra.mxu1 %v7822_v25  ;;  %2684 = vmatprep.mubr.f32.mxu1 %v8869_v0 }
 0x28b   : > { %7827 = vmatprep.subr.bf16.mxu1 %v7826_v51  ;;  %v9471_v31 = vpop.permute.xlu1 %8349  ;;  %v2972_v51 = vsel %vm1230_vm5, %v8321_v35, %v8322_v33 }
 0x28c   : > { %v9473_v32 = vpop.permute.xlu0 %8354  ;;  %v7834_v55 = vpack.c.bf16 %v2972_v51, %v2969_v45  ;;  %v8351_v37 = vunpack.i.l.bf16 %v9471_v31 }
 0x28d   : > { %7332 = vmatmul.mubr.msk.f32.gmra.mrb[6].mxu1 %vm2043_vm9, %v1988_v30 }
 0x28e   : > { %7630 = vmatprep.mubr.msk.f32.mxu1 %vm2043_vm9, %v1987_v26  ;;  %v3161_v26 = vsel %vm1412_vm6, %v8336_v22, %v8337_v19 }
 0x28f   : > { %v9481_v39 = vpop.permute.xlu1 %8364 }
 0x290   : > { %v9483_v36 = vpop.permute.xlu0 %8359 }
 0x291   : > { %7631 = vmatmul.mubr.msk.f32.vlgmr.msra.gmra.mrb[2].mxu1 %vm2043_vm9, %v1988_v30  ;;  %v8346_v30 = vunpack.i.l.bf16 %v9461_v29 }
 0x292   : > { %7829 = vmatpush1.bf16.msra.mxu1 %v7828_v52  ;;  %2842 = vmatprep.mubr.f32.mxu1 %v8869_v0  ;;  %v8326_v52 = vunpack.i.l.bf16 %v9442_v13  ;;  %v8342_v13 = vunpack.i.h.bf16 %v9459_v28  ;;  %v8347_v28 = vunpack.i.h.bf16 %v9461_v29 }
 0x293   : > { %7831 = vmatprep.subr.bf16.mxu1 %v9321_v53  ;;  %v8370_v42 = vpop.permute.xlu1 %8369 }
 0x294   : > { %v8375_v43 = vpop.permute.xlu0 %8374  ;;  %v8372_v47 = vunpack.i.h.bf16 %v8370_v42  ;;  %v8371_v48 = vunpack.i.l.bf16 %v8370_v42  ;;  %v2968_v59 = vsel %vm1230_vm5, %v8326_v52, %v8316_v38  ;;  %v3164_v7 = vsel %vm1412_vm6, %v8341_v62, %v8342_v13 }
 0x295   : > { %v8377_v34 = vunpack.i.h.bf16 %v8375_v43  ;;  %v8376_v44 = vunpack.i.l.bf16 %v8375_v43  ;;  %7335 = vmatmul.mubr.msk.f32.vlgmr.msra.gmra.mrb[4].mxu1 %vm2043_vm9, %v1989_v46  ;;  %v7842_v33 = vpack.c.bf16 %v3164_v7, %v3161_v26  ;;  %v3163_v29 = vsel %vm1412_vm6, %v8347_v28, %v8341_v62 }
 0x296   : > { %7833 = vmatpush3.bf16.msra.mxu1 %v9321_v53  ;;  %2848 = vmatprep.mubr.f32.mxu1 %v8869_v0  ;;  %v2032_v58 = vsel %vm341_vm1, %v8371_v48, %v8256_v61  ;;  %v2035_v5 = vsel %vm341_vm1, %v8372_v47, %v8261_v2  ;;  %v2971_v53 = vsel %vm1230_vm5, %v8327_v40, %v8321_v35  ;;  %v8352_v35 = vunpack.i.h.bf16 %v9471_v31 }
 0x297   : > { %v2034_v56 = vsel %vm341_vm1, %v8377_v34, %v8372_v47  ;;  %v2031_v57 = vsel %vm341_vm1, %v8376_v44, %v8371_v48  ;;  %7835 = vmatprep.subr.bf16.mxu1 %v7834_v55  ;;  %v9511_v1 = vpop.permute.xlu1 %8379  ;;  %v7794_v61 = vpack.c.bf16 %v2035_v5, %v2032_v58  ;;  %v7836_v18 = vpack.c.bf16 %v2971_v53, %v2968_v59  ;;  %v1995_v59 = vld [vmem:[%s10121_s2 + $0x70] sm:$0xff] }
 0x298   : > { %v8385_v3 = vpop.permute.xlu0 %8384  ;;  %v7796_v6 = vpack.c.bf16 %v2034_v56, %v2031_v57  ;;  %v3160_v31 = vsel %vm1412_vm6, %v8346_v30, %v8336_v22  ;;  %v8367_v40 = vunpack.i.h.bf16 %v9481_v39  ;;  %v8366_v42 = vunpack.i.l.bf16 %v9481_v39  ;;  %v1993_v39 = vld [vmem:[%s10121_s2 + $0x60] sm:$0xff]  ;;  %v1994_v56 = vld [vmem:[%s10121_s2 + $0x68] sm:$0xff] }
 0x299   : > { %v8387_v8 = vunpack.i.h.bf16 %v8385_v3  ;;  %v8386_v9 = vunpack.i.l.bf16 %v8385_v3  ;;  %7336 = vmatmul.mubr.msk.f32.gmra.mrb[6].mxu1 %vm2043_vm9, %v1990_v60  ;;  %7795 = vmatprep.subr.bf16.mxu0 %v7794_v61  ;;  %v3162_v43 = vsel %vm1412_vm6, %v8337_v19, %v8351_v37  ;;  %v3165_v45 = vsel %vm1412_vm6, %v8342_v13, %v8352_v35 }
 0x29a   : > { %7637 = vmatprep.mubr.msk.f32.mxu1 %vm2043_vm9, %v1989_v46  ;;  %7797 = vmatpush1.bf16.msra.mxu0 %v7796_v6  ;;  %v1992_v46 = vld [vmem:[%s10121_s2 + $0x58] sm:$0xff]  ;;  %v8357_v47 = vunpack.i.h.bf16 %v9473_v32  ;;  %v8356_v48 = vunpack.i.l.bf16 %v9473_v32  ;;  %v7846_v34 = vpack.c.bf16 %v3165_v45, %v3162_v43  ;;  %v3356_v44 = vsel %vm1594_vm7, %v8366_v42, %v8367_v40 }
 0x29b   : > { %v2219_v2 = vsel %vm515_vm2, %v8386_v9, %v8266_v4  ;;  %v2222_v15 = vsel %vm515_vm2, %v8387_v8, %v8276_v11  ;;  %v9530_v16 = vpop.permute.xlu1 %8389  ;;  %v1991_v4 = vld [vmem:[%s10121_s2 + $0x50] sm:$0xff]  ;;  %v8362_v32 = vunpack.i.h.bf16 %v9483_v36  ;;  %v8382_v49 = vunpack.i.h.bf16 %v9511_v1 }
 0x29c   : > { %v7802_v17 = vpack.c.bf16 %v2222_v15, %v2219_v2  ;;  %v3353_v52 = vsel %vm1594_vm7, %v8356_v48, %v8357_v47  ;;  %v8381_v54 = vunpack.i.l.bf16 %v9511_v1  ;;  %v8400_v57 = vpop.permute.xlu0 %8399  ;;  %v8392_v1 = vunpack.i.h.bf16 %v9530_v16 }
 0x29d   : > { %7638 = vmatmul.mubr.msk.f32.vlgmr.msra.gmra.mrb[2].mxu1 %vm2043_vm9, %v1990_v60  ;;  %7319 = vmatmul.mubr.msk.f32.vlgmr.msra.gmra.mrb[4].mxu0 %vm2043_vm9, %v9311_v50  ;;  %v7850_v55 = vpack.c.bf16 %v3356_v44, %v3353_v52  ;;  %v3357_v60 = vsel %vm1594_vm7, %v8367_v40, %v8382_v49  ;;  %v8391_v3 = vunpack.i.l.bf16 %v9530_v16  ;;  %v8402_v5 = vunpack.i.h.bf16 %v8400_v57 }
 0x29e   : > { %7803 = vmatprep.subr.bf16.mxu0 %v7802_v17  ;;  %7837 = vmatpush1.bf16.msra.mxu1 %v7836_v18  ;;  %v3354_v58 = vsel %vm1594_vm7, %v8357_v47, %v8381_v54  ;;  %v8401_v53 = vunpack.i.l.bf16 %v8400_v57  ;;  %v1996_v17 = vld [vmem:[%s10121_s2 + $0x78] sm:$0xff] }
 0x29f   : > { %3050 = vmatprep.mubr.f32.mxu1 %v8869_v0  ;;  %7839 = vmatprep.subr.bf16.mxu1 %v7838_v63  ;;  %v8395_v11 = vpop.permute.xlu1 %8394  ;;  %v3545_v61 = vsel %vm1776_vm8, %v8391_v3, %v8392_v1 }
 0x2a0   : > { %v8397_v21 = vunpack.i.h.bf16 %v8395_v11  ;;  %v8396_v25 = vunpack.i.l.bf16 %v8395_v11  ;;  %2120 = vmatprep.mubr.f32.mxu0 %v8869_v0  ;;  %v3548_v10 = vsel %vm1776_vm8, %v8401_v53, %v8402_v5  ;;  %v1997_v11 = vld [vmem:[%s10121_s2 + $0x80] sm:$0xff] }
 0x2a1   : > { %7339 = vmatmul.mubr.msk.f32.vlgmr.msra.gmra.mrb[4].mxu1 %vm2043_vm9, %v1991_v4  ;;  %7320 = vmatmul.mubr.msk.f32.gmra.mrb[6].mxu0 %vm2043_vm9, %v9397_v14  ;;  %v7844_v14 = vpack.c.bf16 %v3163_v29, %v3160_v31  ;;  %v7858_v2 = vpack.c.bf16 %v3548_v10, %v3545_v61 }
 0x2a2   : > { %v2218_v38 = vsel %vm515_vm2, %v8396_v25, %v8386_v9  ;;  %v2221_v50 = vsel %vm515_vm2, %v8397_v21, %v8387_v8  ;;  %7841 = vmatpush3.bf16.msra.mxu1 %v7838_v63  ;;  %3056 = vmatprep.mubr.f32.mxu1 %v8869_v0  ;;  %v7854_v8 = vpack.c.bf16 %v3357_v60, %v3354_v58  ;;  %v8405_v9 = vpop.permute.xlu0 %8404  ;;  %v1998_v21 = vld [vmem:[%s10121_s2 + $0x88] sm:$0xff] }
 0x2a3   : > { %v7804_v51 = vpack.c.bf16 %v2221_v50, %v2218_v38  ;;  %7843 = vmatprep.subr.bf16.mxu1 %v7842_v33  ;;  %2300 = vmatprep.mubr.f32.mxu0 %v8869_v0  ;;  %v8410_v12 = vpop.permute.xlu1 %8409  ;;  %v8407_v13 = vunpack.i.h.bf16 %v8405_v9  ;;  %v8406_v62 = vunpack.i.l.bf16 %v8405_v9 }
 0x2a4   : > { %v8412_v15 = vunpack.i.h.bf16 %v8410_v12  ;;  %v8411_v16 = vunpack.i.l.bf16 %v8410_v12 }
 0x2a5   : > { %7805 = vmatpush1.bf16.msra.mxu0 %v7804_v51  ;;  %7340 = vmatmul.mubr.msk.f32.gmra.mrb[6].mxu1 %vm2043_vm9, %v1992_v46  ;;  %v3544_v18 = vsel %vm1776_vm8, %v8406_v62, %v8391_v3  ;;  %v3547_v19 = vsel %vm1776_vm8, %v8407_v13, %v8401_v53 }
 0x2a6   : > { %7644 = vmatprep.mubr.msk.f32.mxu1 %vm2043_vm9, %v1991_v4  ;;  %v3546_v22 = vsel %vm1776_vm8, %v8392_v1, %v8411_v16  ;;  %v3549_v63 = vsel %vm1776_vm8, %v8402_v5, %v8412_v15  ;;  %v7860_v4 = vpack.c.bf16 %v3547_v19, %v3544_v18  ;;  %v7411_v18 = vld [vmem:[%s10123_s4 + $0x10] sm:$0xff]  ;;  %v7410_v19 = vld [vmem:[%s10122_s3 + $0x18] sm:$0xff] }
 0x2a7   : > { %v7862_v7 = vpack.c.bf16 %v3549_v63, %v3546_v22  ;;  %v7412_v22 = vld [vmem:[%s10123_s4 + $0x18] sm:$0xff] }
 0x2a8   : > { %7323 = vmatmul.mubr.msk.f32.vlgmr.msra.gmra.mrb[4].mxu0 %vm2043_vm9, %v9408_v20  ;;  %v8361_v20 = vunpack.i.l.bf16 %v9483_v36 }
 0x2a9   : > { %7645 = vmatmul.mubr.msk.f32.vlgmr.msra.gmra.mrb[2].mxu1 %vm2043_vm9, %v1992_v46  ;;  %2306 = vmatprep.mubr.f32.mxu0 %v8869_v0 }
 0x2aa   : > { %7845 = vmatpush1.bf16.msra.mxu1 %v7844_v14  ;;  %3242 = vmatprep.mubr.f32.mxu1 %v8869_v0  ;;  %v3352_v36 = vsel %vm1594_vm7, %v8361_v20, %v8356_v48 }
 0x2ab   : > { %7847 = vmatprep.subr.bf16.mxu1 %v7846_v34 }
 0x2ac   : > { %7324 = vmatmul.mubr.msk.f32.gmra.mrb[6].mxu0 %vm2043_vm9, %v9421_v41  ;;  %v3355_v41 = vsel %vm1594_vm7, %v8362_v32, %v8366_v42 }
 0x2ad   : > { %7343 = vmatmul.mubr.msk.f32.vlgmr.msra.gmra.mrb[4].mxu1 %vm2043_vm9, %v1993_v39  ;;  %3907 = vmatprep.mubr.f32.mxu0 %v8869_v0  ;;  %v7852_v6 = vpack.c.bf16 %v3355_v41, %v3352_v36 }
 0x2ae   : > { %7849 = vmatpush3.bf16.msra.mxu1 %v7846_v34  ;;  %3248 = vmatprep.mubr.f32.mxu1 %v8869_v0 }
 0x2af   : > { %7851 = vmatprep.subr.bf16.mxu1 %v7850_v55 }
 0x2b1   : > { %7344 = vmatmul.mubr.msk.f32.gmra.mrb[6].mxu1 %vm2043_vm9, %v1994_v56  ;;  %v3725_v50 = vpop.permute.xlu0 %3724 }
 0x2b2   : > { %7651 = vmatprep.mubr.msk.f32.mxu1 %vm2043_vm9, %v1993_v39 }
 0x2b4   : > { %v3730_v33 = vpop.permute.xlu1 %3729 }
 0x2b5   : > { %7652 = vmatmul.mubr.msk.f32.vlgmr.msra.gmra.mrb[2].mxu1 %vm2043_vm9, %v1994_v56  ;;  %v3748_v44 = vpop.permute.xlu0 %3747 }
 0x2b6   : > { %7853 = vmatpush1.bf16.msra.mxu1 %v7852_v6  ;;  %3434 = vmatprep.mubr.f32.mxu1 %v8869_v0 }
 0x2b7   : > { %7855 = vmatprep.subr.bf16.mxu1 %v7854_v8 }
 0x2b8   : > { %v3743_v31 = vpop.permute.xlu1 %3742 }
 0x2b9   : > { %7347 = vmatmul.mubr.msk.f32.vlgmr.msra.gmra.mrb[4].mxu1 %vm2043_vm9, %v1995_v59 }
 0x2ba   : > { %7857 = vmatpush3.bf16.msra.mxu1 %v7854_v8  ;;  %3440 = vmatprep.mubr.f32.mxu1 %v8869_v0 }
 0x2bb   : > { %7859 = vmatprep.subr.bf16.mxu1 %v7858_v2 }
 0x2bd   : > { %7348 = vmatmul.mubr.msk.f32.gmra.mrb[6].mxu1 %vm2043_vm9, %v1996_v17 }
 0x2be   : > { %7658 = vmatprep.mubr.msk.f32.mxu1 %vm2043_vm9, %v1995_v59 }
 0x2c1   : > { %7659 = vmatmul.mubr.msk.f32.vlgmr.msra.gmra.mrb[2].mxu1 %vm2043_vm9, %v1996_v17  ;;  %v7409_v17 = vld [vmem:[%s10122_s3 + $0x10] sm:$0xff] }
 0x2c2   : > { %7861 = vmatpush1.bf16.msra.mxu1 %v7860_v4  ;;  %3626 = vmatprep.mubr.f32.mxu1 %v8869_v0 }
 0x2c3   : > { %7863 = vmatprep.subr.bf16.mxu1 %v7862_v7 }
 0x2c5   : > { %7351 = vmatmul.mubr.msk.f32.vlgmr.msra.gmra.mrb[4].mxu1 %vm2043_vm9, %v1997_v11 }
 0x2c6   : > { %7865 = vmatpush3.bf16.msra.mxu1 %v7862_v7  ;;  %3632 = vmatprep.mubr.f32.mxu1 %v8869_v0 }
 0x2c9   : > { %7352 = vmatmul.mubr.msk.f32.gmra.mrb[6].mxu1 %vm2043_vm9, %v1998_v21 }
 0x2ca   : > { %7665 = vmatprep.mubr.msk.f32.mxu1 %vm2043_vm9, %v1997_v11 }
 0x2cd   : > { %7666 = vmatmul.mubr.msk.f32.vlgmr.msra.gmra.mrb[2].mxu1 %vm2043_vm9, %v1998_v21 }
 0x2ce   : > { %5683 = vmatprep.mubr.f32.mxu1 %v8869_v0 }
 0x37b   : > { %v2302_v25 = vpop.f32.mrb[4].mxu0 }
 0x37c   : > { %v2304_v26 = vpop.f32.mrb[5].mxu0 }
 0x37f   : > { %v2308_v28 = vpop.f32.mrb[6].mxu0 }
 0x380   : > { %v2310_v30 = vpop.f32.mrb[7].mxu0 }
 0x398   : > { %v3628_v35 = vpop.f32.mrb[4].mxu1 }
 0x399   : > { %v8001_v37 = vadd.f32 %v3628_v35, %v2302_v25  ;;  %v3630_v38 = vpop.f32.mrb[5].mxu1 }
 0x39a   : > { %v8002_v46 = vadd.f32 %v3630_v38, %v2304_v26 }
 0x39b   : > { %v3732_v51 = vmul.f32 %v8001_v37, %v3725_v50 }
 0x39c   : > { %v3733_v29 = vmul.f32 %v8002_v46, %v3725_v50  ;;  %v3634_v40 = vpop.f32.mrb[6].mxu1 }
 0x39d   : > { %v3750_v42 = vadd.f32 %v3743_v31, %v3732_v51  ;;  %v8003_v43 = vadd.f32 %v3634_v40, %v2308_v28  ;;  %v3636_v45 = vpop.f32.mrb[7].mxu1 }
 0x39e   : > { %v3751_v14 = vadd.f32 %v3743_v31, %v3733_v29  ;;  %v8004_v47 = vadd.f32 %v3636_v45, %v2310_v30  ;;  %v7357_v45 = vld [vmem:[%s10121_s2 + $0xa0] sm:$0xff] }
 0x39f   : > { %v3756_v48 = vmax.f32 %v3750_v42, 0.0  ;;  %v3735_v34 = vmul.f32 %v8003_v43, %v3730_v33 }
 0x3a0   : > { %v3757_v39 = vmax.f32 %v3751_v14, 0.0  ;;  %v3736_v32 = vmul.f32 %v8004_v47, %v3730_v33  ;;  %v7667_v52 = vpop.f32.mrb[2].mxu1 }
 0x3a1   : > { %v9631_v20 = vmul.f32 %v3756_v48, %v9279_v23  ;;  %v3753_v49 = vadd.f32 %v3748_v44, %v3735_v34  ;;  %v3737_v54 = vmul.f32 %v7667_v52, %v3730_v33  ;;  %v3705_v55 = vpop.f32.mrb[3].mxu1 }
 0x3a2   : > { %v9634_v56 = vmul.f32 %v3757_v39, %v9283_v27  ;;  %v3754_v57 = vadd.f32 %v3748_v44, %v3736_v32  ;;  %v3734_v41 = vmul.f32 %v3725_v50, %v3705_v55 }
 0x3a3   : > { %v3759_v36 = vmax.f32 %v3753_v49, 0.0  ;;  %v3755_v58 = vadd.f32 %v3748_v44, %v3737_v54  ;;  %v7358_v54 = vld [vmem:[%s10121_s2 + $0xa8] sm:$0xff] }
 0x3a4   : > { %v3760_v60 = vmax.f32 %v3754_v57, 0.0  ;;  %v3752_v1 = vadd.f32 %v3743_v31, %v3734_v41  ;;  %v8415_v3 = vpack.i.bf16 %v9634_v56, %v9631_v20 }
 0x3a5   : > { %v9639_v5 = vmul.f32 %v3759_v36, %v9279_v23  ;;  %v3761_v53 = vmax.f32 %v3755_v58, 0.0 }
 0x3a6   : > { %v9642_v6 = vmul.f32 %v3760_v60, %v9283_v27  ;;  %v3758_v8 = vmax.f32 %v3752_v1, 0.0  ;;  %8416 = vrot.lane.b32.xlu1 %v8415_v3, %s8870_s9 }
 0x3a7   : > { %v3767_v9 = vmul.f32 %v3761_v53, %v9281_v24  ;;  %v8505_v59 = vpack.i.bf16 %v9639_v5, %v9631_v20  ;;  %v7900_v15 = vpack.c.bf16 %v9639_v5, %v9631_v20 }
 0x3a8   : > { %v3764_v61 = vmul.f32 %v3758_v8, %v9281_v24  ;;  %v8420_v10 = vpack.i.bf16 %v9642_v6, %v9639_v5  ;;  %v7898_v2 = vpack.c.bf16 %v9642_v6, %v9634_v56  ;;  %v7364_v5 = vld [vmem:[%s10121_s2 + $0xd8] sm:$0xff] }
 0x3a9   : > { %v8495_v12 = vpack.i.bf16 %v3767_v9, %v9642_v6 }
 0x3aa   : > { %8426 = vrot.lane.b32.xlu1 %v8869_v0, %s8870_s9  ;;  %8421 = vrot.lane.b32.xlu0 %v8420_v10, %s8870_s9  ;;  %v8435_v13 = vpack.i.bf16 %v3767_v9, %v3764_v61  ;;  %v8500_v62 = vpack.i.bf16 %v3764_v61, %v9634_v56  ;;  %v9660_v16 = vpack.c.bf16 %v3767_v9, %v3764_v61  ;;  %v7363_v56 = vld [vmem:[%s10121_s2 + $0xd0] sm:$0xff] }
 0x3ae   : > { %8431 = vrot.lane.b32.xlu1 %v8415_v3, %s8871_s14  ;;  %8436 = vrot.lane.b32.xlu0 %v8435_v13, %s8870_s9 }
 0x3b2   : > { %8446 = vrot.lane.b32.xlu1 %v8869_v0, %s8871_s14  ;;  %8441 = vrot.lane.b32.xlu0 %v8420_v10, %s8871_s14 }
 0x3b6   : > { %8451 = vrot.lane.b32.xlu1 %v8415_v3, %s8872_s29  ;;  %8456 = vrot.lane.b32.xlu0 %v8435_v13, %s8871_s14 }
 0x3ba   : > { %8466 = vrot.lane.b32.xlu1 %v8869_v0, %s8872_s29  ;;  %8461 = vrot.lane.b32.xlu0 %v8420_v10, %s8872_s29 }
 0x3be   : > { %8471 = vrot.lane.b32.xlu1 %v8415_v3, %s10136_s10  ;;  %8476 = vrot.lane.b32.xlu0 %v8435_v13, %s8872_s29 }
 0x3c2   : > { %8486 = vrot.lane.b32.xlu1 %v8869_v0, %s10136_s10  ;;  %8481 = vrot.lane.b32.xlu0 %v8420_v10, %s10136_s10 }
 0x3c6   : > { %8501 = vrot.lane.b32.xlu1 %v8500_v62, %s10134_s15  ;;  %8491 = vrot.lane.b32.xlu0 %v8435_v13, %s10136_s10  ;;  %s8881_s10 = smov [#allocation8]  }
 0x3ca   : > { %8506 = vrot.lane.b32.xlu1 %v8505_v59, %s10134_s15  ;;  %8496 = vrot.lane.b32.xlu0 %v8495_v12, %s10134_s15 }
 0x3ce   : > { %8521 = vrot.lane.b32.xlu1 %v8500_v62, %s10151_s21  ;;  %8511 = vrot.lane.b32.xlu0 %v8869_v0, %s10134_s15  ;;  %s8797_s15 = sshll.u32 %s8881_s10, 4  ;;  %s8798_s15 = int_to_ptr.vmem [resolvable:$false] %s8797_s15 }
 0x3cf   : > { %s8799_s30 = scalar_lea.vmem %s8798_s15, 768 }
 0x3d2   : > { %8526 = vrot.lane.b32.xlu1 %v8505_v59, %s10151_s21  ;;  %8516 = vrot.lane.b32.xlu0 %v8495_v12, %s10151_s21 }
 0x3d6   : > { %8541 = vrot.lane.b32.xlu1 %v8500_v62, %s10152_s11  ;;  %8531 = vrot.lane.b32.xlu0 %v8869_v0, %s10151_s21 }
 0x3da   : > { %8546 = vrot.lane.b32.xlu1 %v8505_v59, %s10152_s11  ;;  %8536 = vrot.lane.b32.xlu0 %v8495_v12, %s10152_s11 }
 0x3de   : > { %8561 = vrot.lane.b32.xlu1 %v8500_v62, %s8877_s23  ;;  %8551 = vrot.lane.b32.xlu0 %v8869_v0, %s10152_s11 }
 0x3e2   : > { %8566 = vrot.lane.b32.xlu1 %v8505_v59, %s8877_s23  ;;  %8556 = vrot.lane.b32.xlu0 %v8495_v12, %s8877_s23 }
 0x3e6   : > { %5518 = vperm.xlu1 %8414, %v7409_v17   ;;  %8571 = vrot.lane.b32.xlu0 %v8869_v0, %s8877_s23 }
 0x3ea   : > { %5537 = vperm.xlu1 %8414, %v7411_v18   ;;  %5523 = vperm.xlu0 %8413, %v7410_v19   ;;  %v7355_v19 = vld [vmem:[%s10121_s2 + $0x90] sm:$0xff] }
 0x3ee   : > { %5542 = vperm.xlu0 %8413, %v7412_v22  }
 0x418   : > { %v8417_v63 = vpop.permute.xlu1 %8416 }
 0x419   : > { %v8419_v4 = vunpack.i.h.bf16 %v8417_v63  ;;  %v8418_v7 = vunpack.i.l.bf16 %v8417_v63 }
 0x41b   : > { %v3826_v37 = vsel %vm341_vm1, %v8418_v7, %v8419_v4 }
 0x41c   : > { %v8427_v11 = vpop.permute.xlu1 %8426  ;;  %v8422_v21 = vpop.permute.xlu0 %8421 }
 0x41d   : > { %v8429_v25 = vunpack.i.h.bf16 %v8427_v11  ;;  %v8428_v26 = vunpack.i.l.bf16 %v8427_v11  ;;  %v8424_v28 = vunpack.i.h.bf16 %v8422_v21  ;;  %v8423_v30 = vunpack.i.l.bf16 %v8422_v21 }
 0x41f   : > { %v3825_v33 = vsel %vm341_vm1, %v8428_v26, %v8418_v7  ;;  %v3828_v35 = vsel %vm341_vm1, %v8429_v25, %v8423_v30  ;;  %v3829_v38 = vsel %vm341_vm1, %v8423_v30, %v8424_v28 }
 0x420   : > { %v7868_v50 = vpack.c.bf16 %v3828_v35, %v3825_v33  ;;  %v8432_v46 = vpop.permute.xlu1 %8431  ;;  %v8437_v51 = vpop.permute.xlu0 %8436  ;;  %v7866_v29 = vpack.c.bf16 %v3829_v38, %v3826_v37 }
 0x421   : > { %v8439_v31 = vunpack.i.h.bf16 %v8437_v51  ;;  %v8438_v40 = vunpack.i.l.bf16 %v8437_v51  ;;  %v8434_v42 = vunpack.i.h.bf16 %v8432_v46  ;;  %v8433_v43 = vunpack.i.l.bf16 %v8432_v46 }
 0x422   : > { %7867 = vmatprep.subr.bf16.mxu0 %v7866_v29 }
 0x423   : > { %7869 = vmatpush1.bf16.msra.mxu0 %v7868_v50  ;;  %v3827_v14 = vsel %vm341_vm1, %v8419_v4, %v8438_v40  ;;  %v3830_v47 = vsel %vm341_vm1, %v8424_v28, %v8439_v31  ;;  %v4012_v55 = vsel %vm515_vm2, %v8433_v43, %v8434_v42  ;;  %v7356_v28 = vld [vmem:[%s10121_s2 + $0x98] sm:$0xff] }
 0x424   : > { %v8447_v48 = vpop.permute.xlu1 %8446  ;;  %v8442_v34 = vpop.permute.xlu0 %8441  ;;  %v7870_v39 = vpack.c.bf16 %v3830_v47, %v3827_v14 }
 0x425   : > { %v8444_v44 = vunpack.i.h.bf16 %v8442_v34  ;;  %v8443_v32 = vunpack.i.l.bf16 %v8442_v34  ;;  %v8449_v52 = vunpack.i.h.bf16 %v8447_v48  ;;  %v8448_v49 = vunpack.i.l.bf16 %v8447_v48 }
 0x426   : > { %7373 = vmatmul.mubr.msk.f32.vlgmr.msra.gmra.mrb[8].mxu0 %vm2043_vm9, %v7357_v45  ;;  %7871 = vmatprep.subr.bf16.mxu0 %v7870_v39 }
 0x427   : > { %7873 = vmatpush3.bf16.msra.mxu0 %v7870_v39  ;;  %3913 = vmatprep.mubr.f32.mxu0 %v8869_v0  ;;  %v4015_v57 = vsel %vm515_vm2, %v8443_v32, %v8444_v44  ;;  %v4011_v3 = vsel %vm515_vm2, %v8448_v49, %v8433_v43  ;;  %v4014_v53 = vsel %vm515_vm2, %v8449_v52, %v8443_v32  ;;  %v7360_v49 = vld [vmem:[%s10121_s2 + $0xb8] sm:$0xff] }
 0x428   : > { %v8452_v41 = vpop.permute.xlu1 %8451  ;;  %v8457_v36 = vpop.permute.xlu0 %8456  ;;  %v7874_v58 = vpack.c.bf16 %v4015_v57, %v4012_v55  ;;  %v7876_v13 = vpack.c.bf16 %v4014_v53, %v4011_v3 }
 0x429   : > { %v8459_v60 = vunpack.i.h.bf16 %v8457_v36  ;;  %v8458_v1 = vunpack.i.l.bf16 %v8457_v36  ;;  %v8454_v8 = vunpack.i.h.bf16 %v8452_v41  ;;  %v8453_v9 = vunpack.i.l.bf16 %v8452_v41 }
 0x42a   : > { %7374 = vmatmul.mubr.msk.f32.gmra.mrb[10].mxu0 %vm2043_vm9, %v7358_v54  ;;  %7875 = vmatprep.subr.bf16.mxu0 %v7874_v58 }
 0x42b   : > { %7672 = vmatprep.mubr.msk.f32.mxu0 %vm2043_vm9, %v7357_v45  ;;  %v4013_v59 = vsel %vm515_vm2, %v8434_v42, %v8458_v1  ;;  %v4016_v61 = vsel %vm515_vm2, %v8444_v44, %v8459_v60  ;;  %v4198_v22 = vsel %vm691_vm3, %v8453_v9, %v8454_v8  ;;  %v7359_v45 = vld [vmem:[%s10121_s2 + $0xb0] sm:$0xff]  ;;  %v7361_v60 = vld [vmem:[%s10121_s2 + $0xc0] sm:$0xff]  ;;  %v7362_v1 = vld [vmem:[%s10121_s2 + $0xc8] sm:$0xff] }
 0x42c   : > { %v8462_v10 = vpop.permute.xlu0 %8461  ;;  %v7878_v12 = vpack.c.bf16 %v4016_v61, %v4013_v59  ;;  %v8467_v18 = vpop.permute.xlu1 %8466 }
 0x42d   : > { %v8464_v62 = vunpack.i.h.bf16 %v8462_v10  ;;  %v8463_v17 = vunpack.i.l.bf16 %v8462_v10  ;;  %v8469_v11 = vunpack.i.h.bf16 %v8467_v18  ;;  %v8468_v21 = vunpack.i.l.bf16 %v8467_v18 }
 0x42e   : > { %7673 = vmatmul.mubr.msk.f32.vlgmr.msra.gmra.mrb[12].mxu0 %vm2043_vm9, %v7358_v54 }
 0x42f   : > { %7877 = vmatpush1.bf16.msra.mxu0 %v7876_v13  ;;  %4093 = vmatprep.mubr.f32.mxu0 %v8869_v0  ;;  %v4201_v63 = vsel %vm691_vm3, %v8463_v17, %v8464_v62  ;;  %v4197_v35 = vsel %vm691_vm3, %v8468_v21, %v8453_v9  ;;  %v4200_v37 = vsel %vm691_vm3, %v8469_v11, %v8463_v17 }
 0x430   : > { %7879 = vmatprep.subr.bf16.mxu0 %v7878_v12  ;;  %v8477_v4 = vpop.permute.xlu0 %8476  ;;  %v7882_v7 = vpack.c.bf16 %v4201_v63, %v4198_v22  ;;  %v8472_v33 = vpop.permute.xlu1 %8471  ;;  %v7884_v29 = vpack.c.bf16 %v4200_v37, %v4197_v35  ;;  %v7365_v35 = vld [vmem:[%s10121_s2 + $0xe0] sm:$0xff] }
 0x431   : > { %v8479_v25 = vunpack.i.h.bf16 %v8477_v4  ;;  %v8478_v26 = vunpack.i.l.bf16 %v8477_v4  ;;  %v8474_v31 = vunpack.i.h.bf16 %v8472_v33  ;;  %v8473_v40 = vunpack.i.l.bf16 %v8472_v33 }
 0x432   : > { %7377 = vmatmul.mubr.msk.f32.vlgmr.msra.gmra.mrb[8].mxu0 %vm2043_vm9, %v7355_v19 }
 0x433   : > { %7881 = vmatpush3.bf16.msra.mxu0 %v7878_v12  ;;  %4099 = vmatprep.mubr.f32.mxu0 %v8869_v0  ;;  %v4199_v46 = vsel %vm691_vm3, %v8454_v8, %v8478_v26  ;;  %v4202_v51 = vsel %vm691_vm3, %v8464_v62, %v8479_v25  ;;  %v4390_v48 = vsel %vm873_vm4, %v8473_v40, %v8474_v31 }
 0x434   : > { %7883 = vmatprep.subr.bf16.mxu0 %v7882_v7  ;;  %v8482_v30 = vpop.permute.xlu0 %8481  ;;  %v7886_v42 = vpack.c.bf16 %v4202_v51, %v4199_v46  ;;  %v8487_v43 = vpop.permute.xlu1 %8486 }
 0x435   : > { %v8484_v38 = vunpack.i.h.bf16 %v8482_v30  ;;  %v8483_v50 = vunpack.i.l.bf16 %v8482_v30  ;;  %v8489_v34 = vunpack.i.h.bf16 %v8487_v43  ;;  %v8488_v39 = vunpack.i.l.bf16 %v8487_v43 }
 0x436   : > { %7378 = vmatmul.mubr.msk.f32.gmra.mrb[10].mxu0 %vm2043_vm9, %v7356_v28 }
 0x437   : > { %7679 = vmatprep.mubr.msk.f32.mxu0 %vm2043_vm9, %v7355_v19  ;;  %v4393_v14 = vsel %vm873_vm4, %v8483_v50, %v8484_v38  ;;  %v4389_v54 = vsel %vm873_vm4, %v8488_v39, %v8473_v40  ;;  %v4392_v55 = vsel %vm873_vm4, %v8489_v34, %v8483_v50  ;;  %v7366_v40 = vld [vmem:[%s10121_s2 + $0xe8] sm:$0xff] }
 0x438   : > { %v8492_v47 = vpop.permute.xlu0 %8491  ;;  %v7890_v44 = vpack.c.bf16 %v4393_v14, %v4390_v48  ;;  %v7892_v36 = vpack.c.bf16 %v4392_v55, %v4389_v54  ;;  %v8502_v53 = vpop.permute.xlu1 %8501 }
 0x439   : > { %v8494_v32 = vunpack.i.h.bf16 %v8492_v47  ;;  %v8493_v52 = vunpack.i.l.bf16 %v8492_v47  ;;  %v8504_v59 = vunpack.i.h.bf16 %v8502_v53  ;;  %v8503_v61 = vunpack.i.l.bf16 %v8502_v53 }
 0x43a   : > { %7680 = vmatmul.mubr.msk.f32.vlgmr.msra.gmra.mrb[12].mxu0 %vm2043_vm9, %v7356_v28 }
 0x43b   : > { %7885 = vmatpush1.bf16.msra.mxu0 %v7884_v29  ;;  %4279 = vmatprep.mubr.f32.mxu0 %v8869_v0  ;;  %v4391_v57 = vsel %vm873_vm4, %v8474_v31, %v8493_v52  ;;  %v4394_v41 = vsel %vm873_vm4, %v8484_v38, %v8494_v32 }
 0x43c   : > { %7887 = vmatprep.subr.bf16.mxu0 %v7886_v42  ;;  %v7894_v58 = vpack.c.bf16 %v4394_v41, %v4391_v57  ;;  %v8497_v3 = vpop.permute.xlu0 %8496  ;;  %v8507_v12 = vpop.permute.xlu1 %8506  ;;  %v7367_v57 = vld [vmem:[%s10121_s2 + $0xf0] sm:$0xff] }
 0x43d   : > { %v8499_v8 = vunpack.i.h.bf16 %v8497_v3  ;;  %v8498_v9 = vunpack.i.l.bf16 %v8497_v3  ;;  %v8509_v13 = vunpack.i.h.bf16 %v8507_v12  ;;  %v8508_v62 = vunpack.i.l.bf16 %v8507_v12 }
 0x43e   : > { %7381 = vmatmul.mubr.msk.f32.vlgmr.msra.gmra.mrb[8].mxu0 %vm2043_vm9, %v7359_v45 }
 0x43f   : > { %7889 = vmatpush3.bf16.msra.mxu0 %v7886_v42  ;;  %4285 = vmatprep.mubr.f32.mxu0 %v8869_v0  ;;  %v4765_v6 = vsel %vm1230_vm5, %v8498_v9, %v8499_v8  ;;  %v4761_v22 = vsel %vm1230_vm5, %v8508_v62, %v8503_v61  ;;  %v4764_v63 = vsel %vm1230_vm5, %v8509_v13, %v8498_v9 }
 0x440   : > { %7891 = vmatprep.subr.bf16.mxu0 %v7890_v44  ;;  %v8512_v10 = vpop.permute.xlu0 %8511  ;;  %v8522_v19 = vpop.permute.xlu1 %8521  ;;  %v7908_v21 = vpack.c.bf16 %v4764_v63, %v4761_v22 }
 0x441   : > { %v8514_v18 = vunpack.i.h.bf16 %v8512_v10  ;;  %v8513_v20 = vunpack.i.l.bf16 %v8512_v10  ;;  %v8524_v25 = vunpack.i.h.bf16 %v8522_v19  ;;  %v8523_v26 = vunpack.i.l.bf16 %v8522_v19 }
 0x442   : > { %7382 = vmatmul.mubr.msk.f32.gmra.mrb[10].mxu0 %vm2043_vm9, %v7360_v49 }
 0x443   : > { %7686 = vmatprep.mubr.msk.f32.mxu0 %vm2043_vm9, %v7359_v45  ;;  %v4766_v11 = vsel %vm1230_vm5, %v8499_v8, %v8514_v18  ;;  %v4954_v38 = vsel %vm1412_vm6, %v8523_v26, %v8524_v25  ;;  %v7368_v8 = vld [vmem:[%s10121_s2 + $0xf8] sm:$0xff] }
 0x444   : > { %v8527_v33 = vpop.permute.xlu1 %8526 }
 0x445   : > { %v8529_v50 = vunpack.i.h.bf16 %v8527_v33  ;;  %v8528_v46 = vunpack.i.l.bf16 %v8527_v33 }
 0x446   : > { %7687 = vmatmul.mubr.msk.f32.vlgmr.msra.gmra.mrb[12].mxu0 %vm2043_vm9, %v7360_v49 }
 0x447   : > { %7893 = vmatpush1.bf16.msra.mxu0 %v7892_v36  ;;  %4471 = vmatprep.mubr.f32.mxu0 %v8869_v0  ;;  %v4953_v45 = vsel %vm1412_vm6, %v8528_v46, %v8523_v26 }
 0x448   : > { %7895 = vmatprep.subr.bf16.mxu0 %v7894_v58  ;;  %v8542_v43 = vpop.permute.xlu1 %8541 }
 0x449   : > { %v8544_v32 = vunpack.i.h.bf16 %v8542_v43  ;;  %v8543_v52 = vunpack.i.l.bf16 %v8542_v43 }
 0x44a   : > { %7385 = vmatmul.mubr.msk.f32.vlgmr.msra.gmra.mrb[8].mxu0 %vm2043_vm9, %v7361_v60 }
 0x44b   : > { %7897 = vmatpush3.bf16.msra.mxu0 %v7894_v58  ;;  %4477 = vmatprep.mubr.f32.mxu0 %v8869_v0  ;;  %v5146_v36 = vsel %vm1594_vm7, %v8543_v52, %v8544_v32 }
 0x44c   : > { %7899 = vmatprep.subr.bf16.mxu0 %v7898_v2  ;;  %v4762_v2 = vsel %vm1230_vm5, %v8503_v61, %v8504_v59  ;;  %v8547_v55 = vpop.permute.xlu1 %8546 }
 0x44d   : > { %v7906_v17 = vpack.c.bf16 %v4765_v6, %v4762_v2  ;;  %v8549_v58 = vunpack.i.h.bf16 %v8547_v55 }
 0x44e   : > { %7386 = vmatmul.mubr.msk.f32.gmra.mrb[10].mxu0 %vm2043_vm9, %v7362_v1 }
 0x44f   : > { %7693 = vmatprep.mubr.msk.f32.mxu0 %vm2043_vm9, %v7361_v60  ;;  %v8548_v60 = vunpack.i.l.bf16 %v8547_v55 }
 0x451   : > { %v5145_v61 = vsel %vm1594_vm7, %v8548_v60, %v8543_v52 }
 0x452   : > { %7694 = vmatmul.mubr.msk.f32.vlgmr.msra.gmra.mrb[12].mxu0 %vm2043_vm9, %v7362_v1 }
 0x453   : > { %7901 = vmatpush1.bf16.msra.mxu0 %v7900_v15  ;;  %4635 = vmatprep.mubr.f32.mxu0 %v8869_v0  ;;  %v8517_v15 = vpop.permute.xlu0 %8516 }
 0x454   : > { %7903 = vmatprep.subr.bf16.mxu0 %v9660_v16  ;;  %v8519_v4 = vunpack.i.h.bf16 %v8517_v15  ;;  %v8518_v7 = vunpack.i.l.bf16 %v8517_v15 }
 0x456   : > { %7389 = vmatmul.mubr.msk.f32.vlgmr.msra.gmra.mrb[8].mxu0 %vm2043_vm9, %v7363_v56  ;;  %v4957_v37 = vsel %vm1412_vm6, %v8518_v7, %v8519_v4  ;;  %v4956_v14 = vsel %vm1412_vm6, %v8529_v50, %v8518_v7 }
 0x457   : > { %7905 = vmatpush3.bf16.msra.mxu0 %v9660_v16  ;;  %4641 = vmatprep.mubr.f32.mxu0 %v8869_v0  ;;  %v4763_v16 = vsel %vm1230_vm5, %v8504_v59, %v8513_v20  ;;  %v8532_v28 = vpop.permute.xlu0 %8531  ;;  %v7914_v51 = vpack.c.bf16 %v4957_v37, %v4954_v38  ;;  %v7916_v44 = vpack.c.bf16 %v4956_v14, %v4953_v45  ;;  %v8562_v59 = vpop.permute.xlu1 %8561  ;;  %v7371_v37 = vld [vmem:[%s10121_s2 + $0x110] sm:$0xff]  ;;  %v7372_v38 = vld [vmem:[%s10121_s2 + $0x118] sm:$0xff] }
 0x458   : > { %7907 = vmatprep.subr.bf16.mxu0 %v7906_v17  ;;  %v7910_v30 = vpack.c.bf16 %v4766_v11, %v4763_v16  ;;  %v8534_v29 = vunpack.i.h.bf16 %v8532_v28  ;;  %v8533_v31 = vunpack.i.l.bf16 %v8532_v28  ;;  %v8564_v62 = vunpack.i.h.bf16 %v8562_v59 }
 0x459   : > { %v8563_v17 = vunpack.i.l.bf16 %v8562_v59 }
 0x45a   : > { %7390 = vmatmul.mubr.msk.f32.gmra.mrb[10].mxu0 %vm2043_vm9, %v7364_v5  ;;  %v4955_v34 = vsel %vm1412_vm6, %v8524_v25, %v8533_v31  ;;  %v4958_v39 = vsel %vm1412_vm6, %v8519_v4, %v8534_v29 }
 0x45b   : > { %7700 = vmatprep.mubr.msk.f32.mxu0 %vm2043_vm9, %v7363_v56  ;;  %v8537_v42 = vpop.permute.xlu0 %8536  ;;  %v7918_v54 = vpack.c.bf16 %v4958_v39, %v4955_v34  ;;  %v8567_v20 = vpop.permute.xlu1 %8566  ;;  %v5338_v22 = vsel %vm1776_vm8, %v8563_v17, %v8564_v62 }
 0x45c   : > { %v8539_v47 = vunpack.i.h.bf16 %v8537_v42  ;;  %v8538_v48 = vunpack.i.l.bf16 %v8537_v42  ;;  %v8569_v63 = vunpack.i.h.bf16 %v8567_v20  ;;  %v8568_v4 = vunpack.i.l.bf16 %v8567_v20 }
 0x45e   : > { %7701 = vmatmul.mubr.msk.f32.vlgmr.msra.gmra.mrb[12].mxu0 %vm2043_vm9, %v7364_v5  ;;  %v5149_v41 = vsel %vm1594_vm7, %v8538_v48, %v8539_v47  ;;  %v5148_v10 = vsel %vm1594_vm7, %v8549_v58, %v8538_v48  ;;  %v7369_v5 = vld [vmem:[%s10121_s2 + $0x100] sm:$0xff]  ;;  %v5337_v25 = vsel %vm1776_vm8, %v8568_v4, %v8563_v17 }
 0x45f   : > { %7909 = vmatpush1.bf16.msra.mxu0 %v7908_v21  ;;  %4843 = vmatprep.mubr.f32.mxu0 %v8869_v0  ;;  %v8552_v49 = vpop.permute.xlu0 %8551  ;;  %v7922_v1 = vpack.c.bf16 %v5149_v41, %v5146_v36  ;;  %v7924_v13 = vpack.c.bf16 %v5148_v10, %v5145_v61  ;;  %v7370_v21 = vld [vmem:[%s10121_s2 + $0x108] sm:$0xff] }
 0x460   : > { %7911 = vmatprep.subr.bf16.mxu0 %v7910_v30  ;;  %v8554_v3 = vunpack.i.h.bf16 %v8552_v49  ;;  %v8553_v53 = vunpack.i.l.bf16 %v8552_v49 }
 0x462   : > { %7393 = vmatmul.mubr.msk.f32.vlgmr.msra.gmra.mrb[8].mxu0 %vm2043_vm9, %v7365_v35  ;;  %v5147_v6 = vsel %vm1594_vm7, %v8544_v32, %v8553_v53  ;;  %v5150_v2 = vsel %vm1594_vm7, %v8539_v47, %v8554_v3 }
 0x463   : > { %7913 = vmatpush3.bf16.msra.mxu0 %v7910_v30  ;;  %4849 = vmatprep.mubr.f32.mxu0 %v8869_v0  ;;  %v8557_v9 = vpop.permute.xlu0 %8556  ;;  %v7926_v18 = vpack.c.bf16 %v5150_v2, %v5147_v6 }
 0x464   : > { %7915 = vmatprep.subr.bf16.mxu0 %v7914_v51  ;;  %v8559_v12 = vunpack.i.h.bf16 %v8557_v9  ;;  %v8558_v56 = vunpack.i.l.bf16 %v8557_v9 }
 0x465   : > { %v5519_v50 = vpop.permute.xlu1 %5518 }
 0x466   : > { %7394 = vmatmul.mubr.msk.f32.gmra.mrb[10].mxu0 %vm2043_vm9, %v7366_v40  ;;  %v5341_v15 = vsel %vm1776_vm8, %v8558_v56, %v8559_v12  ;;  %v5340_v26 = vsel %vm1776_vm8, %v8569_v63, %v8558_v56 }
 0x467   : > { %7707 = vmatprep.mubr.msk.f32.mxu0 %vm2043_vm9, %v7365_v35  ;;  %v8572_v19 = vpop.permute.xlu0 %8571  ;;  %v7930_v7 = vpack.c.bf16 %v5341_v15, %v5338_v22  ;;  %v7932_v33 = vpack.c.bf16 %v5340_v26, %v5337_v25 }
 0x468   : > { %v8574_v16 = vunpack.i.h.bf16 %v8572_v19  ;;  %v8573_v11 = vunpack.i.l.bf16 %v8572_v19 }
 0x46a   : > { %7708 = vmatmul.mubr.msk.f32.vlgmr.msra.gmra.mrb[12].mxu0 %vm2043_vm9, %v7366_v40  ;;  %v5339_v28 = vsel %vm1776_vm8, %v8564_v62, %v8573_v11  ;;  %v5342_v30 = vsel %vm1776_vm8, %v8559_v12, %v8574_v16  ;;  %v5538_v40 = vpop.permute.xlu1 %5537 }
 0x46b   : > { %7917 = vmatpush1.bf16.msra.mxu0 %v7916_v44  ;;  %5035 = vmatprep.mubr.f32.mxu0 %v8869_v0  ;;  %v7934_v35 = vpack.c.bf16 %v5342_v30, %v5339_v28  ;;  %v5524_v46 = vpop.permute.xlu0 %5523 }
 0x46c   : > { %7919 = vmatprep.subr.bf16.mxu0 %v7918_v54 }
 0x46e   : > { %7397 = vmatmul.mubr.msk.f32.vlgmr.msra.gmra.mrb[8].mxu0 %vm2043_vm9, %v7367_v57 }
 0x46f   : > { %7921 = vmatpush3.bf16.msra.mxu0 %v7918_v54  ;;  %5041 = vmatprep.mubr.f32.mxu0 %v8869_v0  ;;  %v5543_v39 = vpop.permute.xlu0 %5542 }
 0x470   : > { %7923 = vmatprep.subr.bf16.mxu0 %v7922_v1 }
 0x472   : > { %7398 = vmatmul.mubr.msk.f32.gmra.mrb[10].mxu0 %vm2043_vm9, %v7368_v8 }
 0x473   : > { %7714 = vmatprep.mubr.msk.f32.mxu0 %vm2043_vm9, %v7367_v57 }
 0x476   : > { %7715 = vmatmul.mubr.msk.f32.vlgmr.msra.gmra.mrb[12].mxu0 %vm2043_vm9, %v7368_v8 }
 0x477   : > { %7925 = vmatpush1.bf16.msra.mxu0 %v7924_v13  ;;  %5227 = vmatprep.mubr.f32.mxu0 %v8869_v0 }
 0x478   : > { %7927 = vmatprep.subr.bf16.mxu0 %v7926_v18 }
 0x47a   : > { %7401 = vmatmul.mubr.msk.f32.vlgmr.msra.gmra.mrb[8].mxu0 %vm2043_vm9, %v7369_v5 }
 0x47b   : > { %7929 = vmatpush3.bf16.msra.mxu0 %v7926_v18  ;;  %5233 = vmatprep.mubr.f32.mxu0 %v8869_v0 }
 0x47c   : > { %7931 = vmatprep.subr.bf16.mxu0 %v7930_v7 }
 0x47e   : > { %7402 = vmatmul.mubr.msk.f32.gmra.mrb[10].mxu0 %vm2043_vm9, %v7370_v21 }
 0x47f   : > { %7721 = vmatprep.mubr.msk.f32.mxu0 %vm2043_vm9, %v7369_v5 }
 0x482   : > { %7722 = vmatmul.mubr.msk.f32.vlgmr.msra.gmra.mrb[12].mxu0 %vm2043_vm9, %v7370_v21 }
 0x483   : > { %7933 = vmatpush1.bf16.msra.mxu0 %v7932_v33  ;;  %5419 = vmatprep.mubr.f32.mxu0 %v8869_v0 }
 0x484   : > { %7935 = vmatprep.subr.bf16.mxu0 %v7934_v35 }
 0x486   : > { %7405 = vmatmul.mubr.msk.f32.vlgmr.msra.gmra.mrb[8].mxu0 %vm2043_vm9, %v7371_v37 }
 0x487   : > { %7937 = vmatpush3.bf16.msra.mxu0 %v7934_v35  ;;  %5425 = vmatprep.mubr.f32.mxu0 %v8869_v0 }
 0x48a   : > { %7406 = vmatmul.mubr.msk.f32.gmra.mrb[10].mxu0 %vm2043_vm9, %v7372_v38 }
 0x48b   : > { %7728 = vmatprep.mubr.msk.f32.mxu0 %vm2043_vm9, %v7371_v37 }
 0x48e   : > { %7729 = vmatmul.mubr.msk.f32.vlgmr.msra.gmra.mrb[12].mxu0 %vm2043_vm9, %v7372_v38 }
 0x559   : > { %v5421_v51 = vpop.f32.mrb[8].mxu0 }
 0x55a   : > { %v5526_v29 = vmul.f32 %v5519_v50, %v5421_v51  ;;  %v5423_v31 = vpop.f32.mrb[9].mxu0 }
 0x55b   : > { %v5527_v42 = vmul.f32 %v5519_v50, %v5423_v31 }
 0x55c   : > { %v5545_v43 = vadd.f32 %v5538_v40, %v5526_v29 }
 0x55d   : > { %v5546_v45 = vadd.f32 %v5538_v40, %v5527_v42  ;;  %v5427_v14 = vpop.f32.mrb[10].mxu0  ;;  %v5579_v42 = vld [vmem:[#allocation6 + $0x8] sm:$0xff] }
 0x55e   : > { %v5551_v47 = vmax.f32 %v5545_v43, 0.0  ;;  %v5529_v48 = vmul.f32 %v5524_v46, %v5427_v14  ;;  %v5429_v34 = vpop.f32.mrb[11].mxu0 }
 0x55f   : > { %v5552_v44 = vmax.f32 %v5546_v45, 0.0  ;;  %v5530_v32 = vmul.f32 %v5524_v46, %v5429_v34 }
 0x560   : > { %v9874_v52 = vmul.f32 %v5551_v47, %v9279_v23  ;;  %v5548_v49 = vadd.f32 %v5543_v39, %v5529_v48  ;;  %v8879_v47 = vmov 0.0|0.0  }
 0x561   : > { %v9877_v54 = vmul.f32 %v5552_v44, %v9283_v27  ;;  %v5549_v55 = vadd.f32 %v5543_v39, %v5530_v32  ;;  %v7730_v57 = vpop.f32.mrb[12].mxu0 }
 0x562   : > { %v5554_v41 = vmax.f32 %v5548_v49, 0.0  ;;  %v5531_v36 = vmul.f32 %v7730_v57, %v5524_v46  ;;  %v5498_v58 = vpop.f32.mrb[13].mxu0 }
 0x563   : > { %v5555_v60 = vmax.f32 %v5549_v55, 0.0  ;;  %v5528_v1 = vmul.f32 %v5519_v50, %v5498_v58  ;;  %v8575_v3 = vpack.i.bf16 %v9877_v54, %v9874_v52 }
 0x564   : > { %v9882_v53 = vmul.f32 %v5554_v41, %v9279_v23  ;;  %v5550_v8 = vadd.f32 %v5543_v39, %v5531_v36 }
 0x565   : > { %v9885_v9 = vmul.f32 %v5555_v60, %v9283_v27  ;;  %v5547_v59 = vadd.f32 %v5538_v40, %v5528_v1  ;;  %8576 = vrot.lane.b32.xlu1 %v8575_v3, %s8870_s9 }
 0x566   : > { %v5556_v61 = vmax.f32 %v5550_v8, 0.0  ;;  %v8665_v10 = vpack.i.bf16 %v9882_v53, %v9874_v52  ;;  %v7968_v62 = vpack.c.bf16 %v9882_v53, %v9874_v52 }
 0x567   : > { %v5553_v12 = vmax.f32 %v5547_v59, 0.0  ;;  %v8590_v56 = vpack.i.bf16 %v9885_v9, %v9882_v53  ;;  %v7966_v13 = vpack.c.bf16 %v9885_v9, %v9877_v54 }
 0x568   : > { %v9893_v6 = vmul.f32 %v5556_v61, %v9281_v24 }
 0x569   : > { %v9896_v2 = vmul.f32 %v5553_v12, %v9281_v24  ;;  %8581 = vrot.lane.b32.xlu1 %v8869_v0, %s8870_s9  ;;  %8591 = vrot.lane.b32.xlu0 %v8590_v56, %s8870_s9  ;;  %v5577_v12 = vld [vmem:[#allocation6] sm:$0xff] }
 0x56a   : > { %v8655_v17 = vpack.i.bf16 %v9893_v6, %v9885_v9 }
 0x56b   : > { %v8595_v18 = vpack.i.bf16 %v9893_v6, %v9896_v2  ;;  %v8660_v20 = vpack.i.bf16 %v9896_v2, %v9877_v54  ;;  %v7971_v5 = vpack.c.bf16 %v9893_v6, %v9896_v2  ;;  %v6444_v6 = vld [vmem:[#allocation6 + $0x28] sm:$0xff] }
 0x56d   : > { %8586 = vrot.lane.b32.xlu1 %v8575_v3, %s8871_s14  ;;  %8596 = vrot.lane.b32.xlu0 %v8595_v18, %s8870_s9  ;;  %s10154_s9 = smov 127  }
 0x571   : > { %8606 = vrot.lane.b32.xlu1 %v8869_v0, %s8871_s14  ;;  %8601 = vrot.lane.b32.xlu0 %v8590_v56, %s8871_s14 }
 0x575   : > { %8611 = vrot.lane.b32.xlu1 %v8575_v3, %s8872_s29  ;;  %8616 = vrot.lane.b32.xlu0 %v8595_v18, %s8871_s14  ;;  %s8180_s14 = smul.u32 24, %s9058_s16 }
 0x579   : > { %8626 = vrot.lane.b32.xlu1 %v8869_v0, %s8872_s29  ;;  %8621 = vrot.lane.b32.xlu0 %v8590_v56, %s8872_s29 }
 0x57d   : > { %8631 = vrot.lane.b32.xlu1 %v8575_v3, %s10153_s5  ;;  %8636 = vrot.lane.b32.xlu0 %v8595_v18, %s8872_s29  ;;  %s8181_s29 = smul.u32 384, %s8943_s28  ;;  %s7166_s28 = scalar_lea.sflag [#allocation5], %s9058_s16 }
 0x57f   : > { %s10075_s20 = scalar_lea.hbm %s10126_s7, %s8181_s29 }
 0x581   : > { %8646 = vrot.lane.b32.xlu1 %v8869_v0, %s10153_s5  ;;  %8641 = vrot.lane.b32.xlu0 %v8590_v56, %s10153_s5 }
 0x585   : > { %8661 = vrot.lane.b32.xlu1 %v8660_v20, %s10154_s9  ;;  %8651 = vrot.lane.b32.xlu0 %v8595_v18, %s10153_s5 }
 0x589   : > { %8666 = vrot.lane.b32.xlu1 %v8665_v10, %s10154_s9  ;;  %8656 = vrot.lane.b32.xlu0 %v8655_v17, %s10154_s9 }
 0x58d   : > { %8681 = vrot.lane.b32.xlu1 %v8660_v20, %s10151_s21  ;;  %8671 = vrot.lane.b32.xlu0 %v8869_v0, %s10154_s9 }
 0x591   : > { %8686 = vrot.lane.b32.xlu1 %v8665_v10, %s10151_s21  ;;  %8676 = vrot.lane.b32.xlu0 %v8655_v17, %s10151_s21 }
 0x595   : > { %8701 = vrot.lane.b32.xlu1 %v8660_v20, %s10152_s11  ;;  %8691 = vrot.lane.b32.xlu0 %v8869_v0, %s10151_s21 }
 0x599   : > { %8706 = vrot.lane.b32.xlu1 %v8665_v10, %s10152_s11  ;;  %8696 = vrot.lane.b32.xlu0 %v8655_v17, %s10152_s11 }
 0x59d   : > { %8721 = vrot.lane.b32.xlu1 %v8660_v20, %s8877_s23  ;;  %8711 = vrot.lane.b32.xlu0 %v8869_v0, %s10152_s11 }
 0x5a1   : > { %8726 = vrot.lane.b32.xlu1 %v8665_v10, %s8877_s23  ;;  %8716 = vrot.lane.b32.xlu0 %v8655_v17, %s8877_s23 }
 0x5a5   : > { %8731 = vrot.lane.b32.xlu0 %v8869_v0, %s8877_s23  ;;  %s309_s23 = scalar_lea.vmem [#allocation8], %s8180_s14 }
 0x5a6   : > { %s7180_s21 = sshll.u32 %s309_s23, 4  ;;  %s10077_s21 = int_to_ptr.vmem [resolvable:$true] %s7180_s21 }
 0x5a7   : > { %s8793_s22 = scalar_lea.vmem %s10077_s21, 384  ;;  %p8800_p10 = scmp.lt.s32.totalorder %s10077_s21, %s8798_s15 }
 0x5a8   : > { %p8794_p4 = scmp.ne.s32.totalorder %s10077_s21, %s8793_s22  ;;  %p8801_p11 = scmp.lt.s32.totalorder %s8799_s30, %s8793_s22 }
 0x5aa   : > { %p8795_p6 = pnand %p8794_p4, %p9013_p12  ;;  %p8802_p3 = por %p8801_p11, %p8800_p10 }
 0x5ac   : > { %p8796_p8 = pneg %p8795_p6 }
 0x5ae   : > { %p8803_p7 = pnand %p8802_p3, %p8796_p8 }
 0x5d7   : > { %v8577_v15 = vpop.permute.xlu1 %8576 }
 0x5d8   : > { %v8579_v19 = vunpack.i.h.bf16 %v8577_v15  ;;  %v8578_v22 = vunpack.i.l.bf16 %v8577_v15 }
 0x5da   : > { %v5605_v28 = vsel %vm341_vm1, %v8578_v22, %v8579_v19 }
 0x5db   : > { %v8582_v63 = vpop.permute.xlu1 %8581  ;;  %v8592_v4 = vpop.permute.xlu0 %8591 }
 0x5dc   : > { %v8584_v7 = vunpack.i.h.bf16 %v8582_v63  ;;  %v8583_v16 = vunpack.i.l.bf16 %v8582_v63  ;;  %v8594_v11 = vunpack.i.h.bf16 %v8592_v4  ;;  %v8593_v21 = vunpack.i.l.bf16 %v8592_v4 }
 0x5de   : > { %v5604_v25 = vsel %vm341_vm1, %v8583_v16, %v8578_v22  ;;  %v5607_v26 = vsel %vm341_vm1, %v8584_v7, %v8593_v21  ;;  %v5608_v30 = vsel %vm341_vm1, %v8593_v21, %v8594_v11 }
 0x5df   : > { %v7940_v33 = vpack.c.bf16 %v5607_v26, %v5604_v25  ;;  %v8587_v35 = vpop.permute.xlu1 %8586  ;;  %v8597_v37 = vpop.permute.xlu0 %8596  ;;  %v7938_v38 = vpack.c.bf16 %v5608_v30, %v5605_v28 }
 0x5e0   : > { %v8599_v50 = vunpack.i.h.bf16 %v8597_v37  ;;  %v8598_v46 = vunpack.i.l.bf16 %v8597_v37  ;;  %v8589_v51 = vunpack.i.h.bf16 %v8587_v35  ;;  %v8588_v29 = vunpack.i.l.bf16 %v8587_v35 }
 0x5e1   : > { %7939 = vmatprep.subr.bf16.mxu1 %v7938_v38 }
 0x5e2   : > { %v5609_v31 = vsel %vm341_vm1, %v8594_v11, %v8599_v50  ;;  %v5606_v40 = vsel %vm341_vm1, %v8579_v19, %v8598_v46  ;;  %7941 = vmatpush1.bf16.msra.mxu1 %v7940_v33  ;;  %v5777_v32 = vsel %vm515_vm2, %v8588_v29, %v8589_v51  ;;  %v5933_v50 = vld [vmem:[#allocation6 + $0x10] sm:$0xff] }
 0x5e3   : > { %v7943_v43 = vpack.c.bf16 %v5609_v31, %v5606_v40  ;;  %v8607_v45 = vpop.permute.xlu1 %8606  ;;  %v8602_v14 = vpop.permute.xlu0 %8601  ;;  %7942 = vmatprep.subr.bf16.mxu1 %v8879_v47 }
 0x5e4   : > { %v8609_v48 = vunpack.i.h.bf16 %v8607_v45  ;;  %v8608_v34 = vunpack.i.l.bf16 %v8607_v45  ;;  %v8604_v39 = vunpack.i.h.bf16 %v8602_v14  ;;  %v8603_v44 = vunpack.i.l.bf16 %v8602_v14 }
 0x5e5   : > { %7413 = vmatmul.mubr.msk.f32.vlgmr.msra.gmra.mrb[8].mxu1 %vm2043_vm9, %v5579_v42 }
 0x5e6   : > { %v5776_v49 = vsel %vm515_vm2, %v8608_v34, %v8588_v29  ;;  %v5779_v55 = vsel %vm515_vm2, %v8609_v48, %v8603_v44  ;;  %7944 = vmatpush3.bf16.msra.mxu1 %v7943_v43  ;;  %7735 = vmatprep.mubr.msk.f32.mxu1 %vm8880_vm10, %v8869_v0  ;;  %v5780_v57 = vsel %vm515_vm2, %v8603_v44, %v8604_v39 }
 0x5e7   : > { %v7947_v41 = vpack.c.bf16 %v5779_v55, %v5776_v49  ;;  %v8612_v36 = vpop.permute.xlu1 %8611  ;;  %v8617_v58 = vpop.permute.xlu0 %8616  ;;  %v7945_v60 = vpack.c.bf16 %v5780_v57, %v5777_v32 }
 0x5e8   : > { %v8619_v1 = vunpack.i.h.bf16 %v8617_v58  ;;  %v8618_v3 = vunpack.i.l.bf16 %v8617_v58  ;;  %v8614_v8 = vunpack.i.h.bf16 %v8612_v36  ;;  %v8613_v59 = vunpack.i.l.bf16 %v8612_v36  ;;  %v6110_v58 = vld [vmem:[#allocation6 + $0x18] sm:$0xff] }
 0x5e9   : > { %7736 = vmatmul.mubr.msk.f32.vlgmr.msra.gmra.mrb[10].mxu1 %vm2043_vm9, %v5579_v42  ;;  %7946 = vmatprep.subr.bf16.mxu1 %v7945_v60 }
 0x5ea   : > { %v5778_v61 = vsel %vm515_vm2, %v8589_v51, %v8618_v3  ;;  %v5781_v10 = vsel %vm515_vm2, %v8604_v39, %v8619_v1  ;;  %7948 = vmatpush1.bf16.msra.mxu1 %v7947_v41  ;;  %5855 = vmatprep.mubr.f32.mxu1 %v8869_v0  ;;  %v5951_v63 = vsel %vm691_vm3, %v8613_v59, %v8614_v8 }
 0x5eb   : > { %v7950_v56 = vpack.c.bf16 %v5781_v10, %v5778_v61  ;;  %v8627_v17 = vpop.permute.xlu1 %8626  ;;  %v8622_v18 = vpop.permute.xlu0 %8621  ;;  %7949 = vmatprep.subr.bf16.mxu1 %v8879_v47 }
 0x5ec   : > { %v8629_v20 = vunpack.i.h.bf16 %v8627_v17  ;;  %v8628_v15 = vunpack.i.l.bf16 %v8627_v17  ;;  %v8624_v19 = vunpack.i.h.bf16 %v8622_v18  ;;  %v8623_v22 = vunpack.i.l.bf16 %v8622_v18 }
 0x5ed   : > { %7415 = vmatmul.mubr.msk.f32.vlgmr.msra.gmra.mrb[8].mxu1 %vm2043_vm9, %v5577_v12 }
 0x5ee   : > { %v5950_v4 = vsel %vm691_vm3, %v8628_v15, %v8613_v59  ;;  %v5953_v7 = vsel %vm691_vm3, %v8629_v20, %v8623_v22  ;;  %7951 = vmatpush3.bf16.msra.mxu1 %v7950_v56  ;;  %7742 = vmatprep.mubr.msk.f32.mxu1 %vm8880_vm10, %v8869_v0  ;;  %v5954_v16 = vsel %vm691_vm3, %v8623_v22, %v8624_v19  ;;  %v6287_v20 = vld [vmem:[#allocation6 + $0x20] sm:$0xff] }
 0x5ef   : > { %v7954_v11 = vpack.c.bf16 %v5953_v7, %v5950_v4  ;;  %v8632_v21 = vpop.permute.xlu1 %8631  ;;  %v8637_v25 = vpop.permute.xlu0 %8636  ;;  %v7952_v26 = vpack.c.bf16 %v5954_v16, %v5951_v63 }
 0x5f0   : > { %v8639_v28 = vunpack.i.h.bf16 %v8637_v25  ;;  %v8638_v30 = vunpack.i.l.bf16 %v8637_v25  ;;  %v8634_v33 = vunpack.i.h.bf16 %v8632_v21  ;;  %v8633_v35 = vunpack.i.l.bf16 %v8632_v21 }
 0x5f1   : > { %7743 = vmatmul.mubr.msk.f32.vlgmr.msra.gmra.mrb[10].mxu1 %vm2043_vm9, %v5577_v12  ;;  %7953 = vmatprep.subr.bf16.mxu1 %v7952_v26 }
 0x5f2   : > { %v5952_v37 = vsel %vm691_vm3, %v8614_v8, %v8638_v30  ;;  %v5955_v38 = vsel %vm691_vm3, %v8624_v19, %v8639_v28  ;;  %7955 = vmatpush1.bf16.msra.mxu1 %v7954_v11  ;;  %6029 = vmatprep.mubr.f32.mxu1 %v8869_v0  ;;  %v6128_v45 = vsel %vm873_vm4, %v8633_v35, %v8634_v33 }
 0x5f3   : > { %v7957_v46 = vpack.c.bf16 %v5955_v38, %v5952_v37  ;;  %v8647_v51 = vpop.permute.xlu1 %8646  ;;  %v8642_v29 = vpop.permute.xlu0 %8641  ;;  %7956 = vmatprep.subr.bf16.mxu1 %v8879_v47 }
 0x5f4   : > { %v8649_v31 = vunpack.i.h.bf16 %v8647_v51  ;;  %v8648_v40 = vunpack.i.l.bf16 %v8647_v51  ;;  %v8644_v42 = vunpack.i.h.bf16 %v8642_v29  ;;  %v8643_v43 = vunpack.i.l.bf16 %v8642_v29 }
 0x5f5   : > { %7417 = vmatmul.mubr.msk.f32.vlgmr.msra.gmra.mrb[8].mxu1 %vm2043_vm9, %v5933_v50 }
 0x5f6   : > { %v6127_v14 = vsel %vm873_vm4, %v8648_v40, %v8633_v35  ;;  %v6130_v48 = vsel %vm873_vm4, %v8649_v31, %v8643_v43  ;;  %7958 = vmatpush3.bf16.msra.mxu1 %v7957_v46  ;;  %7749 = vmatprep.mubr.msk.f32.mxu1 %vm8880_vm10, %v8869_v0  ;;  %v6131_v34 = vsel %vm873_vm4, %v8643_v43, %v8644_v42 }
 0x5f7   : > { %v7961_v39 = vpack.c.bf16 %v6130_v48, %v6127_v14  ;;  %v8662_v44 = vpop.permute.xlu1 %8661  ;;  %v8652_v32 = vpop.permute.xlu0 %8651  ;;  %v7959_v49 = vpack.c.bf16 %v6131_v34, %v6128_v45 }
 0x5f8   : > { %v8654_v55 = vunpack.i.h.bf16 %v8652_v32  ;;  %v8653_v57 = vunpack.i.l.bf16 %v8652_v32  ;;  %v8664_v12 = vunpack.i.h.bf16 %v8662_v44  ;;  %v8663_v56 = vunpack.i.l.bf16 %v8662_v44 }
 0x5f9   : > { %7750 = vmatmul.mubr.msk.f32.vlgmr.msra.gmra.mrb[10].mxu1 %vm2043_vm9, %v5933_v50  ;;  %7960 = vmatprep.subr.bf16.mxu1 %v7959_v49 }
 0x5fa   : > { %v6129_v41 = vsel %vm873_vm4, %v8634_v33, %v8653_v57  ;;  %v6132_v36 = vsel %vm873_vm4, %v8644_v42, %v8654_v55  ;;  %7962 = vmatpush1.bf16.msra.mxu1 %v7961_v39  ;;  %6206 = vmatprep.mubr.f32.mxu1 %v8869_v0  ;;  %v6470_v9 = vsel %vm1230_vm5, %v8663_v56, %v8664_v12  ;;  %v6629_v55 = vld [vmem:[#allocation6 + $0x30] sm:$0xff] }
 0x5fb   : > { %v7964_v60 = vpack.c.bf16 %v6132_v36, %v6129_v41  ;;  %v8667_v1 = vpop.permute.xlu1 %8666  ;;  %v8657_v3 = vpop.permute.xlu0 %8656  ;;  %7963 = vmatprep.subr.bf16.mxu1 %v8879_v47 }
 0x5fc   : > { %v8659_v8 = vunpack.i.h.bf16 %v8657_v3  ;;  %v8658_v59 = vunpack.i.l.bf16 %v8657_v3  ;;  %v8668_v17 = vunpack.i.l.bf16 %v8667_v1  ;;  %v8669_v18 = vunpack.i.h.bf16 %v8667_v1 }
 0x5fd   : > { %7419 = vmatmul.mubr.msk.f32.vlgmr.msra.gmra.mrb[8].mxu1 %vm2043_vm9, %v6110_v58 }
 0x5fe   : > { %7965 = vmatpush3.bf16.msra.mxu1 %v7964_v60  ;;  %7756 = vmatprep.mubr.msk.f32.mxu1 %vm8880_vm10, %v8869_v0  ;;  %v6473_v15 = vsel %vm1230_vm5, %v8658_v59, %v8659_v8  ;;  %v6469_v54 = vsel %vm1230_vm5, %v8668_v17, %v8663_v56 }
 0x5ff   : > { %v9995_v61 = vpop.permute.xlu1 %8681  ;;  %v8672_v10 = vpop.permute.xlu0 %8671  ;;  %7967 = vmatprep.subr.bf16.mxu1 %v7966_v13  ;;  %v6472_v13 = vsel %vm1230_vm5, %v8669_v18, %v8658_v59  ;;  %v7973_v52 = vpack.c.bf16 %v6473_v15, %v6470_v9  ;;  %v6806_v9 = vld [vmem:[#allocation6 + $0x38] sm:$0xff] }
 0x600   : > { %v8674_v63 = vunpack.i.h.bf16 %v8672_v10  ;;  %v8673_v4 = vunpack.i.l.bf16 %v8672_v10  ;;  %v7975_v11 = vpack.c.bf16 %v6472_v13, %v6469_v54  ;;  %v8684_v21 = vunpack.i.h.bf16 %v9995_v61 }
 0x601   : > { %7757 = vmatmul.mubr.msk.f32.vlgmr.msra.gmra.mrb[10].mxu1 %vm2043_vm9, %v6110_v58  ;;  %v8683_v25 = vunpack.i.l.bf16 %v9995_v61 }
 0x602   : > { %7969 = vmatpush1.bf16.msra.mxu1 %v7968_v62  ;;  %6355 = vmatprep.mubr.f32.mxu1 %v8869_v0  ;;  %v6471_v28 = vsel %vm1230_vm5, %v8664_v12, %v8673_v4  ;;  %v6474_v30 = vsel %vm1230_vm5, %v8659_v8, %v8674_v63 }
 0x603   : > { %v8687_v19 = vpop.permute.xlu1 %8686  ;;  %v8677_v22 = vpop.permute.xlu0 %8676  ;;  %7970 = vmatprep.subr.bf16.mxu1 %v8879_v47  ;;  %v7978_v37 = vpack.c.bf16 %v6474_v30, %v6471_v28  ;;  %v6647_v50 = vsel %vm1412_vm6, %v8683_v25, %v8684_v21 }
 0x604   : > { %v8679_v53 = vunpack.i.h.bf16 %v8677_v22  ;;  %v8678_v62 = vunpack.i.l.bf16 %v8677_v22  ;;  %v8688_v26 = vunpack.i.l.bf16 %v8687_v19  ;;  %v8689_v33 = vunpack.i.h.bf16 %v8687_v19 }
 0x605   : > { %7421 = vmatmul.mubr.msk.f32.vlgmr.msra.gmra.mrb[8].mxu1 %vm2043_vm9, %v6287_v20 }
 0x606   : > { %7972 = vmatpush3.bf16.msra.mxu1 %v7971_v5  ;;  %7763 = vmatprep.mubr.msk.f32.mxu1 %vm8880_vm10, %v8869_v0  ;;  %v6650_v2 = vsel %vm1412_vm6, %v8678_v62, %v8679_v53  ;;  %v6646_v38 = vsel %vm1412_vm6, %v8688_v26, %v8683_v25  ;;  %v6649_v46 = vsel %vm1412_vm6, %v8689_v33, %v8678_v62  ;;  %v6983_v26 = vld [vmem:[#allocation6 + $0x40] sm:$0xff] }
 0x607   : > { %v10016_v7 = vpop.permute.xlu1 %8701  ;;  %v8692_v16 = vpop.permute.xlu0 %8691  ;;  %7974 = vmatprep.subr.bf16.mxu1 %v7973_v52  ;;  %v7980_v31 = vpack.c.bf16 %v6650_v2, %v6647_v50  ;;  %v7982_v14 = vpack.c.bf16 %v6649_v46, %v6646_v38 }
 0x608   : > { %v8694_v51 = vunpack.i.h.bf16 %v8692_v16  ;;  %v8693_v29 = vunpack.i.l.bf16 %v8692_v16  ;;  %v8704_v48 = vunpack.i.h.bf16 %v10016_v7  ;;  %v8703_v34 = vunpack.i.l.bf16 %v10016_v7 }
 0x609   : > { %7764 = vmatmul.mubr.msk.f32.vlgmr.msra.gmra.mrb[10].mxu1 %vm2043_vm9, %v6287_v20 }
 0x60a   : > { %7976 = vmatpush1.bf16.msra.mxu1 %v7975_v11  ;;  %6548 = vmatprep.mubr.f32.mxu1 %v8869_v0  ;;  %v6648_v44 = vsel %vm1412_vm6, %v8684_v21, %v8693_v29  ;;  %v6651_v32 = vsel %vm1412_vm6, %v8679_v53, %v8694_v51  ;;  %v6824_v60 = vsel %vm1594_vm7, %v8703_v34, %v8704_v48 }
 0x60b   : > { %v8707_v5 = vpop.permute.xlu1 %8706  ;;  %v8697_v35 = vpop.permute.xlu0 %8696  ;;  %7977 = vmatprep.subr.bf16.mxu1 %v8879_v47  ;;  %v7985_v36 = vpack.c.bf16 %v6651_v32, %v6648_v44 }
 0x60c   : > { %v8699_v40 = vunpack.i.h.bf16 %v8697_v35  ;;  %v8698_v42 = vunpack.i.l.bf16 %v8697_v35  ;;  %v8708_v39 = vunpack.i.l.bf16 %v8707_v5  ;;  %v8709_v49 = vunpack.i.h.bf16 %v8707_v5 }
 0x60d   : > { %7423 = vmatmul.mubr.msk.f32.vlgmr.msra.gmra.mrb[8].mxu1 %vm2043_vm9, %v6444_v6 }
 0x60e   : > { %7979 = vmatpush3.bf16.msra.mxu1 %v7978_v37  ;;  %7770 = vmatprep.mubr.msk.f32.mxu1 %vm8880_vm10, %v8869_v0  ;;  %v6827_v57 = vsel %vm1594_vm7, %v8698_v42, %v8699_v40  ;;  %v6823_v58 = vsel %vm1594_vm7, %v8708_v39, %v8703_v34  ;;  %v6826_v1 = vsel %vm1594_vm7, %v8709_v49, %v8698_v42 }
 0x60f   : > { %v8722_v43 = vpop.permute.xlu1 %8721  ;;  %v8712_v45 = vpop.permute.xlu0 %8711  ;;  %7981 = vmatprep.subr.bf16.mxu1 %v7980_v31  ;;  %v7987_v61 = vpack.c.bf16 %v6827_v57, %v6824_v60  ;;  %v7989_v56 = vpack.c.bf16 %v6826_v1, %v6823_v58 }
 0x610   : > { %v8714_v3 = vunpack.i.h.bf16 %v8712_v45  ;;  %v8713_v8 = vunpack.i.l.bf16 %v8712_v45  ;;  %v8724_v17 = vunpack.i.h.bf16 %v8722_v43  ;;  %v8723_v18 = vunpack.i.l.bf16 %v8722_v43 }
 0x611   : > { %7771 = vmatmul.mubr.msk.f32.vlgmr.msra.gmra.mrb[10].mxu1 %vm2043_vm9, %v6444_v6 }
 0x612   : > { %7983 = vmatpush1.bf16.msra.mxu1 %v7982_v14  ;;  %6725 = vmatprep.mubr.f32.mxu1 %v8869_v0  ;;  %v6825_v15 = vsel %vm1594_vm7, %v8704_v48, %v8713_v8  ;;  %v6828_v19 = vsel %vm1594_vm7, %v8699_v40, %v8714_v3  ;;  %v7001_v52 = vsel %vm1776_vm8, %v8723_v18, %v8724_v17 }
 0x613   : > { %v8717_v41 = vpop.permute.xlu0 %8716  ;;  %7984 = vmatprep.subr.bf16.mxu1 %v8879_v47  ;;  %v8727_v59 = vpop.permute.xlu1 %8726  ;;  %v7992_v63 = vpack.c.bf16 %v6828_v19, %v6825_v15 }
 0x614   : > { %v8719_v10 = vunpack.i.h.bf16 %v8717_v41  ;;  %v8718_v12 = vunpack.i.l.bf16 %v8717_v41  ;;  %v8728_v20 = vunpack.i.l.bf16 %v8727_v59  ;;  %v8729_v22 = vunpack.i.h.bf16 %v8727_v59 }
 0x615   : > { %7425 = vmatmul.mubr.msk.f32.vlgmr.msra.gmra.mrb[8].mxu1 %vm2043_vm9, %v6629_v55 }
 0x616   : > { %7986 = vmatpush3.bf16.msra.mxu1 %v7985_v36  ;;  %7777 = vmatprep.mubr.msk.f32.mxu1 %vm8880_vm10, %v8869_v0  ;;  %v7004_v13 = vsel %vm1776_vm8, %v8718_v12, %v8719_v10  ;;  %v7000_v4 = vsel %vm1776_vm8, %v8728_v20, %v8723_v18  ;;  %v7003_v53 = vsel %vm1776_vm8, %v8729_v22, %v8718_v12 }
 0x617   : > { %7988 = vmatprep.subr.bf16.mxu1 %v7987_v61  ;;  %v8732_v54 = vpop.permute.xlu0 %8731  ;;  %v7994_v16 = vpack.c.bf16 %v7004_v13, %v7001_v52  ;;  %v7996_v11 = vpack.c.bf16 %v7003_v53, %v7000_v4 }
 0x618   : > { %v8734_v62 = vunpack.i.h.bf16 %v8732_v54  ;;  %v8733_v7 = vunpack.i.l.bf16 %v8732_v54 }
 0x619   : > { %7778 = vmatmul.mubr.msk.f32.vlgmr.msra.gmra.mrb[10].mxu1 %vm2043_vm9, %v6629_v55 }
 0x61a   : > { %7990 = vmatpush1.bf16.msra.mxu1 %v7989_v56  ;;  %6902 = vmatprep.mubr.f32.mxu1 %v8869_v0  ;;  %v7002_v21 = vsel %vm1776_vm8, %v8724_v17, %v8733_v7  ;;  %v7005_v25 = vsel %vm1776_vm8, %v8719_v10, %v8734_v62 }
 0x61b   : > { %7991 = vmatprep.subr.bf16.mxu1 %v8879_v47  ;;  %v7999_v28 = vpack.c.bf16 %v7005_v25, %v7002_v21 }
 0x61d   : > { %7427 = vmatmul.mubr.msk.f32.vlgmr.msra.gmra.mrb[8].mxu1 %vm2043_vm9, %v6806_v9 }
 0x61e   : > { %7993 = vmatpush3.bf16.msra.mxu1 %v7992_v63  ;;  %7784 = vmatprep.mubr.msk.f32.mxu1 %vm8880_vm10, %v8869_v0 }
 0x61f   : > { %7995 = vmatprep.subr.bf16.mxu1 %v7994_v16 }
 0x621   : > { %7785 = vmatmul.mubr.msk.f32.vlgmr.msra.gmra.mrb[10].mxu1 %vm2043_vm9, %v6806_v9 }
 0x622   : > { %7997 = vmatpush1.bf16.msra.mxu1 %v7996_v11  ;;  %7079 = vmatprep.mubr.f32.mxu1 %v8869_v0 }
 0x623   : > { %7998 = vmatprep.subr.bf16.mxu1 %v8879_v47 }
 0x625   : > { %7429 = vmatmul.mubr.msk.f32.vlgmr.msra.gmra.mrb[8].mxu1 %vm2043_vm9, %v6983_v26 }
 0x626   : > { %8000 = vmatpush3.bf16.msra.mxu1 %v7999_v28  ;;  %7791 = vmatprep.mubr.msk.f32.mxu1 %vm8880_vm10, %v8869_v0 }
 0x629   : > { %7792 = vmatmul.mubr.msk.f32.vlgmr.msra.gmra.mrb[10].mxu1 %vm2043_vm9, %v6983_v26 }
 0x6f8   : > { %v7081_v30 = vpop.f32.mrb[8].mxu1 }
 0x6f9   : > { %v7159_v33 = vmul.f32 %v7081_v30, %v9279_v23  ;;  %v7083_v6 = vpop.f32.mrb[9].mxu1 }
 0x6fa   : > { %v7160_v2 = vmul.f32 %v7083_v6, %v9283_v27 }
 0x6fb   : > { %7162 = vst [vmem:[%s309_s23] sm:$0xff] %v7159_v33 }
 0x6fc   : > { %7163 = vst [vmem:[%s309_s23 + $0x8] sm:$0xff] %v7160_v2  ;;  %v7152_v47 = vpop.f32.mrb[10].mxu1 }
 0x6fd   : > { %v7161_v5 = vmul.f32 %v7152_v47, %v9281_v24  ;;  %v7793_v0 = vpop.f32.mrb[11].mxu1 }
 0x6ff   : > { %7164 = vst [vmem:[%s309_s23 + $0x10] sm:$0xff] %v7161_v5 }
 0x700   : > { %8806 = shalt.err (!%p8803_p7)
}
 0x701   : > { %s8807_s16 = scalar_lea.hbm %s10075_s20, 384  ;;  %s8811_s9 = scalar_lea.hbm %s10126_s7, 768 }
 0x702   : > { %p8808_p9 = scmp.ne.s32.totalorder %s10075_s20, %s8807_s16  ;;  %p8812_p0 = scmp.lt.u32.totalorder %s10075_s20, %s10126_s7 }
 0x703   : > { %p8813_p13 = scmp.lt.u32.totalorder %s8811_s9, %s8807_s16  ;;  %p8815_p4 = scmp.lt.u32.totalorder %s8807_s16, %s10075_s20 }
 0x704   : > { %p8809_p2 = pnand %p8808_p9, %p9013_p12 }
 0x705   : > { %p8814_p1 = por %p8813_p13, %p8812_p0 }
 0x706   : > { %p8810_p5 = pneg %p8809_p2 }
 0x707   : > { %p8816_p6 = por %p8815_p4, %p8814_p1 }
 0x709   : > { %p8817_p8 = pnand %p8816_p6, %p8810_p5 }
 0x70b   : > { %8820 = shalt.err (!%p8817_p8)
}
 0x70c   : > { %8188 = dma.vmem_to_hbm [thread:$0]  (%p9013_p12), %s10077_s21, 384, %s10075_s20, %s7166_s28  }
 0x70d PF: > { %s7192_s23 = sand.u32 1, %s8851_s24   ;;  %p10155_p10 = scmp.ne.s32.totalorder %s10140_s8, 0 }
 0x70e   : > { %p10156_p11 = scmp.ge.s32.totalorder %s8863_s27, 2  ;;  %s7193_s11 = scalar_lea.sflag [#allocation5], %s7192_s23 }
 0x710   : > { %p8199_p3 = pnand %p10156_p11, %p10155_p10 }
 0x712   : > { %8846 = dma.done.wait (!%p8199_p3), %s7193_s11, 384  }
 0x713   : > { %8848 = vsyncadd (!%p8199_p3), %s7193_s11, 4294966912  ;;  %p21_p7 = scmp.ge.s32.totalorder %s8978_s13, 4   ;;  %s10157_s24 = smov %s8855_s25 }
 0x714   : > { %s10158_s25 = smov %s8859_s26  ;;  %s10159_s26 = smov %s9009_s18 }
 0x715   : > { %s10160_s27 = smov %s8978_s13  ;;  %23 = sbr.rel (!%p21_p7) target bundleno = 8 (0x8), region = 117 }
 0x71c   :  { %7198 = vsyncpa [#allocation4], 1 }
 0x71d   :  { %7200 = vsyncpa [#allocation4 + $0x1], 1 }
 0x71e   :  { %7201 = vsyncpa [#allocation7], 1 }
 0x71f   :  { %7202 = vsyncpa [#allocation5], 1 }
 0x720   :  { %7204 = vsyncpa [#allocation5 + $0x1], 1 }

</bundles_post_ra>
